<compile_context>
chip_gen: v7x
topology: tpu7x:2x2x1
jax: 0.10.0
libtpu: 0.0.40
codegen_flags: <defaults>
</compile_context>

<pallas_src>
import math

import jax
import jax.numpy as jnp
from jax.experimental import pallas as pl
from jax.experimental.pallas import tpu as pltpu

# Lane widths tried in order: last block dim is a multiple of 128 (unmasked
# lane-dense vst) and as wide as possible.
_LANE_CHOICES = (1024, 512, 256, 128)
# ~1 Mi elements per block (4 MiB f32).  Double-buffered input+output
# footprint <= 16 MiB, within the scoped-VMEM limit below on v5e/v6e/v7x.
_MAX_BLOCK_ELEMS = 1 << 20
# Below this many output bytes, launch + pipeline prologue dominates; XLA's
# fused elementwise multiply is already at roofline.
_SMALL_BYTES = 512 * 1024


def _scale_kernel(value_ref, x_ref, o_ref):
    # value_ref: (1,) SMEM scalar (scalar prefetch; f32 or i32).
    # x_ref:     VMEM tile in the ORIGINAL input dtype (promotion fused here).
    # o_ref:     VMEM tile in the promoted output dtype.
    v = value_ref[0]
    o_ref[...] = (x_ref[...].astype(v.dtype) * v).astype(o_ref.dtype)


def _dtypes_for(x_dtype, value):
    """PyTorch-style promotion + the in-kernel compute dtype for the scalar."""
    out_dtype = jnp.result_type(x_dtype, value)
    if jnp.issubdtype(out_dtype, jnp.floating):
        compute_dtype = jnp.float32   # multiply at f32, round product once
    elif jnp.issubdtype(out_dtype, jnp.integer):
        compute_dtype = jnp.int32
    else:
        compute_dtype = out_dtype
    return out_dtype, compute_dtype


def _xla_scale(x, value, out_dtype, compute_dtype):
    v = jnp.asarray(value, dtype=compute_dtype)
    return (x.astype(compute_dtype) * v).astype(out_dtype)


def _scale_2d(x2, value_arr, out_dtype, *, donate):
    rows, lanes = x2.shape
    row_cap = _MAX_BLOCK_ELEMS // lanes            # multiple of 8 (lanes<=1024)
    block_rows = rows if rows <= row_cap else row_cap
    num_blocks = pl.cdiv(rows, block_rows)         # ragged last block is OK
    numel = rows * lanes
    bytes_accessed = numel * (x2.dtype.itemsize + jnp.dtype(out_dtype).itemsize)

    kwargs = {}
    if donate and x2.dtype == jnp.dtype(out_dtype):
        # arg 0 is the scalar-prefetch value, arg 1 is the tensor input.
        kwargs["input_output_aliases"] = {1: 0}

    return pl.pallas_call(
        _scale_kernel,
        out_shape=jax.ShapeDtypeStruct((rows, lanes), out_dtype),
        grid_spec=pltpu.PrefetchScalarGridSpec(
            num_scalar_prefetch=1,
            grid=(num_blocks,),
            # index_maps receive the scalar-prefetch ref as a trailing arg.
            in_specs=[pl.BlockSpec((block_rows, lanes), lambda i, v: (i, 0))],
            out_specs=pl.BlockSpec((block_rows, lanes), lambda i, v: (i, 0)),
        ),
        compiler_params=pltpu.CompilerParams(
            dimension_semantics=("parallel",),   # megacore sharding on v7x
            vmem_limit_bytes=32 << 20,           # v5e default (16 MiB) guard
        ),
        cost_estimate=pl.CostEstimate(
            flops=numel, transcendentals=0, bytes_accessed=bytes_accessed),
        **kwargs,
    )(value_arr, x2)


def scale(x: jax.Array, value, *, donate: bool = False) -> jax.Array:
    """Pallas equivalent of Scale(value)(x) == x * value."""
    orig_shape = x.shape
    out_dtype, compute_dtype = _dtypes_for(x.dtype, value)
    numel = math.prod(orig_shape)

    # Small tensors: XLA's fused scalar multiply already sits at roofline;
    # pallas_call launch + pipeline prologue would dominate.
    if numel * jnp.dtype(out_dtype).itemsize < _SMALL_BYTES:
        return _xla_scale(x, value, out_dtype, compute_dtype)

    lanes = next((l for l in _LANE_CHOICES if numel % l == 0), None)
    if lanes is None:
        # TODO(synk): handle element counts not divisible by 128 with masked
        # last-block stores inside the kernel; any lane-dense repacking here
        # (pad/slice/concat) would add a full extra HBM pass, which is slower
        # than XLA's fused elementwise multiply for this mem-bound op.
        return _xla_scale(x, value, out_dtype, compute_dtype)

    # Runtime SMEM scalar -> changing `value` does not recompile.
    value_arr = jnp.asarray(value, dtype=compute_dtype).reshape(1)

    x2 = x.reshape(numel // lanes, lanes)          # metadata-only reshape
    out2 = _scale_2d(x2, value_arr, out_dtype, donate=donate)
    return out2.reshape(orig_shape)


if __name__ == "__main__":
    value = 2.5  # "module parameter" (plain float in Scale.__init__)

    # 1) Small NCHW input consistent with the module: small-input fast path.
    x_small = jax.random.normal(jax.random.PRNGKey(0), (2, 4, 16, 16),
                                dtype=jnp.float32)
    y_small = scale(x_small, value)
    jax.block_until_ready(y_small)
    assert y_small.shape == x_small.shape and y_small.dtype == jnp.float32
    assert jnp.allclose(y_small, x_small * value, atol=1e-6, rtol=1e-6)

    # 2) Larger f32 input: Pallas kernel path with a ragged last row-block
    #    (1040 rows of 1024 lanes, 1024-row blocks, grid=2) -- no padding.
    x_big = jax.random.normal(jax.random.PRNGKey(1), (8, 16, 64, 130),
                              dtype=jnp.float32)
    y_big = scale(x_big, value)
    jax.block_until_ready(y_big)
    assert y_big.dtype == jnp.float32
    assert jnp.allclose(y_big, x_big * value, atol=1e-6, rtol=1e-6)

    # 3) bf16 input: multiply at f32 inside the kernel, round once to bf16.
    x_bf16 = jax.random.normal(jax.random.PRNGKey(2), (8, 16, 32, 128),
                               dtype=jnp.bfloat16)
    y_bf16 = scale(x_bf16, value)
    jax.block_until_ready(y_bf16)
    assert y_bf16.dtype == jnp.bfloat16
    ref_bf16 = (x_bf16.astype(jnp.float32) * value).astype(jnp.bfloat16)
    assert jnp.allclose(y_bf16.astype(jnp.float32), ref_bf16.astype(jnp.float32),
                        atol=1e-2, rtol=1e-2)

    # 4) int8 input * float scalar: promotion fused into the kernel
    #    (int8 DMA'd at 1 B/elem, cast to f32 in VMEM, f32 output).
    x_i8 = jax.random.randint(jax.random.PRNGKey(3), (4, 16, 64, 128),
                              -100, 100, dtype=jnp.int32).astype(jnp.int8)
    y_i8 = scale(x_i8, value)
    jax.block_until_ready(y_i8)
    assert y_i8.dtype == jnp.float32
    assert jnp.allclose(y_i8, x_i8.astype(jnp.float32) * value,
                        atol=1e-5, rtol=1e-5)

    print("KERNEL_OK")
</pallas_src>

<mosaic_0001>
module attributes {stable_mosaic.version = 11 : i64} {
  func.func @_scale_kernel(%arg0: i32, %arg1: memref<1xf32, #tpu.memory_space<smem>>, %arg2: memref<1024x1024xf32, #tpu.memory_space<vmem>>, %arg3: memref<1024x1024xf32, #tpu.memory_space<vmem>>) attributes {dimension_semantics = [#tpu.dimension_semantics<parallel>], iteration_bounds = array<i64: 2>, scalar_prefetch = 1 : i64, scratch_operands = 0 : i64, tpu.core_type = #tpu.core_type<tc>, window_params = [{transform_indices = @transform_0, window_bounds = array<i64: 1024, 1024>}, {transform_indices = @transform_1, window_bounds = array<i64: 1024, 1024>}]} {
    %c0 = arith.constant 0 : index
    %0 = memref.load %arg1[%c0] : memref<1xf32, #tpu.memory_space<smem>>
    %c0_0 = arith.constant 0 : index
    %c0_1 = arith.constant 0 : index
    %1 = vector.load %arg2[%c0_0, %c0_1] : memref<1024x1024xf32, #tpu.memory_space<vmem>>, vector<1024x1024xf32>
    %2 = vector.broadcast %0 : f32 to vector<1024x1024xf32>
    %3 = arith.mulf %1, %2 : vector<1024x1024xf32>
    %c0_2 = arith.constant 0 : index
    %c0_3 = arith.constant 0 : index
    %4 = vector.load %arg3[%c0_2, %c0_3] : memref<1024x1024xf32, #tpu.memory_space<vmem>>, vector<1024x1024xf32>
    tpu.vector_store %arg3[%c0_2, %c0_3], %3 {strides = array<i32>} : memref<1024x1024xf32, #tpu.memory_space<vmem>>, vector<1024x1024xf32>,
    return
  }
  func.func @transform_0(%arg0: i32, %arg1: memref<1xf32, #tpu.memory_space<smem>>) -> (i32, i32) {
    %c0_i32 = arith.constant 0 : i32
    %c0_i32_0 = arith.constant 0 : i32
    return %arg0, %c0_i32 : i32, i32
  }
  func.func @transform_1(%arg0: i32, %arg1: memref<1xf32, #tpu.memory_space<smem>>) -> (i32, i32) {
    %c0_i32 = arith.constant 0 : i32
    %c0_i32_0 = arith.constant 0 : i32
    return %arg0, %c0_i32 : i32, i32
  }
}

</mosaic_0001>

<bundles_post_ra>
// kernel: tpu_custom_call.1
= control target key start
LH: loop header
LB: loop body
LE: loop exit
PB: predicated region body
PF: predicated region fallthrough
CT: control target
= control target key end

     0   :  { %s6770_s0 = inlined_call_operand.<no memory space> [shape: f32[1], index: 0, kind: input, shape index: {}]   ;;  %s6771_s1 = inlined_call_operand.hbm [shape: f32[1040,1024], index: 1, kind: input, shape index: {}]   ;;  %s6772_s2 = inlined_call_operand.hbm [shape: f32[1040,1024], index: 2, kind: output, shape index: {}]  }
   0x1   :  { %7 = sst [smem:[#allocation3]] %s6770_s0 }
   0x2   :  { %8 = vsyncpa [#allocation5], 0 }
   0x3   :  { %10 = vsyncpa [#allocation5 + $0x1], 0 }
   0x4   :  { %11 = vsyncpa [#allocation6], 0 }
   0x5   :  { %13 = vsyncpa [#allocation6 + $0x1], 0  ;;  %s3521_s11 = smov 0   ;;  %s3523_s12 = smov 0  }
   0x6   :  { %s3525_s13 = smov 0   ;;  %s3527_s14 = smov 0  }
   0x7 LB: > { %s3542_s0 = sadd.s32 4294967295, %s3495_s14   ;;  %s3326_s15 = sadd.s32 4294967294, %s3495_s14   ;;  %s3495_s14 = sphi %s3527_s14, %s6782_s14   ;;  %s3491_s13 = sphi %s3525_s13, %s6781_s13   ;;  %s3487_s12 = sphi %s3523_s12, %s6780_s12   ;;  %s3483_s11 = sphi %s3521_s11, %s6779_s11  }
   0x8   : > { %s3546_s16 = sadd.s32 1, %s3495_s14   ;;  %s26_s17 = sadd.s32 1, %s3491_s13 }
   0x9   : > { %s23_s18 = ssub.s32 %s3495_s14, %s3546_s16  ;;  %p33_p0 = scmp.ne.s32.totalorder %s3491_s13, %s3487_s12 }
   0xa   : > { %p24_p1 = scmp.eq.s32.totalorder %s23_s18, 0  ;;  %p34_p2 = scmp.eq.s32.totalorder %s3495_s14, 0 }
   0xb   : > { %p39_p3 = scmp.ne.s32.totalorder %s3487_s12, %s3483_s11  ;;  %p40_p4 = scmp.eq.s32.totalorder %s3542_s0, 0 }
   0xc   : > { %s3558_s19 = scalar_select %p24_p1, %s3491_s13, %s26_s17  }
   0xd   : > { %p35_p5 = por %p34_p2, %p33_p0  ;;  %p3560_p6 = por %p40_p4, %p39_p3 }
   0xe   : > { %p63_p7 = scmp.eq.s32.totalorder %s3542_s0, 1  ;;  %p69_p8 = scmp.eq.s32.totalorder %s3326_s15, 1 }
   0xf   : > { %p6773_p11 = scmp.ge.s32.totalorder %s3495_s14, 2 }
  0x10   : > { %p3565_p9 = por %p63_p7, %p33_p0  ;;  %p3569_p10 = por %p69_p8, %p39_p3 }
  0x11   : > { %85 = sbr.rel (%p6773_p11) target bundleno = 59 (0x3b), region = 16 }
  0x12   : > { %s6776_s22 = scalar_select %p3569_p10, 1, 0 }
  0x18   : > { %88 = sbr.rel (!%p35_p5) target bundleno = 59 (0x3b), region = 20  ;;  %s89_s23 = sand.u32 (%p35_p5), 1, %s3491_s13  }
  0x19   : > { %s3330_s24 = sshll.u32 (%p35_p5), %s3495_s14, 7  ;;  %s3329_s25 = sshll.u32 (%p35_p5), %s89_s23, 13 }
  0x1a   : > { %s95_s26 = ssub.s32 (%p35_p5), 130, %s3330_s24  ;;  %s3581_s29 = scalar_lea.sflag (%p35_p5), [#allocation5], %s89_s23 }
  0x1b   : > { %p96_p12 = scmp.lt.s32.totalorder (%p35_p5), %s95_s26, 128  ;;  %s93_s30 = scalar_lea.vmem (%p35_p5), [#allocation4], %s3329_s25 }
  0x1f   : > { %s6784_s26 = smov (!%p96_p12, %s95_s26), 128 }
  0x20   : > { %s3578_s27 = sshll.u32 %s6784_s26, 10 }
  0x21   : > { %s101_s28 = ssub.s32 131072, %s3578_s27 }
  0x22   : > { %102 = vsyncadd %s3581_s29, %s101_s28  ;;  %p3333_p13 = scmp.ne.s32.totalorder %s3578_s27, 0  ;;  %s3354_s3 = sshll.u32 %s3495_s14, 17 }
  0x23   : > { %s3589_s6 = scalar_lea.hbm %s6771_s1, %s3354_s3  ;;  %s108_s7 = sshll.u32 %s93_s30, 4  ;;  %s3591_s7 = int_to_ptr.vmem [resolvable:$true] %s108_s7 }
  0x24   : > { %s3401_s8 = scalar_lea.hbm %s3589_s6, %s3578_s27  ;;  %s3405_s15 = scalar_lea.hbm %s6771_s1, 133120 }
  0x25   : > { %p3402_p0 = scmp.ne.s32.totalorder %s3589_s6, %s3401_s8  ;;  %p3406_p3 = scmp.lt.u32.totalorder %s3589_s6, %s6771_s1 }
  0x26   : > { %p3407_p4 = scmp.lt.u32.totalorder %s3405_s15, %s3401_s8  ;;  %p3409_p7 = scmp.lt.u32.totalorder %s3401_s8, %s3589_s6 }
  0x27   : > { %p3403_p1 = pnand %p3402_p0, %p3333_p13 }
  0x28   : > { %p3408_p5 = por %p3407_p4, %p3406_p3 }
  0x29   : > { %p3404_p2 = pneg %p3403_p1 }
  0x2a   : > { %p3410_p8 = por %p3409_p7, %p3408_p5 }
  0x2c   : > { %p3411_p12 = pnand %p3410_p8, %p3404_p2 }
  0x2e   : > { %3414 = shalt.err (!%p3411_p12)
}
  0x2f   : > { %s3415_s23 = scalar_lea.vmem %s3591_s7, %s3578_s27  ;;  %s3497_s24 = smov [#allocation4]  }
  0x30   : > { %p3416_p0 = scmp.ne.s32.totalorder %s3591_s7, %s3415_s23  ;;  %s3419_s25 = sshll.u32 %s3497_s24, 4  ;;  %s3420_s25 = int_to_ptr.vmem [resolvable:$false] %s3419_s25 }
  0x31   : > { %s3421_s26 = scalar_lea.vmem %s3420_s25, 262144  ;;  %p3422_p10 = scmp.lt.s32.totalorder %s3591_s7, %s3420_s25 }
  0x32   : > { %p3417_p1 = pnand %p3416_p0, %p3333_p13  ;;  %p3423_p3 = scmp.lt.s32.totalorder %s3421_s26, %s3415_s23 }
  0x34   : > { %p3418_p11 = pneg %p3417_p1  ;;  %p3424_p4 = por %p3423_p3, %p3422_p10 }
  0x36   : > { %p3425_p5 = pnand %p3424_p4, %p3418_p11 }
  0x38   : > { %3428 = shalt.err (!%p3425_p5)
}
  0x39   : > { %s3498_s28 = smov 1024   ;;  %s3499_s30 = smov 64  }
  0x3a   : > { %114 = dma.hbm_to_vmem [thread:$0]  (%p3333_p13), %s3589_s6, %s3578_s27, %s3591_s7, %s3581_s29, %s3498_s28, %s3498_s28, %s3499_s30  }
  0x3b PF: > { %p3338_p2 = scmp.ge.s32.totalorder %s3495_s14, 1  ;;  %p116_p7 = scmp.lt.s32.totalorder %s3495_s14, 3 }
  0x3d   : > { %p117_p8 = pnand %p3338_p2, %p116_p7 }
  0x3e   : > { %s3621_s3 = sand.u32 (!%p117_p8), 1, %s3487_s12  }
  0x3f   : > { %120 = sbr.rel (%p117_p8) target bundleno = 620 (0x26c), region = 24  ;;  %s3339_s4 = sshll.u32 (!%p117_p8), %s3621_s3, 13 }
  0x40   : > { %s123_s5 = scalar_lea.sflag (!%p117_p8), [#allocation5], %s3621_s3  ;;  %s3625_s8 = scalar_lea.vmem (!%p117_p8), [#allocation4], %s3339_s4 }
  0x46   : > { %3474 = dma.done.wait (%p3560_p6), %s123_s5, 131072  }
  0x47   : > { %3476 = vsyncadd (%p3560_p6), %s123_s5, 4294836224  ;;  %s157_s27 = sld [smem:[#allocation3]]  ;;  %v158_v0 = vld [vmem:[%s3625_s8] sm:$0xff]  ;;  %v159_v2 = vld [vmem:[%s3625_s8 + $0x8] sm:$0xff]  ;;  %s3648_s20 = scalar_lea.vmem [#allocation7], %s3339_s4 }
  0x48   : > { %v160_v3 = vld [vmem:[%s3625_s8 + $0x10] sm:$0xff]  ;;  %v161_v7 = vld [vmem:[%s3625_s8 + $0x18] sm:$0xff]  ;;  %v162_v8 = vld [vmem:[%s3625_s8 + $0x20] sm:$0xff]  ;;  %s3232_s29 = scalar_lea.sflag [#allocation6], %s3621_s3  ;;  %s3342_s6 = sshll.u32 (%p3565_p9), %s3542_s0, 7 }
  0x49   : > { %v163_v9 = vld [vmem:[%s3625_s8 + $0x28] sm:$0xff]  ;;  %v164_v13 = vld [vmem:[%s3625_s8 + $0x30] sm:$0xff]  ;;  %v165_v14 = vld [vmem:[%s3625_s8 + $0x38] sm:$0xff]  ;;  %s3240_s7 = ssub.s32 (%p3565_p9), 130, %s3342_s6 }
  0x4a   : > { %v166_v15 = vld [vmem:[%s3625_s8 + $0x40] sm:$0xff]  ;;  %v167_v19 = vld [vmem:[%s3625_s8 + $0x48] sm:$0xff]  ;;  %v168_v20 = vld [vmem:[%s3625_s8 + $0x50] sm:$0xff]  ;;  %p3241_p6 = scmp.lt.s32.totalorder (%p3565_p9), %s3240_s7, 128 }
  0x4b   : > { %v169_v21 = vld [vmem:[%s3625_s8 + $0x58] sm:$0xff]  ;;  %v170_v25 = vld [vmem:[%s3625_s8 + $0x60] sm:$0xff]  ;;  %v171_v26 = vld [vmem:[%s3625_s8 + $0x68] sm:$0xff] }
  0x4c   : > { %v172_v27 = vld [vmem:[%s3625_s8 + $0x70] sm:$0xff]  ;;  %v173_v31 = vld [vmem:[%s3625_s8 + $0x78] sm:$0xff]  ;;  %v174_v32 = vld [vmem:[%s3625_s8 + $0x80] sm:$0xff] }
  0x4d   : > { %v3632_v1 = vstv %s157_s27  ;;  %v175_v33 = vld [vmem:[%s3625_s8 + $0x88] sm:$0xff]  ;;  %v176_v37 = vld [vmem:[%s3625_s8 + $0x90] sm:$0xff]  ;;  %v177_v38 = vld [vmem:[%s3625_s8 + $0x98] sm:$0xff] }
  0x4e   : > { %v1183_v4 = vmul.f32 %v3632_v1, %v158_v0  ;;  %v1184_v5 = vmul.f32 %v3632_v1, %v159_v2  ;;  %v1185_v6 = vmul.f32 %v3632_v1, %v160_v3  ;;  %v1186_v10 = vmul.f32 %v3632_v1, %v161_v7  ;;  %v178_v39 = vld [vmem:[%s3625_s8 + $0xa0] sm:$0xff]  ;;  %v179_v43 = vld [vmem:[%s3625_s8 + $0xa8] sm:$0xff]  ;;  %v180_v44 = vld [vmem:[%s3625_s8 + $0xb0] sm:$0xff] }
  0x4f   : > { %v1187_v11 = vmul.f32 %v3632_v1, %v162_v8  ;;  %v1188_v12 = vmul.f32 %v3632_v1, %v163_v9  ;;  %v1189_v16 = vmul.f32 %v3632_v1, %v164_v13  ;;  %v1190_v17 = vmul.f32 %v3632_v1, %v165_v14  ;;  %v181_v45 = vld [vmem:[%s3625_s8 + $0xb8] sm:$0xff]  ;;  %v182_v49 = vld [vmem:[%s3625_s8 + $0xc0] sm:$0xff]  ;;  %v183_v50 = vld [vmem:[%s3625_s8 + $0xc8] sm:$0xff] }
  0x50   : > { %2207 = vst [vmem:[%s3648_s20] sm:$0xff] %v1183_v4  ;;  %2208 = vst [vmem:[%s3648_s20 + $0x8] sm:$0xff] %v1184_v5  ;;  %v1191_v18 = vmul.f32 %v3632_v1, %v166_v15  ;;  %v1192_v22 = vmul.f32 %v3632_v1, %v167_v19  ;;  %v1193_v23 = vmul.f32 %v3632_v1, %v168_v20  ;;  %v184_v51 = vld [vmem:[%s3625_s8 + $0xd0] sm:$0xff]  ;;  %v185_v55 = vld [vmem:[%s3625_s8 + $0xd8] sm:$0xff] }
  0x51   : > { %2209 = vst [vmem:[%s3648_s20 + $0x10] sm:$0xff] %v1185_v6  ;;  %2210 = vst [vmem:[%s3648_s20 + $0x18] sm:$0xff] %v1186_v10  ;;  %v1194_v24 = vmul.f32 %v3632_v1, %v169_v21  ;;  %v1195_v28 = vmul.f32 %v3632_v1, %v170_v25  ;;  %v1196_v29 = vmul.f32 %v3632_v1, %v171_v26  ;;  %v186_v56 = vld [vmem:[%s3625_s8 + $0xe0] sm:$0xff]  ;;  %v187_v57 = vld [vmem:[%s3625_s8 + $0xe8] sm:$0xff] }
  0x52   : > { %2211 = vst [vmem:[%s3648_s20 + $0x20] sm:$0xff] %v1187_v11  ;;  %2212 = vst [vmem:[%s3648_s20 + $0x28] sm:$0xff] %v1188_v12  ;;  %v1197_v30 = vmul.f32 %v3632_v1, %v172_v27  ;;  %v1198_v34 = vmul.f32 %v3632_v1, %v173_v31  ;;  %v1199_v35 = vmul.f32 %v3632_v1, %v174_v32  ;;  %v188_v61 = vld [vmem:[%s3625_s8 + $0xf0] sm:$0xff]  ;;  %v189_v62 = vld [vmem:[%s3625_s8 + $0xf8] sm:$0xff] }
  0x53   : > { %2213 = vst [vmem:[%s3648_s20 + $0x30] sm:$0xff] %v1189_v16  ;;  %2214 = vst [vmem:[%s3648_s20 + $0x38] sm:$0xff] %v1190_v17  ;;  %v1200_v36 = vmul.f32 %v3632_v1, %v175_v33  ;;  %v1201_v40 = vmul.f32 %v3632_v1, %v176_v37  ;;  %v1202_v41 = vmul.f32 %v3632_v1, %v177_v38  ;;  %v190_v63 = vld [vmem:[%s3625_s8 + $0x100] sm:$0xff]  ;;  %v191_v4 = vld [vmem:[%s3625_s8 + $0x108] sm:$0xff] }
  0x54   : > { %2215 = vst [vmem:[%s3648_s20 + $0x40] sm:$0xff] %v1191_v18  ;;  %2216 = vst [vmem:[%s3648_s20 + $0x48] sm:$0xff] %v1192_v22  ;;  %v1203_v42 = vmul.f32 %v3632_v1, %v178_v39  ;;  %v1204_v46 = vmul.f32 %v3632_v1, %v179_v43  ;;  %v1205_v47 = vmul.f32 %v3632_v1, %v180_v44  ;;  %v192_v5 = vld [vmem:[%s3625_s8 + $0x110] sm:$0xff]  ;;  %v193_v6 = vld [vmem:[%s3625_s8 + $0x118] sm:$0xff] }
  0x55   : > { %2217 = vst [vmem:[%s3648_s20 + $0x50] sm:$0xff] %v1193_v23  ;;  %2218 = vst [vmem:[%s3648_s20 + $0x58] sm:$0xff] %v1194_v24  ;;  %v1206_v48 = vmul.f32 %v3632_v1, %v181_v45  ;;  %v1207_v52 = vmul.f32 %v3632_v1, %v182_v49  ;;  %v1208_v53 = vmul.f32 %v3632_v1, %v183_v50  ;;  %v194_v10 = vld [vmem:[%s3625_s8 + $0x120] sm:$0xff]  ;;  %v195_v11 = vld [vmem:[%s3625_s8 + $0x128] sm:$0xff] }
  0x56   : > { %2219 = vst [vmem:[%s3648_s20 + $0x60] sm:$0xff] %v1195_v28  ;;  %2220 = vst [vmem:[%s3648_s20 + $0x68] sm:$0xff] %v1196_v29  ;;  %v1209_v54 = vmul.f32 %v3632_v1, %v184_v51  ;;  %v1210_v58 = vmul.f32 %v3632_v1, %v185_v55  ;;  %v1211_v59 = vmul.f32 %v3632_v1, %v186_v56  ;;  %v196_v12 = vld [vmem:[%s3625_s8 + $0x130] sm:$0xff]  ;;  %v197_v16 = vld [vmem:[%s3625_s8 + $0x138] sm:$0xff] }
  0x57   : > { %2221 = vst [vmem:[%s3648_s20 + $0x70] sm:$0xff] %v1197_v30  ;;  %2222 = vst [vmem:[%s3648_s20 + $0x78] sm:$0xff] %v1198_v34  ;;  %v1212_v60 = vmul.f32 %v3632_v1, %v187_v57  ;;  %v1213_v0 = vmul.f32 %v3632_v1, %v188_v61  ;;  %v1214_v2 = vmul.f32 %v3632_v1, %v189_v62  ;;  %v198_v17 = vld [vmem:[%s3625_s8 + $0x140] sm:$0xff]  ;;  %v199_v18 = vld [vmem:[%s3625_s8 + $0x148] sm:$0xff] }
  0x58   : > { %2223 = vst [vmem:[%s3648_s20 + $0x80] sm:$0xff] %v1199_v35  ;;  %2224 = vst [vmem:[%s3648_s20 + $0x88] sm:$0xff] %v1200_v36  ;;  %v1215_v3 = vmul.f32 %v3632_v1, %v190_v63  ;;  %v1216_v7 = vmul.f32 %v3632_v1, %v191_v4  ;;  %v1217_v8 = vmul.f32 %v3632_v1, %v192_v5  ;;  %v200_v22 = vld [vmem:[%s3625_s8 + $0x150] sm:$0xff]  ;;  %v201_v23 = vld [vmem:[%s3625_s8 + $0x158] sm:$0xff] }
  0x59   : > { %2225 = vst [vmem:[%s3648_s20 + $0x90] sm:$0xff] %v1201_v40  ;;  %2226 = vst [vmem:[%s3648_s20 + $0x98] sm:$0xff] %v1202_v41  ;;  %v1218_v9 = vmul.f32 %v3632_v1, %v193_v6  ;;  %v1219_v13 = vmul.f32 %v3632_v1, %v194_v10  ;;  %v1220_v14 = vmul.f32 %v3632_v1, %v195_v11  ;;  %v202_v24 = vld [vmem:[%s3625_s8 + $0x160] sm:$0xff]  ;;  %v203_v28 = vld [vmem:[%s3625_s8 + $0x168] sm:$0xff] }
  0x5a   : > { %2227 = vst [vmem:[%s3648_s20 + $0xa0] sm:$0xff] %v1203_v42  ;;  %2228 = vst [vmem:[%s3648_s20 + $0xa8] sm:$0xff] %v1204_v46  ;;  %v1221_v15 = vmul.f32 %v3632_v1, %v196_v12  ;;  %v1222_v19 = vmul.f32 %v3632_v1, %v197_v16  ;;  %v1223_v20 = vmul.f32 %v3632_v1, %v198_v17  ;;  %v204_v29 = vld [vmem:[%s3625_s8 + $0x170] sm:$0xff]  ;;  %v205_v30 = vld [vmem:[%s3625_s8 + $0x178] sm:$0xff] }
  0x5b   : > { %2229 = vst [vmem:[%s3648_s20 + $0xb0] sm:$0xff] %v1205_v47  ;;  %2230 = vst [vmem:[%s3648_s20 + $0xb8] sm:$0xff] %v1206_v48  ;;  %v1224_v21 = vmul.f32 %v3632_v1, %v199_v18  ;;  %v1225_v25 = vmul.f32 %v3632_v1, %v200_v22  ;;  %v1226_v26 = vmul.f32 %v3632_v1, %v201_v23  ;;  %v206_v34 = vld [vmem:[%s3625_s8 + $0x180] sm:$0xff]  ;;  %v207_v35 = vld [vmem:[%s3625_s8 + $0x188] sm:$0xff] }
  0x5c   : > { %2231 = vst [vmem:[%s3648_s20 + $0xc0] sm:$0xff] %v1207_v52  ;;  %2232 = vst [vmem:[%s3648_s20 + $0xc8] sm:$0xff] %v1208_v53  ;;  %v1227_v27 = vmul.f32 %v3632_v1, %v202_v24  ;;  %v1228_v31 = vmul.f32 %v3632_v1, %v203_v28  ;;  %v1229_v32 = vmul.f32 %v3632_v1, %v204_v29  ;;  %v208_v36 = vld [vmem:[%s3625_s8 + $0x190] sm:$0xff]  ;;  %v209_v40 = vld [vmem:[%s3625_s8 + $0x198] sm:$0xff] }
  0x5d   : > { %2233 = vst [vmem:[%s3648_s20 + $0xd0] sm:$0xff] %v1209_v54  ;;  %2234 = vst [vmem:[%s3648_s20 + $0xd8] sm:$0xff] %v1210_v58  ;;  %v1230_v33 = vmul.f32 %v3632_v1, %v205_v30  ;;  %v1231_v37 = vmul.f32 %v3632_v1, %v206_v34  ;;  %v1232_v38 = vmul.f32 %v3632_v1, %v207_v35  ;;  %v210_v41 = vld [vmem:[%s3625_s8 + $0x1a0] sm:$0xff]  ;;  %v211_v42 = vld [vmem:[%s3625_s8 + $0x1a8] sm:$0xff] }
  0x5e   : > { %2235 = vst [vmem:[%s3648_s20 + $0xe0] sm:$0xff] %v1211_v59  ;;  %2236 = vst [vmem:[%s3648_s20 + $0xe8] sm:$0xff] %v1212_v60  ;;  %v1233_v39 = vmul.f32 %v3632_v1, %v208_v36  ;;  %v1234_v43 = vmul.f32 %v3632_v1, %v209_v40  ;;  %v1235_v44 = vmul.f32 %v3632_v1, %v210_v41  ;;  %v212_v46 = vld [vmem:[%s3625_s8 + $0x1b0] sm:$0xff]  ;;  %v213_v47 = vld [vmem:[%s3625_s8 + $0x1b8] sm:$0xff] }
  0x5f   : > { %2237 = vst [vmem:[%s3648_s20 + $0xf0] sm:$0xff] %v1213_v0  ;;  %2238 = vst [vmem:[%s3648_s20 + $0xf8] sm:$0xff] %v1214_v2  ;;  %v1236_v45 = vmul.f32 %v3632_v1, %v211_v42  ;;  %v214_v48 = vld [vmem:[%s3625_s8 + $0x1c0] sm:$0xff]  ;;  %v1237_v49 = vmul.f32 %v3632_v1, %v212_v46  ;;  %v1238_v50 = vmul.f32 %v3632_v1, %v213_v47  ;;  %v215_v52 = vld [vmem:[%s3625_s8 + $0x1c8] sm:$0xff] }
  0x60   : > { %2239 = vst [vmem:[%s3648_s20 + $0x100] sm:$0xff] %v1215_v3  ;;  %2240 = vst [vmem:[%s3648_s20 + $0x108] sm:$0xff] %v1216_v7  ;;  %v1239_v51 = vmul.f32 %v3632_v1, %v214_v48  ;;  %v216_v53 = vld [vmem:[%s3625_s8 + $0x1d0] sm:$0xff]  ;;  %v217_v54 = vld [vmem:[%s3625_s8 + $0x1d8] sm:$0xff]  ;;  %v1240_v55 = vmul.f32 %v3632_v1, %v215_v52 }
  0x61   : > { %2241 = vst [vmem:[%s3648_s20 + $0x110] sm:$0xff] %v1217_v8  ;;  %2242 = vst [vmem:[%s3648_s20 + $0x118] sm:$0xff] %v1218_v9  ;;  %v1241_v56 = vmul.f32 %v3632_v1, %v216_v53  ;;  %v1242_v57 = vmul.f32 %v3632_v1, %v217_v54  ;;  %v218_v58 = vld [vmem:[%s3625_s8 + $0x1e0] sm:$0xff]  ;;  %v219_v59 = vld [vmem:[%s3625_s8 + $0x1e8] sm:$0xff] }
  0x62   : > { %2243 = vst [vmem:[%s3648_s20 + $0x120] sm:$0xff] %v1219_v13  ;;  %2244 = vst [vmem:[%s3648_s20 + $0x128] sm:$0xff] %v1220_v14  ;;  %v220_v60 = vld [vmem:[%s3625_s8 + $0x1f0] sm:$0xff]  ;;  %v1243_v61 = vmul.f32 %v3632_v1, %v218_v58  ;;  %v1244_v62 = vmul.f32 %v3632_v1, %v219_v59  ;;  %v221_v0 = vld [vmem:[%s3625_s8 + $0x1f8] sm:$0xff] }
  0x63   : > { %2245 = vst [vmem:[%s3648_s20 + $0x130] sm:$0xff] %v1221_v15  ;;  %2246 = vst [vmem:[%s3648_s20 + $0x138] sm:$0xff] %v1222_v19  ;;  %v1245_v63 = vmul.f32 %v3632_v1, %v220_v60  ;;  %v222_v2 = vld [vmem:[%s3625_s8 + $0x200] sm:$0xff]  ;;  %v223_v3 = vld [vmem:[%s3625_s8 + $0x208] sm:$0xff]  ;;  %v1246_v4 = vmul.f32 %v3632_v1, %v221_v0 }
  0x64   : > { %2247 = vst [vmem:[%s3648_s20 + $0x140] sm:$0xff] %v1223_v20  ;;  %2248 = vst [vmem:[%s3648_s20 + $0x148] sm:$0xff] %v1224_v21  ;;  %v1247_v5 = vmul.f32 %v3632_v1, %v222_v2  ;;  %v1248_v6 = vmul.f32 %v3632_v1, %v223_v3  ;;  %v224_v7 = vld [vmem:[%s3625_s8 + $0x210] sm:$0xff]  ;;  %v225_v8 = vld [vmem:[%s3625_s8 + $0x218] sm:$0xff] }
  0x65   : > { %2249 = vst [vmem:[%s3648_s20 + $0x150] sm:$0xff] %v1225_v25  ;;  %2250 = vst [vmem:[%s3648_s20 + $0x158] sm:$0xff] %v1226_v26  ;;  %v226_v9 = vld [vmem:[%s3625_s8 + $0x220] sm:$0xff]  ;;  %v1249_v10 = vmul.f32 %v3632_v1, %v224_v7  ;;  %v1250_v11 = vmul.f32 %v3632_v1, %v225_v8  ;;  %v227_v13 = vld [vmem:[%s3625_s8 + $0x228] sm:$0xff] }
  0x66   : > { %2251 = vst [vmem:[%s3648_s20 + $0x160] sm:$0xff] %v1227_v27  ;;  %2252 = vst [vmem:[%s3648_s20 + $0x168] sm:$0xff] %v1228_v31  ;;  %v1251_v12 = vmul.f32 %v3632_v1, %v226_v9  ;;  %v228_v14 = vld [vmem:[%s3625_s8 + $0x230] sm:$0xff]  ;;  %v229_v15 = vld [vmem:[%s3625_s8 + $0x238] sm:$0xff]  ;;  %v1252_v16 = vmul.f32 %v3632_v1, %v227_v13 }
  0x67   : > { %2253 = vst [vmem:[%s3648_s20 + $0x170] sm:$0xff] %v1229_v32  ;;  %2254 = vst [vmem:[%s3648_s20 + $0x178] sm:$0xff] %v1230_v33  ;;  %v1253_v17 = vmul.f32 %v3632_v1, %v228_v14  ;;  %v1254_v18 = vmul.f32 %v3632_v1, %v229_v15  ;;  %v230_v19 = vld [vmem:[%s3625_s8 + $0x240] sm:$0xff]  ;;  %v231_v20 = vld [vmem:[%s3625_s8 + $0x248] sm:$0xff] }
  0x68   : > { %2255 = vst [vmem:[%s3648_s20 + $0x180] sm:$0xff] %v1231_v37  ;;  %2256 = vst [vmem:[%s3648_s20 + $0x188] sm:$0xff] %v1232_v38  ;;  %v232_v21 = vld [vmem:[%s3625_s8 + $0x250] sm:$0xff]  ;;  %v1255_v22 = vmul.f32 %v3632_v1, %v230_v19  ;;  %v1256_v23 = vmul.f32 %v3632_v1, %v231_v20  ;;  %v233_v25 = vld [vmem:[%s3625_s8 + $0x258] sm:$0xff] }
  0x69   : > { %2257 = vst [vmem:[%s3648_s20 + $0x190] sm:$0xff] %v1233_v39  ;;  %2258 = vst [vmem:[%s3648_s20 + $0x198] sm:$0xff] %v1234_v43  ;;  %v1257_v24 = vmul.f32 %v3632_v1, %v232_v21  ;;  %v234_v26 = vld [vmem:[%s3625_s8 + $0x260] sm:$0xff]  ;;  %v235_v27 = vld [vmem:[%s3625_s8 + $0x268] sm:$0xff]  ;;  %v1258_v28 = vmul.f32 %v3632_v1, %v233_v25 }
  0x6a   : > { %2259 = vst [vmem:[%s3648_s20 + $0x1a0] sm:$0xff] %v1235_v44  ;;  %2260 = vst [vmem:[%s3648_s20 + $0x1a8] sm:$0xff] %v1236_v45  ;;  %v1259_v29 = vmul.f32 %v3632_v1, %v234_v26  ;;  %v1260_v30 = vmul.f32 %v3632_v1, %v235_v27  ;;  %v236_v31 = vld [vmem:[%s3625_s8 + $0x270] sm:$0xff]  ;;  %v237_v32 = vld [vmem:[%s3625_s8 + $0x278] sm:$0xff] }
  0x6b   : > { %2261 = vst [vmem:[%s3648_s20 + $0x1b0] sm:$0xff] %v1237_v49  ;;  %2262 = vst [vmem:[%s3648_s20 + $0x1b8] sm:$0xff] %v1238_v50  ;;  %v238_v33 = vld [vmem:[%s3625_s8 + $0x280] sm:$0xff]  ;;  %v1261_v34 = vmul.f32 %v3632_v1, %v236_v31  ;;  %v1262_v35 = vmul.f32 %v3632_v1, %v237_v32  ;;  %v239_v37 = vld [vmem:[%s3625_s8 + $0x288] sm:$0xff] }
  0x6c   : > { %2263 = vst [vmem:[%s3648_s20 + $0x1c0] sm:$0xff] %v1239_v51  ;;  %2264 = vst [vmem:[%s3648_s20 + $0x1c8] sm:$0xff] %v1240_v55  ;;  %v1263_v36 = vmul.f32 %v3632_v1, %v238_v33  ;;  %v240_v38 = vld [vmem:[%s3625_s8 + $0x290] sm:$0xff]  ;;  %v241_v39 = vld [vmem:[%s3625_s8 + $0x298] sm:$0xff]  ;;  %v1264_v40 = vmul.f32 %v3632_v1, %v239_v37 }
  0x6d   : > { %2265 = vst [vmem:[%s3648_s20 + $0x1d0] sm:$0xff] %v1241_v56  ;;  %2266 = vst [vmem:[%s3648_s20 + $0x1d8] sm:$0xff] %v1242_v57  ;;  %v1265_v41 = vmul.f32 %v3632_v1, %v240_v38  ;;  %v1266_v42 = vmul.f32 %v3632_v1, %v241_v39  ;;  %v242_v43 = vld [vmem:[%s3625_s8 + $0x2a0] sm:$0xff]  ;;  %v243_v44 = vld [vmem:[%s3625_s8 + $0x2a8] sm:$0xff] }
  0x6e   : > { %2267 = vst [vmem:[%s3648_s20 + $0x1e0] sm:$0xff] %v1243_v61  ;;  %2268 = vst [vmem:[%s3648_s20 + $0x1e8] sm:$0xff] %v1244_v62  ;;  %v244_v45 = vld [vmem:[%s3625_s8 + $0x2b0] sm:$0xff]  ;;  %v1267_v46 = vmul.f32 %v3632_v1, %v242_v43  ;;  %v1268_v47 = vmul.f32 %v3632_v1, %v243_v44  ;;  %v245_v49 = vld [vmem:[%s3625_s8 + $0x2b8] sm:$0xff] }
  0x6f   : > { %2269 = vst [vmem:[%s3648_s20 + $0x1f0] sm:$0xff] %v1245_v63  ;;  %2270 = vst [vmem:[%s3648_s20 + $0x1f8] sm:$0xff] %v1246_v4  ;;  %v1269_v48 = vmul.f32 %v3632_v1, %v244_v45  ;;  %v246_v50 = vld [vmem:[%s3625_s8 + $0x2c0] sm:$0xff]  ;;  %v247_v51 = vld [vmem:[%s3625_s8 + $0x2c8] sm:$0xff]  ;;  %v1270_v52 = vmul.f32 %v3632_v1, %v245_v49 }
  0x70   : > { %2271 = vst [vmem:[%s3648_s20 + $0x200] sm:$0xff] %v1247_v5  ;;  %2272 = vst [vmem:[%s3648_s20 + $0x208] sm:$0xff] %v1248_v6  ;;  %v1271_v53 = vmul.f32 %v3632_v1, %v246_v50  ;;  %v1272_v54 = vmul.f32 %v3632_v1, %v247_v51  ;;  %v248_v55 = vld [vmem:[%s3625_s8 + $0x2d0] sm:$0xff]  ;;  %v249_v56 = vld [vmem:[%s3625_s8 + $0x2d8] sm:$0xff] }
  0x71   : > { %2273 = vst [vmem:[%s3648_s20 + $0x210] sm:$0xff] %v1249_v10  ;;  %2274 = vst [vmem:[%s3648_s20 + $0x218] sm:$0xff] %v1250_v11  ;;  %v250_v57 = vld [vmem:[%s3625_s8 + $0x2e0] sm:$0xff]  ;;  %v1273_v58 = vmul.f32 %v3632_v1, %v248_v55  ;;  %v1274_v59 = vmul.f32 %v3632_v1, %v249_v56  ;;  %v251_v61 = vld [vmem:[%s3625_s8 + $0x2e8] sm:$0xff] }
  0x72   : > { %2275 = vst [vmem:[%s3648_s20 + $0x220] sm:$0xff] %v1251_v12  ;;  %2276 = vst [vmem:[%s3648_s20 + $0x228] sm:$0xff] %v1252_v16  ;;  %v1275_v60 = vmul.f32 %v3632_v1, %v250_v57  ;;  %v252_v62 = vld [vmem:[%s3625_s8 + $0x2f0] sm:$0xff]  ;;  %v253_v63 = vld [vmem:[%s3625_s8 + $0x2f8] sm:$0xff]  ;;  %v1276_v0 = vmul.f32 %v3632_v1, %v251_v61 }
  0x73   : > { %2277 = vst [vmem:[%s3648_s20 + $0x230] sm:$0xff] %v1253_v17  ;;  %2278 = vst [vmem:[%s3648_s20 + $0x238] sm:$0xff] %v1254_v18  ;;  %v1277_v2 = vmul.f32 %v3632_v1, %v252_v62  ;;  %v1278_v3 = vmul.f32 %v3632_v1, %v253_v63  ;;  %v254_v4 = vld [vmem:[%s3625_s8 + $0x300] sm:$0xff]  ;;  %v255_v5 = vld [vmem:[%s3625_s8 + $0x308] sm:$0xff] }
  0x74   : > { %2279 = vst [vmem:[%s3648_s20 + $0x240] sm:$0xff] %v1255_v22  ;;  %2280 = vst [vmem:[%s3648_s20 + $0x248] sm:$0xff] %v1256_v23  ;;  %v256_v6 = vld [vmem:[%s3625_s8 + $0x310] sm:$0xff]  ;;  %v1279_v7 = vmul.f32 %v3632_v1, %v254_v4  ;;  %v1280_v8 = vmul.f32 %v3632_v1, %v255_v5  ;;  %v257_v10 = vld [vmem:[%s3625_s8 + $0x318] sm:$0xff] }
  0x75   : > { %2281 = vst [vmem:[%s3648_s20 + $0x250] sm:$0xff] %v1257_v24  ;;  %2282 = vst [vmem:[%s3648_s20 + $0x258] sm:$0xff] %v1258_v28  ;;  %v1281_v9 = vmul.f32 %v3632_v1, %v256_v6  ;;  %v258_v11 = vld [vmem:[%s3625_s8 + $0x320] sm:$0xff]  ;;  %v259_v12 = vld [vmem:[%s3625_s8 + $0x328] sm:$0xff]  ;;  %v1282_v13 = vmul.f32 %v3632_v1, %v257_v10 }
  0x76   : > { %2283 = vst [vmem:[%s3648_s20 + $0x260] sm:$0xff] %v1259_v29  ;;  %2284 = vst [vmem:[%s3648_s20 + $0x268] sm:$0xff] %v1260_v30  ;;  %v1283_v14 = vmul.f32 %v3632_v1, %v258_v11  ;;  %v1284_v15 = vmul.f32 %v3632_v1, %v259_v12  ;;  %v260_v16 = vld [vmem:[%s3625_s8 + $0x330] sm:$0xff]  ;;  %v261_v17 = vld [vmem:[%s3625_s8 + $0x338] sm:$0xff] }
  0x77   : > { %2285 = vst [vmem:[%s3648_s20 + $0x270] sm:$0xff] %v1261_v34  ;;  %2286 = vst [vmem:[%s3648_s20 + $0x278] sm:$0xff] %v1262_v35  ;;  %v262_v18 = vld [vmem:[%s3625_s8 + $0x340] sm:$0xff]  ;;  %v1285_v19 = vmul.f32 %v3632_v1, %v260_v16  ;;  %v1286_v20 = vmul.f32 %v3632_v1, %v261_v17  ;;  %v263_v22 = vld [vmem:[%s3625_s8 + $0x348] sm:$0xff] }
  0x78   : > { %2287 = vst [vmem:[%s3648_s20 + $0x280] sm:$0xff] %v1263_v36  ;;  %2288 = vst [vmem:[%s3648_s20 + $0x288] sm:$0xff] %v1264_v40  ;;  %v1287_v21 = vmul.f32 %v3632_v1, %v262_v18  ;;  %v264_v23 = vld [vmem:[%s3625_s8 + $0x350] sm:$0xff]  ;;  %v265_v24 = vld [vmem:[%s3625_s8 + $0x358] sm:$0xff]  ;;  %v1288_v25 = vmul.f32 %v3632_v1, %v263_v22 }
  0x79   : > { %2289 = vst [vmem:[%s3648_s20 + $0x290] sm:$0xff] %v1265_v41  ;;  %2290 = vst [vmem:[%s3648_s20 + $0x298] sm:$0xff] %v1266_v42  ;;  %v1289_v26 = vmul.f32 %v3632_v1, %v264_v23  ;;  %v1290_v27 = vmul.f32 %v3632_v1, %v265_v24  ;;  %v266_v28 = vld [vmem:[%s3625_s8 + $0x360] sm:$0xff]  ;;  %v267_v29 = vld [vmem:[%s3625_s8 + $0x368] sm:$0xff] }
  0x7a   : > { %2291 = vst [vmem:[%s3648_s20 + $0x2a0] sm:$0xff] %v1267_v46  ;;  %2292 = vst [vmem:[%s3648_s20 + $0x2a8] sm:$0xff] %v1268_v47  ;;  %v268_v30 = vld [vmem:[%s3625_s8 + $0x370] sm:$0xff]  ;;  %v1291_v31 = vmul.f32 %v3632_v1, %v266_v28  ;;  %v1292_v32 = vmul.f32 %v3632_v1, %v267_v29  ;;  %v269_v34 = vld [vmem:[%s3625_s8 + $0x378] sm:$0xff] }
  0x7b   : > { %2293 = vst [vmem:[%s3648_s20 + $0x2b0] sm:$0xff] %v1269_v48  ;;  %2294 = vst [vmem:[%s3648_s20 + $0x2b8] sm:$0xff] %v1270_v52  ;;  %v1293_v33 = vmul.f32 %v3632_v1, %v268_v30  ;;  %v270_v35 = vld [vmem:[%s3625_s8 + $0x380] sm:$0xff]  ;;  %v271_v36 = vld [vmem:[%s3625_s8 + $0x388] sm:$0xff]  ;;  %v1294_v37 = vmul.f32 %v3632_v1, %v269_v34 }
  0x7c   : > { %2295 = vst [vmem:[%s3648_s20 + $0x2c0] sm:$0xff] %v1271_v53  ;;  %2296 = vst [vmem:[%s3648_s20 + $0x2c8] sm:$0xff] %v1272_v54  ;;  %v1295_v38 = vmul.f32 %v3632_v1, %v270_v35  ;;  %v1296_v39 = vmul.f32 %v3632_v1, %v271_v36  ;;  %v272_v40 = vld [vmem:[%s3625_s8 + $0x390] sm:$0xff]  ;;  %v273_v41 = vld [vmem:[%s3625_s8 + $0x398] sm:$0xff] }
  0x7d   : > { %2297 = vst [vmem:[%s3648_s20 + $0x2d0] sm:$0xff] %v1273_v58  ;;  %2298 = vst [vmem:[%s3648_s20 + $0x2d8] sm:$0xff] %v1274_v59  ;;  %v274_v42 = vld [vmem:[%s3625_s8 + $0x3a0] sm:$0xff]  ;;  %v1297_v43 = vmul.f32 %v3632_v1, %v272_v40  ;;  %v1298_v44 = vmul.f32 %v3632_v1, %v273_v41  ;;  %v275_v46 = vld [vmem:[%s3625_s8 + $0x3a8] sm:$0xff] }
  0x7e   : > { %2299 = vst [vmem:[%s3648_s20 + $0x2e0] sm:$0xff] %v1275_v60  ;;  %2300 = vst [vmem:[%s3648_s20 + $0x2e8] sm:$0xff] %v1276_v0  ;;  %v1299_v45 = vmul.f32 %v3632_v1, %v274_v42  ;;  %v276_v47 = vld [vmem:[%s3625_s8 + $0x3b0] sm:$0xff]  ;;  %v277_v48 = vld [vmem:[%s3625_s8 + $0x3b8] sm:$0xff]  ;;  %v1300_v49 = vmul.f32 %v3632_v1, %v275_v46 }
  0x7f   : > { %2301 = vst [vmem:[%s3648_s20 + $0x2f0] sm:$0xff] %v1277_v2  ;;  %2302 = vst [vmem:[%s3648_s20 + $0x2f8] sm:$0xff] %v1278_v3  ;;  %v1301_v50 = vmul.f32 %v3632_v1, %v276_v47  ;;  %v1302_v51 = vmul.f32 %v3632_v1, %v277_v48  ;;  %v278_v52 = vld [vmem:[%s3625_s8 + $0x3c0] sm:$0xff]  ;;  %v279_v53 = vld [vmem:[%s3625_s8 + $0x3c8] sm:$0xff] }
  0x80   : > { %2303 = vst [vmem:[%s3648_s20 + $0x300] sm:$0xff] %v1279_v7  ;;  %2304 = vst [vmem:[%s3648_s20 + $0x308] sm:$0xff] %v1280_v8  ;;  %v280_v54 = vld [vmem:[%s3625_s8 + $0x3d0] sm:$0xff]  ;;  %v1303_v55 = vmul.f32 %v3632_v1, %v278_v52  ;;  %v1304_v56 = vmul.f32 %v3632_v1, %v279_v53  ;;  %v281_v58 = vld [vmem:[%s3625_s8 + $0x3d8] sm:$0xff] }
  0x81   : > { %2305 = vst [vmem:[%s3648_s20 + $0x310] sm:$0xff] %v1281_v9  ;;  %2306 = vst [vmem:[%s3648_s20 + $0x318] sm:$0xff] %v1282_v13  ;;  %v1305_v57 = vmul.f32 %v3632_v1, %v280_v54  ;;  %v282_v59 = vld [vmem:[%s3625_s8 + $0x3e0] sm:$0xff]  ;;  %v283_v60 = vld [vmem:[%s3625_s8 + $0x3e8] sm:$0xff]  ;;  %v1306_v61 = vmul.f32 %v3632_v1, %v281_v58 }
  0x82   : > { %2307 = vst [vmem:[%s3648_s20 + $0x320] sm:$0xff] %v1283_v14  ;;  %2308 = vst [vmem:[%s3648_s20 + $0x328] sm:$0xff] %v1284_v15  ;;  %v1307_v62 = vmul.f32 %v3632_v1, %v282_v59  ;;  %v1308_v63 = vmul.f32 %v3632_v1, %v283_v60  ;;  %v284_v0 = vld [vmem:[%s3625_s8 + $0x3f0] sm:$0xff]  ;;  %v285_v2 = vld [vmem:[%s3625_s8 + $0x3f8] sm:$0xff] }
  0x83   : > { %2309 = vst [vmem:[%s3648_s20 + $0x330] sm:$0xff] %v1285_v19  ;;  %2310 = vst [vmem:[%s3648_s20 + $0x338] sm:$0xff] %v1286_v20  ;;  %v286_v3 = vld [vmem:[%s3625_s8 + $0x400] sm:$0xff]  ;;  %v1309_v4 = vmul.f32 %v3632_v1, %v284_v0  ;;  %v1310_v5 = vmul.f32 %v3632_v1, %v285_v2  ;;  %v287_v7 = vld [vmem:[%s3625_s8 + $0x408] sm:$0xff] }
  0x84   : > { %2311 = vst [vmem:[%s3648_s20 + $0x340] sm:$0xff] %v1287_v21  ;;  %2312 = vst [vmem:[%s3648_s20 + $0x348] sm:$0xff] %v1288_v25  ;;  %v1311_v6 = vmul.f32 %v3632_v1, %v286_v3  ;;  %v288_v8 = vld [vmem:[%s3625_s8 + $0x410] sm:$0xff]  ;;  %v289_v9 = vld [vmem:[%s3625_s8 + $0x418] sm:$0xff]  ;;  %v1312_v10 = vmul.f32 %v3632_v1, %v287_v7 }
  0x85   : > { %2313 = vst [vmem:[%s3648_s20 + $0x350] sm:$0xff] %v1289_v26  ;;  %2314 = vst [vmem:[%s3648_s20 + $0x358] sm:$0xff] %v1290_v27  ;;  %v1313_v11 = vmul.f32 %v3632_v1, %v288_v8  ;;  %v1314_v12 = vmul.f32 %v3632_v1, %v289_v9  ;;  %v290_v13 = vld [vmem:[%s3625_s8 + $0x420] sm:$0xff]  ;;  %v291_v14 = vld [vmem:[%s3625_s8 + $0x428] sm:$0xff] }
  0x86   : > { %2315 = vst [vmem:[%s3648_s20 + $0x360] sm:$0xff] %v1291_v31  ;;  %2316 = vst [vmem:[%s3648_s20 + $0x368] sm:$0xff] %v1292_v32  ;;  %v292_v15 = vld [vmem:[%s3625_s8 + $0x430] sm:$0xff]  ;;  %v1315_v16 = vmul.f32 %v3632_v1, %v290_v13  ;;  %v1316_v17 = vmul.f32 %v3632_v1, %v291_v14  ;;  %v293_v19 = vld [vmem:[%s3625_s8 + $0x438] sm:$0xff] }
  0x87   : > { %2317 = vst [vmem:[%s3648_s20 + $0x370] sm:$0xff] %v1293_v33  ;;  %2318 = vst [vmem:[%s3648_s20 + $0x378] sm:$0xff] %v1294_v37  ;;  %v1317_v18 = vmul.f32 %v3632_v1, %v292_v15  ;;  %v294_v20 = vld [vmem:[%s3625_s8 + $0x440] sm:$0xff]  ;;  %v295_v21 = vld [vmem:[%s3625_s8 + $0x448] sm:$0xff]  ;;  %v1318_v22 = vmul.f32 %v3632_v1, %v293_v19 }
  0x88   : > { %2319 = vst [vmem:[%s3648_s20 + $0x380] sm:$0xff] %v1295_v38  ;;  %2320 = vst [vmem:[%s3648_s20 + $0x388] sm:$0xff] %v1296_v39  ;;  %v1319_v23 = vmul.f32 %v3632_v1, %v294_v20  ;;  %v1320_v24 = vmul.f32 %v3632_v1, %v295_v21  ;;  %v296_v25 = vld [vmem:[%s3625_s8 + $0x450] sm:$0xff]  ;;  %v297_v26 = vld [vmem:[%s3625_s8 + $0x458] sm:$0xff] }
  0x89   : > { %2321 = vst [vmem:[%s3648_s20 + $0x390] sm:$0xff] %v1297_v43  ;;  %2322 = vst [vmem:[%s3648_s20 + $0x398] sm:$0xff] %v1298_v44  ;;  %v298_v27 = vld [vmem:[%s3625_s8 + $0x460] sm:$0xff]  ;;  %v1321_v28 = vmul.f32 %v3632_v1, %v296_v25  ;;  %v1322_v29 = vmul.f32 %v3632_v1, %v297_v26  ;;  %v299_v31 = vld [vmem:[%s3625_s8 + $0x468] sm:$0xff] }
  0x8a   : > { %2323 = vst [vmem:[%s3648_s20 + $0x3a0] sm:$0xff] %v1299_v45  ;;  %2324 = vst [vmem:[%s3648_s20 + $0x3a8] sm:$0xff] %v1300_v49  ;;  %v1323_v30 = vmul.f32 %v3632_v1, %v298_v27  ;;  %v300_v32 = vld [vmem:[%s3625_s8 + $0x470] sm:$0xff]  ;;  %v301_v33 = vld [vmem:[%s3625_s8 + $0x478] sm:$0xff]  ;;  %v1324_v34 = vmul.f32 %v3632_v1, %v299_v31 }
  0x8b   : > { %2325 = vst [vmem:[%s3648_s20 + $0x3b0] sm:$0xff] %v1301_v50  ;;  %2326 = vst [vmem:[%s3648_s20 + $0x3b8] sm:$0xff] %v1302_v51  ;;  %v1325_v35 = vmul.f32 %v3632_v1, %v300_v32  ;;  %v1326_v36 = vmul.f32 %v3632_v1, %v301_v33  ;;  %v302_v37 = vld [vmem:[%s3625_s8 + $0x480] sm:$0xff]  ;;  %v303_v38 = vld [vmem:[%s3625_s8 + $0x488] sm:$0xff] }
  0x8c   : > { %2327 = vst [vmem:[%s3648_s20 + $0x3c0] sm:$0xff] %v1303_v55  ;;  %2328 = vst [vmem:[%s3648_s20 + $0x3c8] sm:$0xff] %v1304_v56  ;;  %v304_v39 = vld [vmem:[%s3625_s8 + $0x490] sm:$0xff]  ;;  %v1327_v40 = vmul.f32 %v3632_v1, %v302_v37  ;;  %v1328_v41 = vmul.f32 %v3632_v1, %v303_v38  ;;  %v305_v43 = vld [vmem:[%s3625_s8 + $0x498] sm:$0xff] }
  0x8d   : > { %2329 = vst [vmem:[%s3648_s20 + $0x3d0] sm:$0xff] %v1305_v57  ;;  %2330 = vst [vmem:[%s3648_s20 + $0x3d8] sm:$0xff] %v1306_v61  ;;  %v1329_v42 = vmul.f32 %v3632_v1, %v304_v39  ;;  %v306_v44 = vld [vmem:[%s3625_s8 + $0x4a0] sm:$0xff]  ;;  %v307_v45 = vld [vmem:[%s3625_s8 + $0x4a8] sm:$0xff]  ;;  %v1330_v46 = vmul.f32 %v3632_v1, %v305_v43 }
  0x8e   : > { %2331 = vst [vmem:[%s3648_s20 + $0x3e0] sm:$0xff] %v1307_v62  ;;  %2332 = vst [vmem:[%s3648_s20 + $0x3e8] sm:$0xff] %v1308_v63  ;;  %v1331_v47 = vmul.f32 %v3632_v1, %v306_v44  ;;  %v1332_v48 = vmul.f32 %v3632_v1, %v307_v45  ;;  %v308_v49 = vld [vmem:[%s3625_s8 + $0x4b0] sm:$0xff]  ;;  %v309_v50 = vld [vmem:[%s3625_s8 + $0x4b8] sm:$0xff] }
  0x8f   : > { %2333 = vst [vmem:[%s3648_s20 + $0x3f0] sm:$0xff] %v1309_v4  ;;  %2334 = vst [vmem:[%s3648_s20 + $0x3f8] sm:$0xff] %v1310_v5  ;;  %v310_v51 = vld [vmem:[%s3625_s8 + $0x4c0] sm:$0xff]  ;;  %v1333_v52 = vmul.f32 %v3632_v1, %v308_v49  ;;  %v1334_v53 = vmul.f32 %v3632_v1, %v309_v50  ;;  %v311_v55 = vld [vmem:[%s3625_s8 + $0x4c8] sm:$0xff] }
  0x90   : > { %2335 = vst [vmem:[%s3648_s20 + $0x400] sm:$0xff] %v1311_v6  ;;  %2336 = vst [vmem:[%s3648_s20 + $0x408] sm:$0xff] %v1312_v10  ;;  %v1335_v54 = vmul.f32 %v3632_v1, %v310_v51  ;;  %v312_v56 = vld [vmem:[%s3625_s8 + $0x4d0] sm:$0xff]  ;;  %v313_v57 = vld [vmem:[%s3625_s8 + $0x4d8] sm:$0xff]  ;;  %v1336_v58 = vmul.f32 %v3632_v1, %v311_v55 }
  0x91   : > { %2337 = vst [vmem:[%s3648_s20 + $0x410] sm:$0xff] %v1313_v11  ;;  %2338 = vst [vmem:[%s3648_s20 + $0x418] sm:$0xff] %v1314_v12  ;;  %v1337_v59 = vmul.f32 %v3632_v1, %v312_v56  ;;  %v1338_v60 = vmul.f32 %v3632_v1, %v313_v57  ;;  %v314_v61 = vld [vmem:[%s3625_s8 + $0x4e0] sm:$0xff]  ;;  %v315_v62 = vld [vmem:[%s3625_s8 + $0x4e8] sm:$0xff] }
  0x92   : > { %2339 = vst [vmem:[%s3648_s20 + $0x420] sm:$0xff] %v1315_v16  ;;  %2340 = vst [vmem:[%s3648_s20 + $0x428] sm:$0xff] %v1316_v17  ;;  %v316_v63 = vld [vmem:[%s3625_s8 + $0x4f0] sm:$0xff]  ;;  %v1339_v0 = vmul.f32 %v3632_v1, %v314_v61  ;;  %v1340_v2 = vmul.f32 %v3632_v1, %v315_v62  ;;  %v317_v4 = vld [vmem:[%s3625_s8 + $0x4f8] sm:$0xff] }
  0x93   : > { %2341 = vst [vmem:[%s3648_s20 + $0x430] sm:$0xff] %v1317_v18  ;;  %2342 = vst [vmem:[%s3648_s20 + $0x438] sm:$0xff] %v1318_v22  ;;  %v1341_v3 = vmul.f32 %v3632_v1, %v316_v63  ;;  %v318_v5 = vld [vmem:[%s3625_s8 + $0x500] sm:$0xff]  ;;  %v319_v6 = vld [vmem:[%s3625_s8 + $0x508] sm:$0xff]  ;;  %v1342_v7 = vmul.f32 %v3632_v1, %v317_v4 }
  0x94   : > { %2343 = vst [vmem:[%s3648_s20 + $0x440] sm:$0xff] %v1319_v23  ;;  %2344 = vst [vmem:[%s3648_s20 + $0x448] sm:$0xff] %v1320_v24  ;;  %v1343_v8 = vmul.f32 %v3632_v1, %v318_v5  ;;  %v1344_v9 = vmul.f32 %v3632_v1, %v319_v6  ;;  %v320_v10 = vld [vmem:[%s3625_s8 + $0x510] sm:$0xff]  ;;  %v321_v11 = vld [vmem:[%s3625_s8 + $0x518] sm:$0xff] }
  0x95   : > { %2345 = vst [vmem:[%s3648_s20 + $0x450] sm:$0xff] %v1321_v28  ;;  %2346 = vst [vmem:[%s3648_s20 + $0x458] sm:$0xff] %v1322_v29  ;;  %v322_v12 = vld [vmem:[%s3625_s8 + $0x520] sm:$0xff]  ;;  %v1345_v13 = vmul.f32 %v3632_v1, %v320_v10  ;;  %v1346_v14 = vmul.f32 %v3632_v1, %v321_v11  ;;  %v323_v16 = vld [vmem:[%s3625_s8 + $0x528] sm:$0xff] }
  0x96   : > { %2347 = vst [vmem:[%s3648_s20 + $0x460] sm:$0xff] %v1323_v30  ;;  %2348 = vst [vmem:[%s3648_s20 + $0x468] sm:$0xff] %v1324_v34  ;;  %v1347_v15 = vmul.f32 %v3632_v1, %v322_v12  ;;  %v324_v17 = vld [vmem:[%s3625_s8 + $0x530] sm:$0xff]  ;;  %v325_v18 = vld [vmem:[%s3625_s8 + $0x538] sm:$0xff]  ;;  %v1348_v19 = vmul.f32 %v3632_v1, %v323_v16 }
  0x97   : > { %2349 = vst [vmem:[%s3648_s20 + $0x470] sm:$0xff] %v1325_v35  ;;  %2350 = vst [vmem:[%s3648_s20 + $0x478] sm:$0xff] %v1326_v36  ;;  %v1349_v20 = vmul.f32 %v3632_v1, %v324_v17  ;;  %v1350_v21 = vmul.f32 %v3632_v1, %v325_v18  ;;  %v326_v22 = vld [vmem:[%s3625_s8 + $0x540] sm:$0xff]  ;;  %v327_v23 = vld [vmem:[%s3625_s8 + $0x548] sm:$0xff] }
  0x98   : > { %2351 = vst [vmem:[%s3648_s20 + $0x480] sm:$0xff] %v1327_v40  ;;  %2352 = vst [vmem:[%s3648_s20 + $0x488] sm:$0xff] %v1328_v41  ;;  %v328_v24 = vld [vmem:[%s3625_s8 + $0x550] sm:$0xff]  ;;  %v1351_v25 = vmul.f32 %v3632_v1, %v326_v22  ;;  %v1352_v26 = vmul.f32 %v3632_v1, %v327_v23  ;;  %v329_v28 = vld [vmem:[%s3625_s8 + $0x558] sm:$0xff] }
  0x99   : > { %2353 = vst [vmem:[%s3648_s20 + $0x490] sm:$0xff] %v1329_v42  ;;  %2354 = vst [vmem:[%s3648_s20 + $0x498] sm:$0xff] %v1330_v46  ;;  %v1353_v27 = vmul.f32 %v3632_v1, %v328_v24  ;;  %v330_v29 = vld [vmem:[%s3625_s8 + $0x560] sm:$0xff]  ;;  %v331_v30 = vld [vmem:[%s3625_s8 + $0x568] sm:$0xff]  ;;  %v1354_v31 = vmul.f32 %v3632_v1, %v329_v28 }
  0x9a   : > { %2355 = vst [vmem:[%s3648_s20 + $0x4a0] sm:$0xff] %v1331_v47  ;;  %2356 = vst [vmem:[%s3648_s20 + $0x4a8] sm:$0xff] %v1332_v48  ;;  %v1355_v32 = vmul.f32 %v3632_v1, %v330_v29  ;;  %v1356_v33 = vmul.f32 %v3632_v1, %v331_v30  ;;  %v332_v34 = vld [vmem:[%s3625_s8 + $0x570] sm:$0xff]  ;;  %v333_v35 = vld [vmem:[%s3625_s8 + $0x578] sm:$0xff] }
  0x9b   : > { %2357 = vst [vmem:[%s3648_s20 + $0x4b0] sm:$0xff] %v1333_v52  ;;  %2358 = vst [vmem:[%s3648_s20 + $0x4b8] sm:$0xff] %v1334_v53  ;;  %v334_v36 = vld [vmem:[%s3625_s8 + $0x580] sm:$0xff]  ;;  %v1357_v37 = vmul.f32 %v3632_v1, %v332_v34  ;;  %v1358_v38 = vmul.f32 %v3632_v1, %v333_v35  ;;  %v335_v40 = vld [vmem:[%s3625_s8 + $0x588] sm:$0xff] }
  0x9c   : > { %2359 = vst [vmem:[%s3648_s20 + $0x4c0] sm:$0xff] %v1335_v54  ;;  %2360 = vst [vmem:[%s3648_s20 + $0x4c8] sm:$0xff] %v1336_v58  ;;  %v1359_v39 = vmul.f32 %v3632_v1, %v334_v36  ;;  %v336_v41 = vld [vmem:[%s3625_s8 + $0x590] sm:$0xff]  ;;  %v337_v42 = vld [vmem:[%s3625_s8 + $0x598] sm:$0xff]  ;;  %v1360_v43 = vmul.f32 %v3632_v1, %v335_v40 }
  0x9d   : > { %2361 = vst [vmem:[%s3648_s20 + $0x4d0] sm:$0xff] %v1337_v59  ;;  %2362 = vst [vmem:[%s3648_s20 + $0x4d8] sm:$0xff] %v1338_v60  ;;  %v1361_v44 = vmul.f32 %v3632_v1, %v336_v41  ;;  %v1362_v45 = vmul.f32 %v3632_v1, %v337_v42  ;;  %v338_v46 = vld [vmem:[%s3625_s8 + $0x5a0] sm:$0xff]  ;;  %v339_v47 = vld [vmem:[%s3625_s8 + $0x5a8] sm:$0xff] }
  0x9e   : > { %2363 = vst [vmem:[%s3648_s20 + $0x4e0] sm:$0xff] %v1339_v0  ;;  %2364 = vst [vmem:[%s3648_s20 + $0x4e8] sm:$0xff] %v1340_v2  ;;  %v340_v48 = vld [vmem:[%s3625_s8 + $0x5b0] sm:$0xff]  ;;  %v1363_v49 = vmul.f32 %v3632_v1, %v338_v46  ;;  %v1364_v50 = vmul.f32 %v3632_v1, %v339_v47  ;;  %v341_v52 = vld [vmem:[%s3625_s8 + $0x5b8] sm:$0xff] }
  0x9f   : > { %2365 = vst [vmem:[%s3648_s20 + $0x4f0] sm:$0xff] %v1341_v3  ;;  %2366 = vst [vmem:[%s3648_s20 + $0x4f8] sm:$0xff] %v1342_v7  ;;  %v1365_v51 = vmul.f32 %v3632_v1, %v340_v48  ;;  %v342_v53 = vld [vmem:[%s3625_s8 + $0x5c0] sm:$0xff]  ;;  %v343_v54 = vld [vmem:[%s3625_s8 + $0x5c8] sm:$0xff]  ;;  %v1366_v55 = vmul.f32 %v3632_v1, %v341_v52 }
  0xa0   : > { %2367 = vst [vmem:[%s3648_s20 + $0x500] sm:$0xff] %v1343_v8  ;;  %2368 = vst [vmem:[%s3648_s20 + $0x508] sm:$0xff] %v1344_v9  ;;  %v1367_v56 = vmul.f32 %v3632_v1, %v342_v53  ;;  %v1368_v57 = vmul.f32 %v3632_v1, %v343_v54  ;;  %v344_v58 = vld [vmem:[%s3625_s8 + $0x5d0] sm:$0xff]  ;;  %v345_v59 = vld [vmem:[%s3625_s8 + $0x5d8] sm:$0xff] }
  0xa1   : > { %2369 = vst [vmem:[%s3648_s20 + $0x510] sm:$0xff] %v1345_v13  ;;  %2370 = vst [vmem:[%s3648_s20 + $0x518] sm:$0xff] %v1346_v14  ;;  %v346_v60 = vld [vmem:[%s3625_s8 + $0x5e0] sm:$0xff]  ;;  %v1369_v61 = vmul.f32 %v3632_v1, %v344_v58  ;;  %v1370_v62 = vmul.f32 %v3632_v1, %v345_v59  ;;  %v347_v0 = vld [vmem:[%s3625_s8 + $0x5e8] sm:$0xff] }
  0xa2   : > { %2371 = vst [vmem:[%s3648_s20 + $0x520] sm:$0xff] %v1347_v15  ;;  %2372 = vst [vmem:[%s3648_s20 + $0x528] sm:$0xff] %v1348_v19  ;;  %v1371_v63 = vmul.f32 %v3632_v1, %v346_v60  ;;  %v348_v2 = vld [vmem:[%s3625_s8 + $0x5f0] sm:$0xff]  ;;  %v349_v3 = vld [vmem:[%s3625_s8 + $0x5f8] sm:$0xff]  ;;  %v1372_v4 = vmul.f32 %v3632_v1, %v347_v0 }
  0xa3   : > { %2373 = vst [vmem:[%s3648_s20 + $0x530] sm:$0xff] %v1349_v20  ;;  %2374 = vst [vmem:[%s3648_s20 + $0x538] sm:$0xff] %v1350_v21  ;;  %v1373_v5 = vmul.f32 %v3632_v1, %v348_v2  ;;  %v1374_v6 = vmul.f32 %v3632_v1, %v349_v3  ;;  %v350_v7 = vld [vmem:[%s3625_s8 + $0x600] sm:$0xff]  ;;  %v351_v8 = vld [vmem:[%s3625_s8 + $0x608] sm:$0xff] }
  0xa4   : > { %2375 = vst [vmem:[%s3648_s20 + $0x540] sm:$0xff] %v1351_v25  ;;  %2376 = vst [vmem:[%s3648_s20 + $0x548] sm:$0xff] %v1352_v26  ;;  %v352_v9 = vld [vmem:[%s3625_s8 + $0x610] sm:$0xff]  ;;  %v1375_v10 = vmul.f32 %v3632_v1, %v350_v7  ;;  %v1376_v11 = vmul.f32 %v3632_v1, %v351_v8  ;;  %v353_v13 = vld [vmem:[%s3625_s8 + $0x618] sm:$0xff] }
  0xa5   : > { %2377 = vst [vmem:[%s3648_s20 + $0x550] sm:$0xff] %v1353_v27  ;;  %2378 = vst [vmem:[%s3648_s20 + $0x558] sm:$0xff] %v1354_v31  ;;  %v1377_v12 = vmul.f32 %v3632_v1, %v352_v9  ;;  %v354_v14 = vld [vmem:[%s3625_s8 + $0x620] sm:$0xff]  ;;  %v355_v15 = vld [vmem:[%s3625_s8 + $0x628] sm:$0xff]  ;;  %v1378_v16 = vmul.f32 %v3632_v1, %v353_v13 }
  0xa6   : > { %2379 = vst [vmem:[%s3648_s20 + $0x560] sm:$0xff] %v1355_v32  ;;  %2380 = vst [vmem:[%s3648_s20 + $0x568] sm:$0xff] %v1356_v33  ;;  %v1379_v17 = vmul.f32 %v3632_v1, %v354_v14  ;;  %v1380_v18 = vmul.f32 %v3632_v1, %v355_v15  ;;  %v356_v19 = vld [vmem:[%s3625_s8 + $0x630] sm:$0xff]  ;;  %v357_v20 = vld [vmem:[%s3625_s8 + $0x638] sm:$0xff] }
  0xa7   : > { %2381 = vst [vmem:[%s3648_s20 + $0x570] sm:$0xff] %v1357_v37  ;;  %2382 = vst [vmem:[%s3648_s20 + $0x578] sm:$0xff] %v1358_v38  ;;  %v358_v21 = vld [vmem:[%s3625_s8 + $0x640] sm:$0xff]  ;;  %v1381_v22 = vmul.f32 %v3632_v1, %v356_v19  ;;  %v1382_v23 = vmul.f32 %v3632_v1, %v357_v20  ;;  %v359_v25 = vld [vmem:[%s3625_s8 + $0x648] sm:$0xff] }
  0xa8   : > { %2383 = vst [vmem:[%s3648_s20 + $0x580] sm:$0xff] %v1359_v39  ;;  %2384 = vst [vmem:[%s3648_s20 + $0x588] sm:$0xff] %v1360_v43  ;;  %v1383_v24 = vmul.f32 %v3632_v1, %v358_v21  ;;  %v360_v26 = vld [vmem:[%s3625_s8 + $0x650] sm:$0xff]  ;;  %v361_v27 = vld [vmem:[%s3625_s8 + $0x658] sm:$0xff]  ;;  %v1384_v28 = vmul.f32 %v3632_v1, %v359_v25 }
  0xa9   : > { %2385 = vst [vmem:[%s3648_s20 + $0x590] sm:$0xff] %v1361_v44  ;;  %2386 = vst [vmem:[%s3648_s20 + $0x598] sm:$0xff] %v1362_v45  ;;  %v1385_v29 = vmul.f32 %v3632_v1, %v360_v26  ;;  %v1386_v30 = vmul.f32 %v3632_v1, %v361_v27  ;;  %v362_v31 = vld [vmem:[%s3625_s8 + $0x660] sm:$0xff]  ;;  %v363_v32 = vld [vmem:[%s3625_s8 + $0x668] sm:$0xff] }
  0xaa   : > { %2387 = vst [vmem:[%s3648_s20 + $0x5a0] sm:$0xff] %v1363_v49  ;;  %2388 = vst [vmem:[%s3648_s20 + $0x5a8] sm:$0xff] %v1364_v50  ;;  %v364_v33 = vld [vmem:[%s3625_s8 + $0x670] sm:$0xff]  ;;  %v1387_v34 = vmul.f32 %v3632_v1, %v362_v31  ;;  %v1388_v35 = vmul.f32 %v3632_v1, %v363_v32  ;;  %v365_v37 = vld [vmem:[%s3625_s8 + $0x678] sm:$0xff] }
  0xab   : > { %2389 = vst [vmem:[%s3648_s20 + $0x5b0] sm:$0xff] %v1365_v51  ;;  %2390 = vst [vmem:[%s3648_s20 + $0x5b8] sm:$0xff] %v1366_v55  ;;  %v1389_v36 = vmul.f32 %v3632_v1, %v364_v33  ;;  %v366_v38 = vld [vmem:[%s3625_s8 + $0x680] sm:$0xff]  ;;  %v367_v39 = vld [vmem:[%s3625_s8 + $0x688] sm:$0xff]  ;;  %v1390_v40 = vmul.f32 %v3632_v1, %v365_v37 }
  0xac   : > { %2391 = vst [vmem:[%s3648_s20 + $0x5c0] sm:$0xff] %v1367_v56  ;;  %2392 = vst [vmem:[%s3648_s20 + $0x5c8] sm:$0xff] %v1368_v57  ;;  %v1391_v41 = vmul.f32 %v3632_v1, %v366_v38  ;;  %v1392_v42 = vmul.f32 %v3632_v1, %v367_v39  ;;  %v368_v43 = vld [vmem:[%s3625_s8 + $0x690] sm:$0xff]  ;;  %v369_v44 = vld [vmem:[%s3625_s8 + $0x698] sm:$0xff] }
  0xad   : > { %2393 = vst [vmem:[%s3648_s20 + $0x5d0] sm:$0xff] %v1369_v61  ;;  %2394 = vst [vmem:[%s3648_s20 + $0x5d8] sm:$0xff] %v1370_v62  ;;  %v370_v45 = vld [vmem:[%s3625_s8 + $0x6a0] sm:$0xff]  ;;  %v1393_v46 = vmul.f32 %v3632_v1, %v368_v43  ;;  %v1394_v47 = vmul.f32 %v3632_v1, %v369_v44  ;;  %v371_v49 = vld [vmem:[%s3625_s8 + $0x6a8] sm:$0xff] }
  0xae   : > { %2395 = vst [vmem:[%s3648_s20 + $0x5e0] sm:$0xff] %v1371_v63  ;;  %2396 = vst [vmem:[%s3648_s20 + $0x5e8] sm:$0xff] %v1372_v4  ;;  %v1395_v48 = vmul.f32 %v3632_v1, %v370_v45  ;;  %v372_v50 = vld [vmem:[%s3625_s8 + $0x6b0] sm:$0xff]  ;;  %v373_v51 = vld [vmem:[%s3625_s8 + $0x6b8] sm:$0xff]  ;;  %v1396_v52 = vmul.f32 %v3632_v1, %v371_v49 }
  0xaf   : > { %2397 = vst [vmem:[%s3648_s20 + $0x5f0] sm:$0xff] %v1373_v5  ;;  %2398 = vst [vmem:[%s3648_s20 + $0x5f8] sm:$0xff] %v1374_v6  ;;  %v1397_v53 = vmul.f32 %v3632_v1, %v372_v50  ;;  %v1398_v54 = vmul.f32 %v3632_v1, %v373_v51  ;;  %v374_v55 = vld [vmem:[%s3625_s8 + $0x6c0] sm:$0xff]  ;;  %v375_v56 = vld [vmem:[%s3625_s8 + $0x6c8] sm:$0xff] }
  0xb0   : > { %2399 = vst [vmem:[%s3648_s20 + $0x600] sm:$0xff] %v1375_v10  ;;  %2400 = vst [vmem:[%s3648_s20 + $0x608] sm:$0xff] %v1376_v11  ;;  %v376_v57 = vld [vmem:[%s3625_s8 + $0x6d0] sm:$0xff]  ;;  %v1399_v58 = vmul.f32 %v3632_v1, %v374_v55  ;;  %v1400_v59 = vmul.f32 %v3632_v1, %v375_v56  ;;  %v377_v61 = vld [vmem:[%s3625_s8 + $0x6d8] sm:$0xff] }
  0xb1   : > { %2401 = vst [vmem:[%s3648_s20 + $0x610] sm:$0xff] %v1377_v12  ;;  %2402 = vst [vmem:[%s3648_s20 + $0x618] sm:$0xff] %v1378_v16  ;;  %v1401_v60 = vmul.f32 %v3632_v1, %v376_v57  ;;  %v378_v62 = vld [vmem:[%s3625_s8 + $0x6e0] sm:$0xff]  ;;  %v379_v63 = vld [vmem:[%s3625_s8 + $0x6e8] sm:$0xff]  ;;  %v1402_v0 = vmul.f32 %v3632_v1, %v377_v61 }
  0xb2   : > { %2403 = vst [vmem:[%s3648_s20 + $0x620] sm:$0xff] %v1379_v17  ;;  %2404 = vst [vmem:[%s3648_s20 + $0x628] sm:$0xff] %v1380_v18  ;;  %v1403_v2 = vmul.f32 %v3632_v1, %v378_v62  ;;  %v1404_v3 = vmul.f32 %v3632_v1, %v379_v63  ;;  %v380_v4 = vld [vmem:[%s3625_s8 + $0x6f0] sm:$0xff]  ;;  %v381_v5 = vld [vmem:[%s3625_s8 + $0x6f8] sm:$0xff] }
  0xb3   : > { %2405 = vst [vmem:[%s3648_s20 + $0x630] sm:$0xff] %v1381_v22  ;;  %2406 = vst [vmem:[%s3648_s20 + $0x638] sm:$0xff] %v1382_v23  ;;  %v382_v6 = vld [vmem:[%s3625_s8 + $0x700] sm:$0xff]  ;;  %v1405_v7 = vmul.f32 %v3632_v1, %v380_v4  ;;  %v1406_v8 = vmul.f32 %v3632_v1, %v381_v5  ;;  %v383_v10 = vld [vmem:[%s3625_s8 + $0x708] sm:$0xff] }
  0xb4   : > { %2407 = vst [vmem:[%s3648_s20 + $0x640] sm:$0xff] %v1383_v24  ;;  %2408 = vst [vmem:[%s3648_s20 + $0x648] sm:$0xff] %v1384_v28  ;;  %v1407_v9 = vmul.f32 %v3632_v1, %v382_v6  ;;  %v384_v11 = vld [vmem:[%s3625_s8 + $0x710] sm:$0xff]  ;;  %v385_v12 = vld [vmem:[%s3625_s8 + $0x718] sm:$0xff]  ;;  %v1408_v13 = vmul.f32 %v3632_v1, %v383_v10 }
  0xb5   : > { %2409 = vst [vmem:[%s3648_s20 + $0x650] sm:$0xff] %v1385_v29  ;;  %2410 = vst [vmem:[%s3648_s20 + $0x658] sm:$0xff] %v1386_v30  ;;  %v1409_v14 = vmul.f32 %v3632_v1, %v384_v11  ;;  %v1410_v15 = vmul.f32 %v3632_v1, %v385_v12  ;;  %v386_v16 = vld [vmem:[%s3625_s8 + $0x720] sm:$0xff]  ;;  %v387_v17 = vld [vmem:[%s3625_s8 + $0x728] sm:$0xff] }
  0xb6   : > { %2411 = vst [vmem:[%s3648_s20 + $0x660] sm:$0xff] %v1387_v34  ;;  %2412 = vst [vmem:[%s3648_s20 + $0x668] sm:$0xff] %v1388_v35  ;;  %v388_v18 = vld [vmem:[%s3625_s8 + $0x730] sm:$0xff]  ;;  %v1411_v19 = vmul.f32 %v3632_v1, %v386_v16  ;;  %v1412_v20 = vmul.f32 %v3632_v1, %v387_v17  ;;  %v389_v22 = vld [vmem:[%s3625_s8 + $0x738] sm:$0xff] }
  0xb7   : > { %2413 = vst [vmem:[%s3648_s20 + $0x670] sm:$0xff] %v1389_v36  ;;  %2414 = vst [vmem:[%s3648_s20 + $0x678] sm:$0xff] %v1390_v40  ;;  %v1413_v21 = vmul.f32 %v3632_v1, %v388_v18  ;;  %v390_v23 = vld [vmem:[%s3625_s8 + $0x740] sm:$0xff]  ;;  %v391_v24 = vld [vmem:[%s3625_s8 + $0x748] sm:$0xff]  ;;  %v1414_v25 = vmul.f32 %v3632_v1, %v389_v22 }
  0xb8   : > { %2415 = vst [vmem:[%s3648_s20 + $0x680] sm:$0xff] %v1391_v41  ;;  %2416 = vst [vmem:[%s3648_s20 + $0x688] sm:$0xff] %v1392_v42  ;;  %v1415_v26 = vmul.f32 %v3632_v1, %v390_v23  ;;  %v1416_v27 = vmul.f32 %v3632_v1, %v391_v24  ;;  %v392_v28 = vld [vmem:[%s3625_s8 + $0x750] sm:$0xff]  ;;  %v393_v29 = vld [vmem:[%s3625_s8 + $0x758] sm:$0xff] }
  0xb9   : > { %2417 = vst [vmem:[%s3648_s20 + $0x690] sm:$0xff] %v1393_v46  ;;  %2418 = vst [vmem:[%s3648_s20 + $0x698] sm:$0xff] %v1394_v47  ;;  %v394_v30 = vld [vmem:[%s3625_s8 + $0x760] sm:$0xff]  ;;  %v1417_v31 = vmul.f32 %v3632_v1, %v392_v28  ;;  %v1418_v32 = vmul.f32 %v3632_v1, %v393_v29  ;;  %v395_v34 = vld [vmem:[%s3625_s8 + $0x768] sm:$0xff] }
  0xba   : > { %2419 = vst [vmem:[%s3648_s20 + $0x6a0] sm:$0xff] %v1395_v48  ;;  %2420 = vst [vmem:[%s3648_s20 + $0x6a8] sm:$0xff] %v1396_v52  ;;  %v1419_v33 = vmul.f32 %v3632_v1, %v394_v30  ;;  %v396_v35 = vld [vmem:[%s3625_s8 + $0x770] sm:$0xff]  ;;  %v397_v36 = vld [vmem:[%s3625_s8 + $0x778] sm:$0xff]  ;;  %v1420_v37 = vmul.f32 %v3632_v1, %v395_v34 }
  0xbb   : > { %2421 = vst [vmem:[%s3648_s20 + $0x6b0] sm:$0xff] %v1397_v53  ;;  %2422 = vst [vmem:[%s3648_s20 + $0x6b8] sm:$0xff] %v1398_v54  ;;  %v1421_v38 = vmul.f32 %v3632_v1, %v396_v35  ;;  %v1422_v39 = vmul.f32 %v3632_v1, %v397_v36  ;;  %v398_v40 = vld [vmem:[%s3625_s8 + $0x780] sm:$0xff]  ;;  %v399_v41 = vld [vmem:[%s3625_s8 + $0x788] sm:$0xff] }
  0xbc   : > { %2423 = vst [vmem:[%s3648_s20 + $0x6c0] sm:$0xff] %v1399_v58  ;;  %2424 = vst [vmem:[%s3648_s20 + $0x6c8] sm:$0xff] %v1400_v59  ;;  %v400_v42 = vld [vmem:[%s3625_s8 + $0x790] sm:$0xff]  ;;  %v1423_v43 = vmul.f32 %v3632_v1, %v398_v40  ;;  %v1424_v44 = vmul.f32 %v3632_v1, %v399_v41  ;;  %v401_v46 = vld [vmem:[%s3625_s8 + $0x798] sm:$0xff] }
  0xbd   : > { %2425 = vst [vmem:[%s3648_s20 + $0x6d0] sm:$0xff] %v1401_v60  ;;  %2426 = vst [vmem:[%s3648_s20 + $0x6d8] sm:$0xff] %v1402_v0  ;;  %v1425_v45 = vmul.f32 %v3632_v1, %v400_v42  ;;  %v402_v47 = vld [vmem:[%s3625_s8 + $0x7a0] sm:$0xff]  ;;  %v403_v48 = vld [vmem:[%s3625_s8 + $0x7a8] sm:$0xff]  ;;  %v1426_v49 = vmul.f32 %v3632_v1, %v401_v46 }
  0xbe   : > { %2427 = vst [vmem:[%s3648_s20 + $0x6e0] sm:$0xff] %v1403_v2  ;;  %2428 = vst [vmem:[%s3648_s20 + $0x6e8] sm:$0xff] %v1404_v3  ;;  %v1427_v50 = vmul.f32 %v3632_v1, %v402_v47  ;;  %v1428_v51 = vmul.f32 %v3632_v1, %v403_v48  ;;  %v404_v52 = vld [vmem:[%s3625_s8 + $0x7b0] sm:$0xff]  ;;  %v405_v53 = vld [vmem:[%s3625_s8 + $0x7b8] sm:$0xff] }
  0xbf   : > { %2429 = vst [vmem:[%s3648_s20 + $0x6f0] sm:$0xff] %v1405_v7  ;;  %2430 = vst [vmem:[%s3648_s20 + $0x6f8] sm:$0xff] %v1406_v8  ;;  %v406_v54 = vld [vmem:[%s3625_s8 + $0x7c0] sm:$0xff]  ;;  %v1429_v55 = vmul.f32 %v3632_v1, %v404_v52  ;;  %v1430_v56 = vmul.f32 %v3632_v1, %v405_v53  ;;  %v407_v58 = vld [vmem:[%s3625_s8 + $0x7c8] sm:$0xff] }
  0xc0   : > { %2431 = vst [vmem:[%s3648_s20 + $0x700] sm:$0xff] %v1407_v9  ;;  %2432 = vst [vmem:[%s3648_s20 + $0x708] sm:$0xff] %v1408_v13  ;;  %v1431_v57 = vmul.f32 %v3632_v1, %v406_v54  ;;  %v408_v59 = vld [vmem:[%s3625_s8 + $0x7d0] sm:$0xff]  ;;  %v409_v60 = vld [vmem:[%s3625_s8 + $0x7d8] sm:$0xff]  ;;  %v1432_v61 = vmul.f32 %v3632_v1, %v407_v58 }
  0xc1   : > { %2433 = vst [vmem:[%s3648_s20 + $0x710] sm:$0xff] %v1409_v14  ;;  %2434 = vst [vmem:[%s3648_s20 + $0x718] sm:$0xff] %v1410_v15  ;;  %v1433_v62 = vmul.f32 %v3632_v1, %v408_v59  ;;  %v1434_v63 = vmul.f32 %v3632_v1, %v409_v60  ;;  %v410_v0 = vld [vmem:[%s3625_s8 + $0x7e0] sm:$0xff]  ;;  %v411_v2 = vld [vmem:[%s3625_s8 + $0x7e8] sm:$0xff] }
  0xc2   : > { %2435 = vst [vmem:[%s3648_s20 + $0x720] sm:$0xff] %v1411_v19  ;;  %2436 = vst [vmem:[%s3648_s20 + $0x728] sm:$0xff] %v1412_v20  ;;  %v412_v3 = vld [vmem:[%s3625_s8 + $0x7f0] sm:$0xff]  ;;  %v1435_v4 = vmul.f32 %v3632_v1, %v410_v0  ;;  %v1436_v5 = vmul.f32 %v3632_v1, %v411_v2  ;;  %v413_v7 = vld [vmem:[%s3625_s8 + $0x7f8] sm:$0xff] }
  0xc3   : > { %2437 = vst [vmem:[%s3648_s20 + $0x730] sm:$0xff] %v1413_v21  ;;  %2438 = vst [vmem:[%s3648_s20 + $0x738] sm:$0xff] %v1414_v25  ;;  %v1437_v6 = vmul.f32 %v3632_v1, %v412_v3  ;;  %v414_v8 = vld [vmem:[%s3625_s8 + $0x800] sm:$0xff]  ;;  %v415_v9 = vld [vmem:[%s3625_s8 + $0x808] sm:$0xff]  ;;  %v1438_v10 = vmul.f32 %v3632_v1, %v413_v7 }
  0xc4   : > { %2439 = vst [vmem:[%s3648_s20 + $0x740] sm:$0xff] %v1415_v26  ;;  %2440 = vst [vmem:[%s3648_s20 + $0x748] sm:$0xff] %v1416_v27  ;;  %v1439_v11 = vmul.f32 %v3632_v1, %v414_v8  ;;  %v1440_v12 = vmul.f32 %v3632_v1, %v415_v9  ;;  %v416_v13 = vld [vmem:[%s3625_s8 + $0x810] sm:$0xff]  ;;  %v417_v14 = vld [vmem:[%s3625_s8 + $0x818] sm:$0xff] }
  0xc5   : > { %2441 = vst [vmem:[%s3648_s20 + $0x750] sm:$0xff] %v1417_v31  ;;  %2442 = vst [vmem:[%s3648_s20 + $0x758] sm:$0xff] %v1418_v32  ;;  %v418_v15 = vld [vmem:[%s3625_s8 + $0x820] sm:$0xff]  ;;  %v1441_v16 = vmul.f32 %v3632_v1, %v416_v13  ;;  %v1442_v17 = vmul.f32 %v3632_v1, %v417_v14  ;;  %v419_v19 = vld [vmem:[%s3625_s8 + $0x828] sm:$0xff] }
  0xc6   : > { %2443 = vst [vmem:[%s3648_s20 + $0x760] sm:$0xff] %v1419_v33  ;;  %2444 = vst [vmem:[%s3648_s20 + $0x768] sm:$0xff] %v1420_v37  ;;  %v1443_v18 = vmul.f32 %v3632_v1, %v418_v15  ;;  %v420_v20 = vld [vmem:[%s3625_s8 + $0x830] sm:$0xff]  ;;  %v421_v21 = vld [vmem:[%s3625_s8 + $0x838] sm:$0xff]  ;;  %v1444_v22 = vmul.f32 %v3632_v1, %v419_v19 }
  0xc7   : > { %2445 = vst [vmem:[%s3648_s20 + $0x770] sm:$0xff] %v1421_v38  ;;  %2446 = vst [vmem:[%s3648_s20 + $0x778] sm:$0xff] %v1422_v39  ;;  %v1445_v23 = vmul.f32 %v3632_v1, %v420_v20  ;;  %v1446_v24 = vmul.f32 %v3632_v1, %v421_v21  ;;  %v422_v25 = vld [vmem:[%s3625_s8 + $0x840] sm:$0xff]  ;;  %v423_v26 = vld [vmem:[%s3625_s8 + $0x848] sm:$0xff] }
  0xc8   : > { %2447 = vst [vmem:[%s3648_s20 + $0x780] sm:$0xff] %v1423_v43  ;;  %2448 = vst [vmem:[%s3648_s20 + $0x788] sm:$0xff] %v1424_v44  ;;  %v424_v27 = vld [vmem:[%s3625_s8 + $0x850] sm:$0xff]  ;;  %v1447_v28 = vmul.f32 %v3632_v1, %v422_v25  ;;  %v1448_v29 = vmul.f32 %v3632_v1, %v423_v26  ;;  %v425_v31 = vld [vmem:[%s3625_s8 + $0x858] sm:$0xff] }
  0xc9   : > { %2449 = vst [vmem:[%s3648_s20 + $0x790] sm:$0xff] %v1425_v45  ;;  %2450 = vst [vmem:[%s3648_s20 + $0x798] sm:$0xff] %v1426_v49  ;;  %v1449_v30 = vmul.f32 %v3632_v1, %v424_v27  ;;  %v426_v32 = vld [vmem:[%s3625_s8 + $0x860] sm:$0xff]  ;;  %v427_v33 = vld [vmem:[%s3625_s8 + $0x868] sm:$0xff]  ;;  %v1450_v34 = vmul.f32 %v3632_v1, %v425_v31 }
  0xca   : > { %2451 = vst [vmem:[%s3648_s20 + $0x7a0] sm:$0xff] %v1427_v50  ;;  %2452 = vst [vmem:[%s3648_s20 + $0x7a8] sm:$0xff] %v1428_v51  ;;  %v1451_v35 = vmul.f32 %v3632_v1, %v426_v32  ;;  %v1452_v36 = vmul.f32 %v3632_v1, %v427_v33  ;;  %v428_v37 = vld [vmem:[%s3625_s8 + $0x870] sm:$0xff]  ;;  %v429_v38 = vld [vmem:[%s3625_s8 + $0x878] sm:$0xff] }
  0xcb   : > { %2453 = vst [vmem:[%s3648_s20 + $0x7b0] sm:$0xff] %v1429_v55  ;;  %2454 = vst [vmem:[%s3648_s20 + $0x7b8] sm:$0xff] %v1430_v56  ;;  %v430_v39 = vld [vmem:[%s3625_s8 + $0x880] sm:$0xff]  ;;  %v1453_v40 = vmul.f32 %v3632_v1, %v428_v37  ;;  %v1454_v41 = vmul.f32 %v3632_v1, %v429_v38  ;;  %v431_v43 = vld [vmem:[%s3625_s8 + $0x888] sm:$0xff] }
  0xcc   : > { %2455 = vst [vmem:[%s3648_s20 + $0x7c0] sm:$0xff] %v1431_v57  ;;  %2456 = vst [vmem:[%s3648_s20 + $0x7c8] sm:$0xff] %v1432_v61  ;;  %v1455_v42 = vmul.f32 %v3632_v1, %v430_v39  ;;  %v432_v44 = vld [vmem:[%s3625_s8 + $0x890] sm:$0xff]  ;;  %v433_v45 = vld [vmem:[%s3625_s8 + $0x898] sm:$0xff]  ;;  %v1456_v46 = vmul.f32 %v3632_v1, %v431_v43 }
  0xcd   : > { %2457 = vst [vmem:[%s3648_s20 + $0x7d0] sm:$0xff] %v1433_v62  ;;  %2458 = vst [vmem:[%s3648_s20 + $0x7d8] sm:$0xff] %v1434_v63  ;;  %v1457_v47 = vmul.f32 %v3632_v1, %v432_v44  ;;  %v1458_v48 = vmul.f32 %v3632_v1, %v433_v45  ;;  %v434_v49 = vld [vmem:[%s3625_s8 + $0x8a0] sm:$0xff]  ;;  %v435_v50 = vld [vmem:[%s3625_s8 + $0x8a8] sm:$0xff] }
  0xce   : > { %2459 = vst [vmem:[%s3648_s20 + $0x7e0] sm:$0xff] %v1435_v4  ;;  %2460 = vst [vmem:[%s3648_s20 + $0x7e8] sm:$0xff] %v1436_v5  ;;  %v436_v51 = vld [vmem:[%s3625_s8 + $0x8b0] sm:$0xff]  ;;  %v1459_v52 = vmul.f32 %v3632_v1, %v434_v49  ;;  %v1460_v53 = vmul.f32 %v3632_v1, %v435_v50  ;;  %v437_v55 = vld [vmem:[%s3625_s8 + $0x8b8] sm:$0xff] }
  0xcf   : > { %2461 = vst [vmem:[%s3648_s20 + $0x7f0] sm:$0xff] %v1437_v6  ;;  %2462 = vst [vmem:[%s3648_s20 + $0x7f8] sm:$0xff] %v1438_v10  ;;  %v1461_v54 = vmul.f32 %v3632_v1, %v436_v51  ;;  %v438_v56 = vld [vmem:[%s3625_s8 + $0x8c0] sm:$0xff]  ;;  %v439_v57 = vld [vmem:[%s3625_s8 + $0x8c8] sm:$0xff]  ;;  %v1462_v58 = vmul.f32 %v3632_v1, %v437_v55 }
  0xd0   : > { %2463 = vst [vmem:[%s3648_s20 + $0x800] sm:$0xff] %v1439_v11  ;;  %2464 = vst [vmem:[%s3648_s20 + $0x808] sm:$0xff] %v1440_v12  ;;  %v1463_v59 = vmul.f32 %v3632_v1, %v438_v56  ;;  %v1464_v60 = vmul.f32 %v3632_v1, %v439_v57  ;;  %v440_v61 = vld [vmem:[%s3625_s8 + $0x8d0] sm:$0xff]  ;;  %v441_v62 = vld [vmem:[%s3625_s8 + $0x8d8] sm:$0xff] }
  0xd1   : > { %2465 = vst [vmem:[%s3648_s20 + $0x810] sm:$0xff] %v1441_v16  ;;  %2466 = vst [vmem:[%s3648_s20 + $0x818] sm:$0xff] %v1442_v17  ;;  %v442_v63 = vld [vmem:[%s3625_s8 + $0x8e0] sm:$0xff]  ;;  %v1465_v0 = vmul.f32 %v3632_v1, %v440_v61  ;;  %v1466_v2 = vmul.f32 %v3632_v1, %v441_v62  ;;  %v443_v4 = vld [vmem:[%s3625_s8 + $0x8e8] sm:$0xff] }
  0xd2   : > { %2467 = vst [vmem:[%s3648_s20 + $0x820] sm:$0xff] %v1443_v18  ;;  %2468 = vst [vmem:[%s3648_s20 + $0x828] sm:$0xff] %v1444_v22  ;;  %v1467_v3 = vmul.f32 %v3632_v1, %v442_v63  ;;  %v444_v5 = vld [vmem:[%s3625_s8 + $0x8f0] sm:$0xff]  ;;  %v445_v6 = vld [vmem:[%s3625_s8 + $0x8f8] sm:$0xff]  ;;  %v1468_v7 = vmul.f32 %v3632_v1, %v443_v4 }
  0xd3   : > { %2469 = vst [vmem:[%s3648_s20 + $0x830] sm:$0xff] %v1445_v23  ;;  %2470 = vst [vmem:[%s3648_s20 + $0x838] sm:$0xff] %v1446_v24  ;;  %v1469_v8 = vmul.f32 %v3632_v1, %v444_v5  ;;  %v1470_v9 = vmul.f32 %v3632_v1, %v445_v6  ;;  %v446_v10 = vld [vmem:[%s3625_s8 + $0x900] sm:$0xff]  ;;  %v447_v11 = vld [vmem:[%s3625_s8 + $0x908] sm:$0xff] }
  0xd4   : > { %2471 = vst [vmem:[%s3648_s20 + $0x840] sm:$0xff] %v1447_v28  ;;  %2472 = vst [vmem:[%s3648_s20 + $0x848] sm:$0xff] %v1448_v29  ;;  %v448_v12 = vld [vmem:[%s3625_s8 + $0x910] sm:$0xff]  ;;  %v1471_v13 = vmul.f32 %v3632_v1, %v446_v10  ;;  %v1472_v14 = vmul.f32 %v3632_v1, %v447_v11  ;;  %v449_v16 = vld [vmem:[%s3625_s8 + $0x918] sm:$0xff] }
  0xd5   : > { %2473 = vst [vmem:[%s3648_s20 + $0x850] sm:$0xff] %v1449_v30  ;;  %2474 = vst [vmem:[%s3648_s20 + $0x858] sm:$0xff] %v1450_v34  ;;  %v1473_v15 = vmul.f32 %v3632_v1, %v448_v12  ;;  %v450_v17 = vld [vmem:[%s3625_s8 + $0x920] sm:$0xff]  ;;  %v451_v18 = vld [vmem:[%s3625_s8 + $0x928] sm:$0xff]  ;;  %v1474_v19 = vmul.f32 %v3632_v1, %v449_v16 }
  0xd6   : > { %2475 = vst [vmem:[%s3648_s20 + $0x860] sm:$0xff] %v1451_v35  ;;  %2476 = vst [vmem:[%s3648_s20 + $0x868] sm:$0xff] %v1452_v36  ;;  %v1475_v20 = vmul.f32 %v3632_v1, %v450_v17  ;;  %v1476_v21 = vmul.f32 %v3632_v1, %v451_v18  ;;  %v452_v22 = vld [vmem:[%s3625_s8 + $0x930] sm:$0xff]  ;;  %v453_v23 = vld [vmem:[%s3625_s8 + $0x938] sm:$0xff] }
  0xd7   : > { %2477 = vst [vmem:[%s3648_s20 + $0x870] sm:$0xff] %v1453_v40  ;;  %2478 = vst [vmem:[%s3648_s20 + $0x878] sm:$0xff] %v1454_v41  ;;  %v454_v24 = vld [vmem:[%s3625_s8 + $0x940] sm:$0xff]  ;;  %v1477_v25 = vmul.f32 %v3632_v1, %v452_v22  ;;  %v1478_v26 = vmul.f32 %v3632_v1, %v453_v23  ;;  %v455_v28 = vld [vmem:[%s3625_s8 + $0x948] sm:$0xff] }
  0xd8   : > { %2479 = vst [vmem:[%s3648_s20 + $0x880] sm:$0xff] %v1455_v42  ;;  %2480 = vst [vmem:[%s3648_s20 + $0x888] sm:$0xff] %v1456_v46  ;;  %v1479_v27 = vmul.f32 %v3632_v1, %v454_v24  ;;  %v456_v29 = vld [vmem:[%s3625_s8 + $0x950] sm:$0xff]  ;;  %v457_v30 = vld [vmem:[%s3625_s8 + $0x958] sm:$0xff]  ;;  %v1480_v31 = vmul.f32 %v3632_v1, %v455_v28 }
  0xd9   : > { %2481 = vst [vmem:[%s3648_s20 + $0x890] sm:$0xff] %v1457_v47  ;;  %2482 = vst [vmem:[%s3648_s20 + $0x898] sm:$0xff] %v1458_v48  ;;  %v1481_v32 = vmul.f32 %v3632_v1, %v456_v29  ;;  %v1482_v33 = vmul.f32 %v3632_v1, %v457_v30  ;;  %v458_v34 = vld [vmem:[%s3625_s8 + $0x960] sm:$0xff]  ;;  %v459_v35 = vld [vmem:[%s3625_s8 + $0x968] sm:$0xff] }
  0xda   : > { %2483 = vst [vmem:[%s3648_s20 + $0x8a0] sm:$0xff] %v1459_v52  ;;  %2484 = vst [vmem:[%s3648_s20 + $0x8a8] sm:$0xff] %v1460_v53  ;;  %v460_v36 = vld [vmem:[%s3625_s8 + $0x970] sm:$0xff]  ;;  %v1483_v37 = vmul.f32 %v3632_v1, %v458_v34  ;;  %v1484_v38 = vmul.f32 %v3632_v1, %v459_v35  ;;  %v461_v40 = vld [vmem:[%s3625_s8 + $0x978] sm:$0xff] }
  0xdb   : > { %2485 = vst [vmem:[%s3648_s20 + $0x8b0] sm:$0xff] %v1461_v54  ;;  %2486 = vst [vmem:[%s3648_s20 + $0x8b8] sm:$0xff] %v1462_v58  ;;  %v1485_v39 = vmul.f32 %v3632_v1, %v460_v36  ;;  %v462_v41 = vld [vmem:[%s3625_s8 + $0x980] sm:$0xff]  ;;  %v463_v42 = vld [vmem:[%s3625_s8 + $0x988] sm:$0xff]  ;;  %v1486_v43 = vmul.f32 %v3632_v1, %v461_v40 }
  0xdc   : > { %2487 = vst [vmem:[%s3648_s20 + $0x8c0] sm:$0xff] %v1463_v59  ;;  %2488 = vst [vmem:[%s3648_s20 + $0x8c8] sm:$0xff] %v1464_v60  ;;  %v1487_v44 = vmul.f32 %v3632_v1, %v462_v41  ;;  %v1488_v45 = vmul.f32 %v3632_v1, %v463_v42  ;;  %v464_v46 = vld [vmem:[%s3625_s8 + $0x990] sm:$0xff]  ;;  %v465_v47 = vld [vmem:[%s3625_s8 + $0x998] sm:$0xff] }
  0xdd   : > { %2489 = vst [vmem:[%s3648_s20 + $0x8d0] sm:$0xff] %v1465_v0  ;;  %2490 = vst [vmem:[%s3648_s20 + $0x8d8] sm:$0xff] %v1466_v2  ;;  %v466_v48 = vld [vmem:[%s3625_s8 + $0x9a0] sm:$0xff]  ;;  %v1489_v49 = vmul.f32 %v3632_v1, %v464_v46  ;;  %v1490_v50 = vmul.f32 %v3632_v1, %v465_v47  ;;  %v467_v52 = vld [vmem:[%s3625_s8 + $0x9a8] sm:$0xff] }
  0xde   : > { %2491 = vst [vmem:[%s3648_s20 + $0x8e0] sm:$0xff] %v1467_v3  ;;  %2492 = vst [vmem:[%s3648_s20 + $0x8e8] sm:$0xff] %v1468_v7  ;;  %v1491_v51 = vmul.f32 %v3632_v1, %v466_v48  ;;  %v468_v53 = vld [vmem:[%s3625_s8 + $0x9b0] sm:$0xff]  ;;  %v469_v54 = vld [vmem:[%s3625_s8 + $0x9b8] sm:$0xff]  ;;  %v1492_v55 = vmul.f32 %v3632_v1, %v467_v52 }
  0xdf   : > { %2493 = vst [vmem:[%s3648_s20 + $0x8f0] sm:$0xff] %v1469_v8  ;;  %2494 = vst [vmem:[%s3648_s20 + $0x8f8] sm:$0xff] %v1470_v9  ;;  %v1493_v56 = vmul.f32 %v3632_v1, %v468_v53  ;;  %v1494_v57 = vmul.f32 %v3632_v1, %v469_v54  ;;  %v470_v58 = vld [vmem:[%s3625_s8 + $0x9c0] sm:$0xff]  ;;  %v471_v59 = vld [vmem:[%s3625_s8 + $0x9c8] sm:$0xff] }
  0xe0   : > { %2495 = vst [vmem:[%s3648_s20 + $0x900] sm:$0xff] %v1471_v13  ;;  %2496 = vst [vmem:[%s3648_s20 + $0x908] sm:$0xff] %v1472_v14  ;;  %v472_v60 = vld [vmem:[%s3625_s8 + $0x9d0] sm:$0xff]  ;;  %v1495_v61 = vmul.f32 %v3632_v1, %v470_v58  ;;  %v1496_v62 = vmul.f32 %v3632_v1, %v471_v59  ;;  %v473_v0 = vld [vmem:[%s3625_s8 + $0x9d8] sm:$0xff] }
  0xe1   : > { %2497 = vst [vmem:[%s3648_s20 + $0x910] sm:$0xff] %v1473_v15  ;;  %2498 = vst [vmem:[%s3648_s20 + $0x918] sm:$0xff] %v1474_v19  ;;  %v1497_v63 = vmul.f32 %v3632_v1, %v472_v60  ;;  %v474_v2 = vld [vmem:[%s3625_s8 + $0x9e0] sm:$0xff]  ;;  %v475_v3 = vld [vmem:[%s3625_s8 + $0x9e8] sm:$0xff]  ;;  %v1498_v4 = vmul.f32 %v3632_v1, %v473_v0 }
  0xe2   : > { %2499 = vst [vmem:[%s3648_s20 + $0x920] sm:$0xff] %v1475_v20  ;;  %2500 = vst [vmem:[%s3648_s20 + $0x928] sm:$0xff] %v1476_v21  ;;  %v1499_v5 = vmul.f32 %v3632_v1, %v474_v2  ;;  %v1500_v6 = vmul.f32 %v3632_v1, %v475_v3  ;;  %v476_v7 = vld [vmem:[%s3625_s8 + $0x9f0] sm:$0xff]  ;;  %v477_v8 = vld [vmem:[%s3625_s8 + $0x9f8] sm:$0xff] }
  0xe3   : > { %2501 = vst [vmem:[%s3648_s20 + $0x930] sm:$0xff] %v1477_v25  ;;  %2502 = vst [vmem:[%s3648_s20 + $0x938] sm:$0xff] %v1478_v26  ;;  %v478_v9 = vld [vmem:[%s3625_s8 + $0xa00] sm:$0xff]  ;;  %v1501_v10 = vmul.f32 %v3632_v1, %v476_v7  ;;  %v1502_v11 = vmul.f32 %v3632_v1, %v477_v8  ;;  %v479_v13 = vld [vmem:[%s3625_s8 + $0xa08] sm:$0xff] }
  0xe4   : > { %2503 = vst [vmem:[%s3648_s20 + $0x940] sm:$0xff] %v1479_v27  ;;  %2504 = vst [vmem:[%s3648_s20 + $0x948] sm:$0xff] %v1480_v31  ;;  %v1503_v12 = vmul.f32 %v3632_v1, %v478_v9  ;;  %v480_v14 = vld [vmem:[%s3625_s8 + $0xa10] sm:$0xff]  ;;  %v481_v15 = vld [vmem:[%s3625_s8 + $0xa18] sm:$0xff]  ;;  %v1504_v16 = vmul.f32 %v3632_v1, %v479_v13 }
  0xe5   : > { %2505 = vst [vmem:[%s3648_s20 + $0x950] sm:$0xff] %v1481_v32  ;;  %2506 = vst [vmem:[%s3648_s20 + $0x958] sm:$0xff] %v1482_v33  ;;  %v1505_v17 = vmul.f32 %v3632_v1, %v480_v14  ;;  %v1506_v18 = vmul.f32 %v3632_v1, %v481_v15  ;;  %v482_v19 = vld [vmem:[%s3625_s8 + $0xa20] sm:$0xff]  ;;  %v483_v20 = vld [vmem:[%s3625_s8 + $0xa28] sm:$0xff] }
  0xe6   : > { %2507 = vst [vmem:[%s3648_s20 + $0x960] sm:$0xff] %v1483_v37  ;;  %2508 = vst [vmem:[%s3648_s20 + $0x968] sm:$0xff] %v1484_v38  ;;  %v484_v21 = vld [vmem:[%s3625_s8 + $0xa30] sm:$0xff]  ;;  %v1507_v22 = vmul.f32 %v3632_v1, %v482_v19  ;;  %v1508_v23 = vmul.f32 %v3632_v1, %v483_v20  ;;  %v485_v25 = vld [vmem:[%s3625_s8 + $0xa38] sm:$0xff] }
  0xe7   : > { %2509 = vst [vmem:[%s3648_s20 + $0x970] sm:$0xff] %v1485_v39  ;;  %2510 = vst [vmem:[%s3648_s20 + $0x978] sm:$0xff] %v1486_v43  ;;  %v1509_v24 = vmul.f32 %v3632_v1, %v484_v21  ;;  %v486_v26 = vld [vmem:[%s3625_s8 + $0xa40] sm:$0xff]  ;;  %v487_v27 = vld [vmem:[%s3625_s8 + $0xa48] sm:$0xff]  ;;  %v1510_v28 = vmul.f32 %v3632_v1, %v485_v25 }
  0xe8   : > { %2511 = vst [vmem:[%s3648_s20 + $0x980] sm:$0xff] %v1487_v44  ;;  %2512 = vst [vmem:[%s3648_s20 + $0x988] sm:$0xff] %v1488_v45  ;;  %v1511_v29 = vmul.f32 %v3632_v1, %v486_v26  ;;  %v1512_v30 = vmul.f32 %v3632_v1, %v487_v27  ;;  %v488_v31 = vld [vmem:[%s3625_s8 + $0xa50] sm:$0xff]  ;;  %v489_v32 = vld [vmem:[%s3625_s8 + $0xa58] sm:$0xff] }
  0xe9   : > { %2513 = vst [vmem:[%s3648_s20 + $0x990] sm:$0xff] %v1489_v49  ;;  %2514 = vst [vmem:[%s3648_s20 + $0x998] sm:$0xff] %v1490_v50  ;;  %v490_v33 = vld [vmem:[%s3625_s8 + $0xa60] sm:$0xff]  ;;  %v1513_v34 = vmul.f32 %v3632_v1, %v488_v31  ;;  %v1514_v35 = vmul.f32 %v3632_v1, %v489_v32  ;;  %v491_v37 = vld [vmem:[%s3625_s8 + $0xa68] sm:$0xff] }
  0xea   : > { %2515 = vst [vmem:[%s3648_s20 + $0x9a0] sm:$0xff] %v1491_v51  ;;  %2516 = vst [vmem:[%s3648_s20 + $0x9a8] sm:$0xff] %v1492_v55  ;;  %v1515_v36 = vmul.f32 %v3632_v1, %v490_v33  ;;  %v492_v38 = vld [vmem:[%s3625_s8 + $0xa70] sm:$0xff]  ;;  %v493_v39 = vld [vmem:[%s3625_s8 + $0xa78] sm:$0xff]  ;;  %v1516_v40 = vmul.f32 %v3632_v1, %v491_v37 }
  0xeb   : > { %2517 = vst [vmem:[%s3648_s20 + $0x9b0] sm:$0xff] %v1493_v56  ;;  %2518 = vst [vmem:[%s3648_s20 + $0x9b8] sm:$0xff] %v1494_v57  ;;  %v1517_v41 = vmul.f32 %v3632_v1, %v492_v38  ;;  %v1518_v42 = vmul.f32 %v3632_v1, %v493_v39  ;;  %v494_v43 = vld [vmem:[%s3625_s8 + $0xa80] sm:$0xff]  ;;  %v495_v44 = vld [vmem:[%s3625_s8 + $0xa88] sm:$0xff] }
  0xec   : > { %2519 = vst [vmem:[%s3648_s20 + $0x9c0] sm:$0xff] %v1495_v61  ;;  %2520 = vst [vmem:[%s3648_s20 + $0x9c8] sm:$0xff] %v1496_v62  ;;  %v496_v45 = vld [vmem:[%s3625_s8 + $0xa90] sm:$0xff]  ;;  %v1519_v46 = vmul.f32 %v3632_v1, %v494_v43  ;;  %v1520_v47 = vmul.f32 %v3632_v1, %v495_v44  ;;  %v497_v49 = vld [vmem:[%s3625_s8 + $0xa98] sm:$0xff] }
  0xed   : > { %2521 = vst [vmem:[%s3648_s20 + $0x9d0] sm:$0xff] %v1497_v63  ;;  %2522 = vst [vmem:[%s3648_s20 + $0x9d8] sm:$0xff] %v1498_v4  ;;  %v1521_v48 = vmul.f32 %v3632_v1, %v496_v45  ;;  %v498_v50 = vld [vmem:[%s3625_s8 + $0xaa0] sm:$0xff]  ;;  %v499_v51 = vld [vmem:[%s3625_s8 + $0xaa8] sm:$0xff]  ;;  %v1522_v52 = vmul.f32 %v3632_v1, %v497_v49 }
  0xee   : > { %2523 = vst [vmem:[%s3648_s20 + $0x9e0] sm:$0xff] %v1499_v5  ;;  %2524 = vst [vmem:[%s3648_s20 + $0x9e8] sm:$0xff] %v1500_v6  ;;  %v1523_v53 = vmul.f32 %v3632_v1, %v498_v50  ;;  %v1524_v54 = vmul.f32 %v3632_v1, %v499_v51  ;;  %v500_v55 = vld [vmem:[%s3625_s8 + $0xab0] sm:$0xff]  ;;  %v501_v56 = vld [vmem:[%s3625_s8 + $0xab8] sm:$0xff] }
  0xef   : > { %2525 = vst [vmem:[%s3648_s20 + $0x9f0] sm:$0xff] %v1501_v10  ;;  %2526 = vst [vmem:[%s3648_s20 + $0x9f8] sm:$0xff] %v1502_v11  ;;  %v502_v57 = vld [vmem:[%s3625_s8 + $0xac0] sm:$0xff]  ;;  %v1525_v58 = vmul.f32 %v3632_v1, %v500_v55  ;;  %v1526_v59 = vmul.f32 %v3632_v1, %v501_v56  ;;  %v503_v61 = vld [vmem:[%s3625_s8 + $0xac8] sm:$0xff] }
  0xf0   : > { %2527 = vst [vmem:[%s3648_s20 + $0xa00] sm:$0xff] %v1503_v12  ;;  %2528 = vst [vmem:[%s3648_s20 + $0xa08] sm:$0xff] %v1504_v16  ;;  %v1527_v60 = vmul.f32 %v3632_v1, %v502_v57  ;;  %v504_v62 = vld [vmem:[%s3625_s8 + $0xad0] sm:$0xff]  ;;  %v505_v63 = vld [vmem:[%s3625_s8 + $0xad8] sm:$0xff]  ;;  %v1528_v0 = vmul.f32 %v3632_v1, %v503_v61 }
  0xf1   : > { %2529 = vst [vmem:[%s3648_s20 + $0xa10] sm:$0xff] %v1505_v17  ;;  %2530 = vst [vmem:[%s3648_s20 + $0xa18] sm:$0xff] %v1506_v18  ;;  %v1529_v2 = vmul.f32 %v3632_v1, %v504_v62  ;;  %v1530_v3 = vmul.f32 %v3632_v1, %v505_v63  ;;  %v506_v4 = vld [vmem:[%s3625_s8 + $0xae0] sm:$0xff]  ;;  %v507_v5 = vld [vmem:[%s3625_s8 + $0xae8] sm:$0xff] }
  0xf2   : > { %2531 = vst [vmem:[%s3648_s20 + $0xa20] sm:$0xff] %v1507_v22  ;;  %2532 = vst [vmem:[%s3648_s20 + $0xa28] sm:$0xff] %v1508_v23  ;;  %v508_v6 = vld [vmem:[%s3625_s8 + $0xaf0] sm:$0xff]  ;;  %v1531_v7 = vmul.f32 %v3632_v1, %v506_v4  ;;  %v1532_v8 = vmul.f32 %v3632_v1, %v507_v5  ;;  %v509_v10 = vld [vmem:[%s3625_s8 + $0xaf8] sm:$0xff] }
  0xf3   : > { %2533 = vst [vmem:[%s3648_s20 + $0xa30] sm:$0xff] %v1509_v24  ;;  %2534 = vst [vmem:[%s3648_s20 + $0xa38] sm:$0xff] %v1510_v28  ;;  %v1533_v9 = vmul.f32 %v3632_v1, %v508_v6  ;;  %v510_v11 = vld [vmem:[%s3625_s8 + $0xb00] sm:$0xff]  ;;  %v511_v12 = vld [vmem:[%s3625_s8 + $0xb08] sm:$0xff]  ;;  %v1534_v13 = vmul.f32 %v3632_v1, %v509_v10 }
  0xf4   : > { %2535 = vst [vmem:[%s3648_s20 + $0xa40] sm:$0xff] %v1511_v29  ;;  %2536 = vst [vmem:[%s3648_s20 + $0xa48] sm:$0xff] %v1512_v30  ;;  %v1535_v14 = vmul.f32 %v3632_v1, %v510_v11  ;;  %v1536_v15 = vmul.f32 %v3632_v1, %v511_v12  ;;  %v512_v16 = vld [vmem:[%s3625_s8 + $0xb10] sm:$0xff]  ;;  %v513_v17 = vld [vmem:[%s3625_s8 + $0xb18] sm:$0xff] }
  0xf5   : > { %2537 = vst [vmem:[%s3648_s20 + $0xa50] sm:$0xff] %v1513_v34  ;;  %2538 = vst [vmem:[%s3648_s20 + $0xa58] sm:$0xff] %v1514_v35  ;;  %v514_v18 = vld [vmem:[%s3625_s8 + $0xb20] sm:$0xff]  ;;  %v1537_v19 = vmul.f32 %v3632_v1, %v512_v16  ;;  %v1538_v20 = vmul.f32 %v3632_v1, %v513_v17  ;;  %v515_v22 = vld [vmem:[%s3625_s8 + $0xb28] sm:$0xff] }
  0xf6   : > { %2539 = vst [vmem:[%s3648_s20 + $0xa60] sm:$0xff] %v1515_v36  ;;  %2540 = vst [vmem:[%s3648_s20 + $0xa68] sm:$0xff] %v1516_v40  ;;  %v1539_v21 = vmul.f32 %v3632_v1, %v514_v18  ;;  %v516_v23 = vld [vmem:[%s3625_s8 + $0xb30] sm:$0xff]  ;;  %v517_v24 = vld [vmem:[%s3625_s8 + $0xb38] sm:$0xff]  ;;  %v1540_v25 = vmul.f32 %v3632_v1, %v515_v22 }
  0xf7   : > { %2541 = vst [vmem:[%s3648_s20 + $0xa70] sm:$0xff] %v1517_v41  ;;  %2542 = vst [vmem:[%s3648_s20 + $0xa78] sm:$0xff] %v1518_v42  ;;  %v1541_v26 = vmul.f32 %v3632_v1, %v516_v23  ;;  %v1542_v27 = vmul.f32 %v3632_v1, %v517_v24  ;;  %v518_v28 = vld [vmem:[%s3625_s8 + $0xb40] sm:$0xff]  ;;  %v519_v29 = vld [vmem:[%s3625_s8 + $0xb48] sm:$0xff] }
  0xf8   : > { %2543 = vst [vmem:[%s3648_s20 + $0xa80] sm:$0xff] %v1519_v46  ;;  %2544 = vst [vmem:[%s3648_s20 + $0xa88] sm:$0xff] %v1520_v47  ;;  %v520_v30 = vld [vmem:[%s3625_s8 + $0xb50] sm:$0xff]  ;;  %v1543_v31 = vmul.f32 %v3632_v1, %v518_v28  ;;  %v1544_v32 = vmul.f32 %v3632_v1, %v519_v29  ;;  %v521_v34 = vld [vmem:[%s3625_s8 + $0xb58] sm:$0xff] }
  0xf9   : > { %2545 = vst [vmem:[%s3648_s20 + $0xa90] sm:$0xff] %v1521_v48  ;;  %2546 = vst [vmem:[%s3648_s20 + $0xa98] sm:$0xff] %v1522_v52  ;;  %v1545_v33 = vmul.f32 %v3632_v1, %v520_v30  ;;  %v522_v35 = vld [vmem:[%s3625_s8 + $0xb60] sm:$0xff]  ;;  %v523_v36 = vld [vmem:[%s3625_s8 + $0xb68] sm:$0xff]  ;;  %v1546_v37 = vmul.f32 %v3632_v1, %v521_v34 }
  0xfa   : > { %2547 = vst [vmem:[%s3648_s20 + $0xaa0] sm:$0xff] %v1523_v53  ;;  %2548 = vst [vmem:[%s3648_s20 + $0xaa8] sm:$0xff] %v1524_v54  ;;  %v1547_v38 = vmul.f32 %v3632_v1, %v522_v35  ;;  %v1548_v39 = vmul.f32 %v3632_v1, %v523_v36  ;;  %v524_v40 = vld [vmem:[%s3625_s8 + $0xb70] sm:$0xff]  ;;  %v525_v41 = vld [vmem:[%s3625_s8 + $0xb78] sm:$0xff] }
  0xfb   : > { %2549 = vst [vmem:[%s3648_s20 + $0xab0] sm:$0xff] %v1525_v58  ;;  %2550 = vst [vmem:[%s3648_s20 + $0xab8] sm:$0xff] %v1526_v59  ;;  %v526_v42 = vld [vmem:[%s3625_s8 + $0xb80] sm:$0xff]  ;;  %v1549_v43 = vmul.f32 %v3632_v1, %v524_v40  ;;  %v1550_v44 = vmul.f32 %v3632_v1, %v525_v41  ;;  %v527_v46 = vld [vmem:[%s3625_s8 + $0xb88] sm:$0xff] }
  0xfc   : > { %2551 = vst [vmem:[%s3648_s20 + $0xac0] sm:$0xff] %v1527_v60  ;;  %2552 = vst [vmem:[%s3648_s20 + $0xac8] sm:$0xff] %v1528_v0  ;;  %v1551_v45 = vmul.f32 %v3632_v1, %v526_v42  ;;  %v528_v47 = vld [vmem:[%s3625_s8 + $0xb90] sm:$0xff]  ;;  %v529_v48 = vld [vmem:[%s3625_s8 + $0xb98] sm:$0xff]  ;;  %v1552_v49 = vmul.f32 %v3632_v1, %v527_v46 }
  0xfd   : > { %2553 = vst [vmem:[%s3648_s20 + $0xad0] sm:$0xff] %v1529_v2  ;;  %2554 = vst [vmem:[%s3648_s20 + $0xad8] sm:$0xff] %v1530_v3  ;;  %v1553_v50 = vmul.f32 %v3632_v1, %v528_v47  ;;  %v1554_v51 = vmul.f32 %v3632_v1, %v529_v48  ;;  %v530_v52 = vld [vmem:[%s3625_s8 + $0xba0] sm:$0xff]  ;;  %v531_v53 = vld [vmem:[%s3625_s8 + $0xba8] sm:$0xff] }
  0xfe   : > { %2555 = vst [vmem:[%s3648_s20 + $0xae0] sm:$0xff] %v1531_v7  ;;  %2556 = vst [vmem:[%s3648_s20 + $0xae8] sm:$0xff] %v1532_v8  ;;  %v532_v54 = vld [vmem:[%s3625_s8 + $0xbb0] sm:$0xff]  ;;  %v1555_v55 = vmul.f32 %v3632_v1, %v530_v52  ;;  %v1556_v56 = vmul.f32 %v3632_v1, %v531_v53  ;;  %v533_v58 = vld [vmem:[%s3625_s8 + $0xbb8] sm:$0xff] }
  0xff   : > { %2557 = vst [vmem:[%s3648_s20 + $0xaf0] sm:$0xff] %v1533_v9  ;;  %2558 = vst [vmem:[%s3648_s20 + $0xaf8] sm:$0xff] %v1534_v13  ;;  %v1557_v57 = vmul.f32 %v3632_v1, %v532_v54  ;;  %v534_v59 = vld [vmem:[%s3625_s8 + $0xbc0] sm:$0xff]  ;;  %v535_v60 = vld [vmem:[%s3625_s8 + $0xbc8] sm:$0xff]  ;;  %v1558_v61 = vmul.f32 %v3632_v1, %v533_v58 }
 0x100   : > { %2559 = vst [vmem:[%s3648_s20 + $0xb00] sm:$0xff] %v1535_v14  ;;  %2560 = vst [vmem:[%s3648_s20 + $0xb08] sm:$0xff] %v1536_v15  ;;  %v1559_v62 = vmul.f32 %v3632_v1, %v534_v59  ;;  %v1560_v63 = vmul.f32 %v3632_v1, %v535_v60  ;;  %v536_v0 = vld [vmem:[%s3625_s8 + $0xbd0] sm:$0xff]  ;;  %v537_v2 = vld [vmem:[%s3625_s8 + $0xbd8] sm:$0xff] }
 0x101   : > { %2561 = vst [vmem:[%s3648_s20 + $0xb10] sm:$0xff] %v1537_v19  ;;  %2562 = vst [vmem:[%s3648_s20 + $0xb18] sm:$0xff] %v1538_v20  ;;  %v538_v3 = vld [vmem:[%s3625_s8 + $0xbe0] sm:$0xff]  ;;  %v1561_v4 = vmul.f32 %v3632_v1, %v536_v0  ;;  %v1562_v5 = vmul.f32 %v3632_v1, %v537_v2  ;;  %v539_v7 = vld [vmem:[%s3625_s8 + $0xbe8] sm:$0xff] }
 0x102   : > { %2563 = vst [vmem:[%s3648_s20 + $0xb20] sm:$0xff] %v1539_v21  ;;  %2564 = vst [vmem:[%s3648_s20 + $0xb28] sm:$0xff] %v1540_v25  ;;  %v1563_v6 = vmul.f32 %v3632_v1, %v538_v3  ;;  %v540_v8 = vld [vmem:[%s3625_s8 + $0xbf0] sm:$0xff]  ;;  %v541_v9 = vld [vmem:[%s3625_s8 + $0xbf8] sm:$0xff]  ;;  %v1564_v10 = vmul.f32 %v3632_v1, %v539_v7 }
 0x103   : > { %2565 = vst [vmem:[%s3648_s20 + $0xb30] sm:$0xff] %v1541_v26  ;;  %2566 = vst [vmem:[%s3648_s20 + $0xb38] sm:$0xff] %v1542_v27  ;;  %v1565_v11 = vmul.f32 %v3632_v1, %v540_v8  ;;  %v1566_v12 = vmul.f32 %v3632_v1, %v541_v9  ;;  %v542_v13 = vld [vmem:[%s3625_s8 + $0xc00] sm:$0xff]  ;;  %v543_v14 = vld [vmem:[%s3625_s8 + $0xc08] sm:$0xff] }
 0x104   : > { %2567 = vst [vmem:[%s3648_s20 + $0xb40] sm:$0xff] %v1543_v31  ;;  %2568 = vst [vmem:[%s3648_s20 + $0xb48] sm:$0xff] %v1544_v32  ;;  %v544_v15 = vld [vmem:[%s3625_s8 + $0xc10] sm:$0xff]  ;;  %v1567_v16 = vmul.f32 %v3632_v1, %v542_v13  ;;  %v1568_v17 = vmul.f32 %v3632_v1, %v543_v14  ;;  %v545_v19 = vld [vmem:[%s3625_s8 + $0xc18] sm:$0xff] }
 0x105   : > { %2569 = vst [vmem:[%s3648_s20 + $0xb50] sm:$0xff] %v1545_v33  ;;  %2570 = vst [vmem:[%s3648_s20 + $0xb58] sm:$0xff] %v1546_v37  ;;  %v1569_v18 = vmul.f32 %v3632_v1, %v544_v15  ;;  %v546_v20 = vld [vmem:[%s3625_s8 + $0xc20] sm:$0xff]  ;;  %v547_v21 = vld [vmem:[%s3625_s8 + $0xc28] sm:$0xff]  ;;  %v1570_v22 = vmul.f32 %v3632_v1, %v545_v19 }
 0x106   : > { %2571 = vst [vmem:[%s3648_s20 + $0xb60] sm:$0xff] %v1547_v38  ;;  %2572 = vst [vmem:[%s3648_s20 + $0xb68] sm:$0xff] %v1548_v39  ;;  %v1571_v23 = vmul.f32 %v3632_v1, %v546_v20  ;;  %v1572_v24 = vmul.f32 %v3632_v1, %v547_v21  ;;  %v548_v25 = vld [vmem:[%s3625_s8 + $0xc30] sm:$0xff]  ;;  %v549_v26 = vld [vmem:[%s3625_s8 + $0xc38] sm:$0xff] }
 0x107   : > { %2573 = vst [vmem:[%s3648_s20 + $0xb70] sm:$0xff] %v1549_v43  ;;  %2574 = vst [vmem:[%s3648_s20 + $0xb78] sm:$0xff] %v1550_v44  ;;  %v550_v27 = vld [vmem:[%s3625_s8 + $0xc40] sm:$0xff]  ;;  %v1573_v28 = vmul.f32 %v3632_v1, %v548_v25  ;;  %v1574_v29 = vmul.f32 %v3632_v1, %v549_v26  ;;  %v551_v31 = vld [vmem:[%s3625_s8 + $0xc48] sm:$0xff] }
 0x108   : > { %2575 = vst [vmem:[%s3648_s20 + $0xb80] sm:$0xff] %v1551_v45  ;;  %2576 = vst [vmem:[%s3648_s20 + $0xb88] sm:$0xff] %v1552_v49  ;;  %v1575_v30 = vmul.f32 %v3632_v1, %v550_v27  ;;  %v552_v32 = vld [vmem:[%s3625_s8 + $0xc50] sm:$0xff]  ;;  %v553_v33 = vld [vmem:[%s3625_s8 + $0xc58] sm:$0xff]  ;;  %v1576_v34 = vmul.f32 %v3632_v1, %v551_v31 }
 0x109   : > { %2577 = vst [vmem:[%s3648_s20 + $0xb90] sm:$0xff] %v1553_v50  ;;  %2578 = vst [vmem:[%s3648_s20 + $0xb98] sm:$0xff] %v1554_v51  ;;  %v1577_v35 = vmul.f32 %v3632_v1, %v552_v32  ;;  %v1578_v36 = vmul.f32 %v3632_v1, %v553_v33  ;;  %v554_v37 = vld [vmem:[%s3625_s8 + $0xc60] sm:$0xff]  ;;  %v555_v38 = vld [vmem:[%s3625_s8 + $0xc68] sm:$0xff] }
 0x10a   : > { %2579 = vst [vmem:[%s3648_s20 + $0xba0] sm:$0xff] %v1555_v55  ;;  %2580 = vst [vmem:[%s3648_s20 + $0xba8] sm:$0xff] %v1556_v56  ;;  %v556_v39 = vld [vmem:[%s3625_s8 + $0xc70] sm:$0xff]  ;;  %v1579_v40 = vmul.f32 %v3632_v1, %v554_v37  ;;  %v1580_v41 = vmul.f32 %v3632_v1, %v555_v38  ;;  %v557_v43 = vld [vmem:[%s3625_s8 + $0xc78] sm:$0xff] }
 0x10b   : > { %2581 = vst [vmem:[%s3648_s20 + $0xbb0] sm:$0xff] %v1557_v57  ;;  %2582 = vst [vmem:[%s3648_s20 + $0xbb8] sm:$0xff] %v1558_v61  ;;  %v1581_v42 = vmul.f32 %v3632_v1, %v556_v39  ;;  %v558_v44 = vld [vmem:[%s3625_s8 + $0xc80] sm:$0xff]  ;;  %v559_v45 = vld [vmem:[%s3625_s8 + $0xc88] sm:$0xff]  ;;  %v1582_v46 = vmul.f32 %v3632_v1, %v557_v43 }
 0x10c   : > { %2583 = vst [vmem:[%s3648_s20 + $0xbc0] sm:$0xff] %v1559_v62  ;;  %2584 = vst [vmem:[%s3648_s20 + $0xbc8] sm:$0xff] %v1560_v63  ;;  %v1583_v47 = vmul.f32 %v3632_v1, %v558_v44  ;;  %v1584_v48 = vmul.f32 %v3632_v1, %v559_v45  ;;  %v560_v49 = vld [vmem:[%s3625_s8 + $0xc90] sm:$0xff]  ;;  %v561_v50 = vld [vmem:[%s3625_s8 + $0xc98] sm:$0xff] }
 0x10d   : > { %2585 = vst [vmem:[%s3648_s20 + $0xbd0] sm:$0xff] %v1561_v4  ;;  %2586 = vst [vmem:[%s3648_s20 + $0xbd8] sm:$0xff] %v1562_v5  ;;  %v562_v51 = vld [vmem:[%s3625_s8 + $0xca0] sm:$0xff]  ;;  %v1585_v52 = vmul.f32 %v3632_v1, %v560_v49  ;;  %v1586_v53 = vmul.f32 %v3632_v1, %v561_v50  ;;  %v563_v55 = vld [vmem:[%s3625_s8 + $0xca8] sm:$0xff] }
 0x10e   : > { %2587 = vst [vmem:[%s3648_s20 + $0xbe0] sm:$0xff] %v1563_v6  ;;  %2588 = vst [vmem:[%s3648_s20 + $0xbe8] sm:$0xff] %v1564_v10  ;;  %v1587_v54 = vmul.f32 %v3632_v1, %v562_v51  ;;  %v564_v56 = vld [vmem:[%s3625_s8 + $0xcb0] sm:$0xff]  ;;  %v565_v57 = vld [vmem:[%s3625_s8 + $0xcb8] sm:$0xff]  ;;  %v1588_v58 = vmul.f32 %v3632_v1, %v563_v55 }
 0x10f   : > { %2589 = vst [vmem:[%s3648_s20 + $0xbf0] sm:$0xff] %v1565_v11  ;;  %2590 = vst [vmem:[%s3648_s20 + $0xbf8] sm:$0xff] %v1566_v12  ;;  %v1589_v59 = vmul.f32 %v3632_v1, %v564_v56  ;;  %v1590_v60 = vmul.f32 %v3632_v1, %v565_v57  ;;  %v566_v61 = vld [vmem:[%s3625_s8 + $0xcc0] sm:$0xff]  ;;  %v567_v62 = vld [vmem:[%s3625_s8 + $0xcc8] sm:$0xff] }
 0x110   : > { %2591 = vst [vmem:[%s3648_s20 + $0xc00] sm:$0xff] %v1567_v16  ;;  %2592 = vst [vmem:[%s3648_s20 + $0xc08] sm:$0xff] %v1568_v17  ;;  %v568_v63 = vld [vmem:[%s3625_s8 + $0xcd0] sm:$0xff]  ;;  %v1591_v0 = vmul.f32 %v3632_v1, %v566_v61  ;;  %v1592_v2 = vmul.f32 %v3632_v1, %v567_v62  ;;  %v569_v4 = vld [vmem:[%s3625_s8 + $0xcd8] sm:$0xff] }
 0x111   : > { %2593 = vst [vmem:[%s3648_s20 + $0xc10] sm:$0xff] %v1569_v18  ;;  %2594 = vst [vmem:[%s3648_s20 + $0xc18] sm:$0xff] %v1570_v22  ;;  %v1593_v3 = vmul.f32 %v3632_v1, %v568_v63  ;;  %v570_v5 = vld [vmem:[%s3625_s8 + $0xce0] sm:$0xff]  ;;  %v571_v6 = vld [vmem:[%s3625_s8 + $0xce8] sm:$0xff]  ;;  %v1594_v7 = vmul.f32 %v3632_v1, %v569_v4 }
 0x112   : > { %2595 = vst [vmem:[%s3648_s20 + $0xc20] sm:$0xff] %v1571_v23  ;;  %2596 = vst [vmem:[%s3648_s20 + $0xc28] sm:$0xff] %v1572_v24  ;;  %v1595_v8 = vmul.f32 %v3632_v1, %v570_v5  ;;  %v1596_v9 = vmul.f32 %v3632_v1, %v571_v6  ;;  %v572_v10 = vld [vmem:[%s3625_s8 + $0xcf0] sm:$0xff]  ;;  %v573_v11 = vld [vmem:[%s3625_s8 + $0xcf8] sm:$0xff] }
 0x113   : > { %2597 = vst [vmem:[%s3648_s20 + $0xc30] sm:$0xff] %v1573_v28  ;;  %2598 = vst [vmem:[%s3648_s20 + $0xc38] sm:$0xff] %v1574_v29  ;;  %v574_v12 = vld [vmem:[%s3625_s8 + $0xd00] sm:$0xff]  ;;  %v1597_v13 = vmul.f32 %v3632_v1, %v572_v10  ;;  %v1598_v14 = vmul.f32 %v3632_v1, %v573_v11  ;;  %v575_v16 = vld [vmem:[%s3625_s8 + $0xd08] sm:$0xff] }
 0x114   : > { %2599 = vst [vmem:[%s3648_s20 + $0xc40] sm:$0xff] %v1575_v30  ;;  %2600 = vst [vmem:[%s3648_s20 + $0xc48] sm:$0xff] %v1576_v34  ;;  %v1599_v15 = vmul.f32 %v3632_v1, %v574_v12  ;;  %v576_v17 = vld [vmem:[%s3625_s8 + $0xd10] sm:$0xff]  ;;  %v577_v18 = vld [vmem:[%s3625_s8 + $0xd18] sm:$0xff]  ;;  %v1600_v19 = vmul.f32 %v3632_v1, %v575_v16 }
 0x115   : > { %2601 = vst [vmem:[%s3648_s20 + $0xc50] sm:$0xff] %v1577_v35  ;;  %2602 = vst [vmem:[%s3648_s20 + $0xc58] sm:$0xff] %v1578_v36  ;;  %v1601_v20 = vmul.f32 %v3632_v1, %v576_v17  ;;  %v1602_v21 = vmul.f32 %v3632_v1, %v577_v18  ;;  %v578_v22 = vld [vmem:[%s3625_s8 + $0xd20] sm:$0xff]  ;;  %v579_v23 = vld [vmem:[%s3625_s8 + $0xd28] sm:$0xff] }
 0x116   : > { %2603 = vst [vmem:[%s3648_s20 + $0xc60] sm:$0xff] %v1579_v40  ;;  %2604 = vst [vmem:[%s3648_s20 + $0xc68] sm:$0xff] %v1580_v41  ;;  %v580_v24 = vld [vmem:[%s3625_s8 + $0xd30] sm:$0xff]  ;;  %v1603_v25 = vmul.f32 %v3632_v1, %v578_v22  ;;  %v1604_v26 = vmul.f32 %v3632_v1, %v579_v23  ;;  %v581_v28 = vld [vmem:[%s3625_s8 + $0xd38] sm:$0xff] }
 0x117   : > { %2605 = vst [vmem:[%s3648_s20 + $0xc70] sm:$0xff] %v1581_v42  ;;  %2606 = vst [vmem:[%s3648_s20 + $0xc78] sm:$0xff] %v1582_v46  ;;  %v1605_v27 = vmul.f32 %v3632_v1, %v580_v24  ;;  %v582_v29 = vld [vmem:[%s3625_s8 + $0xd40] sm:$0xff]  ;;  %v583_v30 = vld [vmem:[%s3625_s8 + $0xd48] sm:$0xff]  ;;  %v1606_v31 = vmul.f32 %v3632_v1, %v581_v28 }
 0x118   : > { %2607 = vst [vmem:[%s3648_s20 + $0xc80] sm:$0xff] %v1583_v47  ;;  %2608 = vst [vmem:[%s3648_s20 + $0xc88] sm:$0xff] %v1584_v48  ;;  %v1607_v32 = vmul.f32 %v3632_v1, %v582_v29  ;;  %v1608_v33 = vmul.f32 %v3632_v1, %v583_v30  ;;  %v584_v34 = vld [vmem:[%s3625_s8 + $0xd50] sm:$0xff]  ;;  %v585_v35 = vld [vmem:[%s3625_s8 + $0xd58] sm:$0xff] }
 0x119   : > { %2609 = vst [vmem:[%s3648_s20 + $0xc90] sm:$0xff] %v1585_v52  ;;  %2610 = vst [vmem:[%s3648_s20 + $0xc98] sm:$0xff] %v1586_v53  ;;  %v586_v36 = vld [vmem:[%s3625_s8 + $0xd60] sm:$0xff]  ;;  %v1609_v37 = vmul.f32 %v3632_v1, %v584_v34  ;;  %v1610_v38 = vmul.f32 %v3632_v1, %v585_v35  ;;  %v587_v40 = vld [vmem:[%s3625_s8 + $0xd68] sm:$0xff] }
 0x11a   : > { %2611 = vst [vmem:[%s3648_s20 + $0xca0] sm:$0xff] %v1587_v54  ;;  %2612 = vst [vmem:[%s3648_s20 + $0xca8] sm:$0xff] %v1588_v58  ;;  %v1611_v39 = vmul.f32 %v3632_v1, %v586_v36  ;;  %v588_v41 = vld [vmem:[%s3625_s8 + $0xd70] sm:$0xff]  ;;  %v589_v42 = vld [vmem:[%s3625_s8 + $0xd78] sm:$0xff]  ;;  %v1612_v43 = vmul.f32 %v3632_v1, %v587_v40 }
 0x11b   : > { %2613 = vst [vmem:[%s3648_s20 + $0xcb0] sm:$0xff] %v1589_v59  ;;  %2614 = vst [vmem:[%s3648_s20 + $0xcb8] sm:$0xff] %v1590_v60  ;;  %v1613_v44 = vmul.f32 %v3632_v1, %v588_v41  ;;  %v1614_v45 = vmul.f32 %v3632_v1, %v589_v42  ;;  %v590_v46 = vld [vmem:[%s3625_s8 + $0xd80] sm:$0xff]  ;;  %v591_v47 = vld [vmem:[%s3625_s8 + $0xd88] sm:$0xff] }
 0x11c   : > { %2615 = vst [vmem:[%s3648_s20 + $0xcc0] sm:$0xff] %v1591_v0  ;;  %2616 = vst [vmem:[%s3648_s20 + $0xcc8] sm:$0xff] %v1592_v2  ;;  %v592_v48 = vld [vmem:[%s3625_s8 + $0xd90] sm:$0xff]  ;;  %v1615_v49 = vmul.f32 %v3632_v1, %v590_v46  ;;  %v1616_v50 = vmul.f32 %v3632_v1, %v591_v47  ;;  %v593_v52 = vld [vmem:[%s3625_s8 + $0xd98] sm:$0xff] }
 0x11d   : > { %2617 = vst [vmem:[%s3648_s20 + $0xcd0] sm:$0xff] %v1593_v3  ;;  %2618 = vst [vmem:[%s3648_s20 + $0xcd8] sm:$0xff] %v1594_v7  ;;  %v1617_v51 = vmul.f32 %v3632_v1, %v592_v48  ;;  %v594_v53 = vld [vmem:[%s3625_s8 + $0xda0] sm:$0xff]  ;;  %v595_v54 = vld [vmem:[%s3625_s8 + $0xda8] sm:$0xff]  ;;  %v1618_v55 = vmul.f32 %v3632_v1, %v593_v52 }
 0x11e   : > { %2619 = vst [vmem:[%s3648_s20 + $0xce0] sm:$0xff] %v1595_v8  ;;  %2620 = vst [vmem:[%s3648_s20 + $0xce8] sm:$0xff] %v1596_v9  ;;  %v1619_v56 = vmul.f32 %v3632_v1, %v594_v53  ;;  %v1620_v57 = vmul.f32 %v3632_v1, %v595_v54  ;;  %v596_v58 = vld [vmem:[%s3625_s8 + $0xdb0] sm:$0xff]  ;;  %v597_v59 = vld [vmem:[%s3625_s8 + $0xdb8] sm:$0xff] }
 0x11f   : > { %2621 = vst [vmem:[%s3648_s20 + $0xcf0] sm:$0xff] %v1597_v13  ;;  %2622 = vst [vmem:[%s3648_s20 + $0xcf8] sm:$0xff] %v1598_v14  ;;  %v598_v60 = vld [vmem:[%s3625_s8 + $0xdc0] sm:$0xff]  ;;  %v1621_v61 = vmul.f32 %v3632_v1, %v596_v58  ;;  %v1622_v62 = vmul.f32 %v3632_v1, %v597_v59  ;;  %v599_v0 = vld [vmem:[%s3625_s8 + $0xdc8] sm:$0xff] }
 0x120   : > { %2623 = vst [vmem:[%s3648_s20 + $0xd00] sm:$0xff] %v1599_v15  ;;  %2624 = vst [vmem:[%s3648_s20 + $0xd08] sm:$0xff] %v1600_v19  ;;  %v1623_v63 = vmul.f32 %v3632_v1, %v598_v60  ;;  %v600_v2 = vld [vmem:[%s3625_s8 + $0xdd0] sm:$0xff]  ;;  %v601_v3 = vld [vmem:[%s3625_s8 + $0xdd8] sm:$0xff]  ;;  %v1624_v4 = vmul.f32 %v3632_v1, %v599_v0 }
 0x121   : > { %2625 = vst [vmem:[%s3648_s20 + $0xd10] sm:$0xff] %v1601_v20  ;;  %2626 = vst [vmem:[%s3648_s20 + $0xd18] sm:$0xff] %v1602_v21  ;;  %v1625_v5 = vmul.f32 %v3632_v1, %v600_v2  ;;  %v1626_v6 = vmul.f32 %v3632_v1, %v601_v3  ;;  %v602_v7 = vld [vmem:[%s3625_s8 + $0xde0] sm:$0xff]  ;;  %v603_v8 = vld [vmem:[%s3625_s8 + $0xde8] sm:$0xff] }
 0x122   : > { %2627 = vst [vmem:[%s3648_s20 + $0xd20] sm:$0xff] %v1603_v25  ;;  %2628 = vst [vmem:[%s3648_s20 + $0xd28] sm:$0xff] %v1604_v26  ;;  %v604_v9 = vld [vmem:[%s3625_s8 + $0xdf0] sm:$0xff]  ;;  %v1627_v10 = vmul.f32 %v3632_v1, %v602_v7  ;;  %v1628_v11 = vmul.f32 %v3632_v1, %v603_v8  ;;  %v605_v13 = vld [vmem:[%s3625_s8 + $0xdf8] sm:$0xff] }
 0x123   : > { %2629 = vst [vmem:[%s3648_s20 + $0xd30] sm:$0xff] %v1605_v27  ;;  %2630 = vst [vmem:[%s3648_s20 + $0xd38] sm:$0xff] %v1606_v31  ;;  %v1629_v12 = vmul.f32 %v3632_v1, %v604_v9  ;;  %v606_v14 = vld [vmem:[%s3625_s8 + $0xe00] sm:$0xff]  ;;  %v607_v15 = vld [vmem:[%s3625_s8 + $0xe08] sm:$0xff]  ;;  %v1630_v16 = vmul.f32 %v3632_v1, %v605_v13 }
 0x124   : > { %2631 = vst [vmem:[%s3648_s20 + $0xd40] sm:$0xff] %v1607_v32  ;;  %2632 = vst [vmem:[%s3648_s20 + $0xd48] sm:$0xff] %v1608_v33  ;;  %v1631_v17 = vmul.f32 %v3632_v1, %v606_v14  ;;  %v1632_v18 = vmul.f32 %v3632_v1, %v607_v15  ;;  %v608_v19 = vld [vmem:[%s3625_s8 + $0xe10] sm:$0xff]  ;;  %v609_v20 = vld [vmem:[%s3625_s8 + $0xe18] sm:$0xff] }
 0x125   : > { %2633 = vst [vmem:[%s3648_s20 + $0xd50] sm:$0xff] %v1609_v37  ;;  %2634 = vst [vmem:[%s3648_s20 + $0xd58] sm:$0xff] %v1610_v38  ;;  %v610_v21 = vld [vmem:[%s3625_s8 + $0xe20] sm:$0xff]  ;;  %v1633_v22 = vmul.f32 %v3632_v1, %v608_v19  ;;  %v1634_v23 = vmul.f32 %v3632_v1, %v609_v20  ;;  %v611_v25 = vld [vmem:[%s3625_s8 + $0xe28] sm:$0xff] }
 0x126   : > { %2635 = vst [vmem:[%s3648_s20 + $0xd60] sm:$0xff] %v1611_v39  ;;  %2636 = vst [vmem:[%s3648_s20 + $0xd68] sm:$0xff] %v1612_v43  ;;  %v1635_v24 = vmul.f32 %v3632_v1, %v610_v21  ;;  %v612_v26 = vld [vmem:[%s3625_s8 + $0xe30] sm:$0xff]  ;;  %v613_v27 = vld [vmem:[%s3625_s8 + $0xe38] sm:$0xff]  ;;  %v1636_v28 = vmul.f32 %v3632_v1, %v611_v25 }
 0x127   : > { %2637 = vst [vmem:[%s3648_s20 + $0xd70] sm:$0xff] %v1613_v44  ;;  %2638 = vst [vmem:[%s3648_s20 + $0xd78] sm:$0xff] %v1614_v45  ;;  %v1637_v29 = vmul.f32 %v3632_v1, %v612_v26  ;;  %v1638_v30 = vmul.f32 %v3632_v1, %v613_v27  ;;  %v614_v31 = vld [vmem:[%s3625_s8 + $0xe40] sm:$0xff]  ;;  %v615_v32 = vld [vmem:[%s3625_s8 + $0xe48] sm:$0xff] }
 0x128   : > { %2639 = vst [vmem:[%s3648_s20 + $0xd80] sm:$0xff] %v1615_v49  ;;  %2640 = vst [vmem:[%s3648_s20 + $0xd88] sm:$0xff] %v1616_v50  ;;  %v616_v33 = vld [vmem:[%s3625_s8 + $0xe50] sm:$0xff]  ;;  %v1639_v34 = vmul.f32 %v3632_v1, %v614_v31  ;;  %v1640_v35 = vmul.f32 %v3632_v1, %v615_v32  ;;  %v617_v37 = vld [vmem:[%s3625_s8 + $0xe58] sm:$0xff] }
 0x129   : > { %2641 = vst [vmem:[%s3648_s20 + $0xd90] sm:$0xff] %v1617_v51  ;;  %2642 = vst [vmem:[%s3648_s20 + $0xd98] sm:$0xff] %v1618_v55  ;;  %v1641_v36 = vmul.f32 %v3632_v1, %v616_v33  ;;  %v618_v38 = vld [vmem:[%s3625_s8 + $0xe60] sm:$0xff]  ;;  %v619_v39 = vld [vmem:[%s3625_s8 + $0xe68] sm:$0xff]  ;;  %v1642_v40 = vmul.f32 %v3632_v1, %v617_v37 }
 0x12a   : > { %2643 = vst [vmem:[%s3648_s20 + $0xda0] sm:$0xff] %v1619_v56  ;;  %2644 = vst [vmem:[%s3648_s20 + $0xda8] sm:$0xff] %v1620_v57  ;;  %v1643_v41 = vmul.f32 %v3632_v1, %v618_v38  ;;  %v1644_v42 = vmul.f32 %v3632_v1, %v619_v39  ;;  %v620_v43 = vld [vmem:[%s3625_s8 + $0xe70] sm:$0xff]  ;;  %v621_v44 = vld [vmem:[%s3625_s8 + $0xe78] sm:$0xff] }
 0x12b   : > { %2645 = vst [vmem:[%s3648_s20 + $0xdb0] sm:$0xff] %v1621_v61  ;;  %2646 = vst [vmem:[%s3648_s20 + $0xdb8] sm:$0xff] %v1622_v62  ;;  %v622_v45 = vld [vmem:[%s3625_s8 + $0xe80] sm:$0xff]  ;;  %v1645_v46 = vmul.f32 %v3632_v1, %v620_v43  ;;  %v1646_v47 = vmul.f32 %v3632_v1, %v621_v44  ;;  %v623_v49 = vld [vmem:[%s3625_s8 + $0xe88] sm:$0xff] }
 0x12c   : > { %2647 = vst [vmem:[%s3648_s20 + $0xdc0] sm:$0xff] %v1623_v63  ;;  %2648 = vst [vmem:[%s3648_s20 + $0xdc8] sm:$0xff] %v1624_v4  ;;  %v1647_v48 = vmul.f32 %v3632_v1, %v622_v45  ;;  %v624_v50 = vld [vmem:[%s3625_s8 + $0xe90] sm:$0xff]  ;;  %v625_v51 = vld [vmem:[%s3625_s8 + $0xe98] sm:$0xff]  ;;  %v1648_v52 = vmul.f32 %v3632_v1, %v623_v49 }
 0x12d   : > { %2649 = vst [vmem:[%s3648_s20 + $0xdd0] sm:$0xff] %v1625_v5  ;;  %2650 = vst [vmem:[%s3648_s20 + $0xdd8] sm:$0xff] %v1626_v6  ;;  %v1649_v53 = vmul.f32 %v3632_v1, %v624_v50  ;;  %v1650_v54 = vmul.f32 %v3632_v1, %v625_v51  ;;  %v626_v55 = vld [vmem:[%s3625_s8 + $0xea0] sm:$0xff]  ;;  %v627_v56 = vld [vmem:[%s3625_s8 + $0xea8] sm:$0xff] }
 0x12e   : > { %2651 = vst [vmem:[%s3648_s20 + $0xde0] sm:$0xff] %v1627_v10  ;;  %2652 = vst [vmem:[%s3648_s20 + $0xde8] sm:$0xff] %v1628_v11  ;;  %v628_v57 = vld [vmem:[%s3625_s8 + $0xeb0] sm:$0xff]  ;;  %v1651_v58 = vmul.f32 %v3632_v1, %v626_v55  ;;  %v1652_v59 = vmul.f32 %v3632_v1, %v627_v56  ;;  %v629_v61 = vld [vmem:[%s3625_s8 + $0xeb8] sm:$0xff] }
 0x12f   : > { %2653 = vst [vmem:[%s3648_s20 + $0xdf0] sm:$0xff] %v1629_v12  ;;  %2654 = vst [vmem:[%s3648_s20 + $0xdf8] sm:$0xff] %v1630_v16  ;;  %v1653_v60 = vmul.f32 %v3632_v1, %v628_v57  ;;  %v630_v62 = vld [vmem:[%s3625_s8 + $0xec0] sm:$0xff]  ;;  %v631_v63 = vld [vmem:[%s3625_s8 + $0xec8] sm:$0xff]  ;;  %v1654_v0 = vmul.f32 %v3632_v1, %v629_v61 }
 0x130   : > { %2655 = vst [vmem:[%s3648_s20 + $0xe00] sm:$0xff] %v1631_v17  ;;  %2656 = vst [vmem:[%s3648_s20 + $0xe08] sm:$0xff] %v1632_v18  ;;  %v1655_v2 = vmul.f32 %v3632_v1, %v630_v62  ;;  %v1656_v3 = vmul.f32 %v3632_v1, %v631_v63  ;;  %v632_v4 = vld [vmem:[%s3625_s8 + $0xed0] sm:$0xff]  ;;  %v633_v5 = vld [vmem:[%s3625_s8 + $0xed8] sm:$0xff] }
 0x131   : > { %2657 = vst [vmem:[%s3648_s20 + $0xe10] sm:$0xff] %v1633_v22  ;;  %2658 = vst [vmem:[%s3648_s20 + $0xe18] sm:$0xff] %v1634_v23  ;;  %v634_v6 = vld [vmem:[%s3625_s8 + $0xee0] sm:$0xff]  ;;  %v1657_v7 = vmul.f32 %v3632_v1, %v632_v4  ;;  %v1658_v8 = vmul.f32 %v3632_v1, %v633_v5  ;;  %v635_v10 = vld [vmem:[%s3625_s8 + $0xee8] sm:$0xff] }
 0x132   : > { %2659 = vst [vmem:[%s3648_s20 + $0xe20] sm:$0xff] %v1635_v24  ;;  %2660 = vst [vmem:[%s3648_s20 + $0xe28] sm:$0xff] %v1636_v28  ;;  %v1659_v9 = vmul.f32 %v3632_v1, %v634_v6  ;;  %v636_v11 = vld [vmem:[%s3625_s8 + $0xef0] sm:$0xff]  ;;  %v637_v12 = vld [vmem:[%s3625_s8 + $0xef8] sm:$0xff]  ;;  %v1660_v13 = vmul.f32 %v3632_v1, %v635_v10 }
 0x133   : > { %2661 = vst [vmem:[%s3648_s20 + $0xe30] sm:$0xff] %v1637_v29  ;;  %2662 = vst [vmem:[%s3648_s20 + $0xe38] sm:$0xff] %v1638_v30  ;;  %v1661_v14 = vmul.f32 %v3632_v1, %v636_v11  ;;  %v1662_v15 = vmul.f32 %v3632_v1, %v637_v12  ;;  %v638_v16 = vld [vmem:[%s3625_s8 + $0xf00] sm:$0xff]  ;;  %v639_v17 = vld [vmem:[%s3625_s8 + $0xf08] sm:$0xff] }
 0x134   : > { %2663 = vst [vmem:[%s3648_s20 + $0xe40] sm:$0xff] %v1639_v34  ;;  %2664 = vst [vmem:[%s3648_s20 + $0xe48] sm:$0xff] %v1640_v35  ;;  %v640_v18 = vld [vmem:[%s3625_s8 + $0xf10] sm:$0xff]  ;;  %v1663_v19 = vmul.f32 %v3632_v1, %v638_v16  ;;  %v1664_v20 = vmul.f32 %v3632_v1, %v639_v17  ;;  %v641_v22 = vld [vmem:[%s3625_s8 + $0xf18] sm:$0xff] }
 0x135   : > { %2665 = vst [vmem:[%s3648_s20 + $0xe50] sm:$0xff] %v1641_v36  ;;  %2666 = vst [vmem:[%s3648_s20 + $0xe58] sm:$0xff] %v1642_v40  ;;  %v1665_v21 = vmul.f32 %v3632_v1, %v640_v18  ;;  %v642_v23 = vld [vmem:[%s3625_s8 + $0xf20] sm:$0xff]  ;;  %v643_v24 = vld [vmem:[%s3625_s8 + $0xf28] sm:$0xff]  ;;  %v1666_v25 = vmul.f32 %v3632_v1, %v641_v22 }
 0x136   : > { %2667 = vst [vmem:[%s3648_s20 + $0xe60] sm:$0xff] %v1643_v41  ;;  %2668 = vst [vmem:[%s3648_s20 + $0xe68] sm:$0xff] %v1644_v42  ;;  %v1667_v26 = vmul.f32 %v3632_v1, %v642_v23  ;;  %v1668_v27 = vmul.f32 %v3632_v1, %v643_v24  ;;  %v644_v28 = vld [vmem:[%s3625_s8 + $0xf30] sm:$0xff]  ;;  %v645_v29 = vld [vmem:[%s3625_s8 + $0xf38] sm:$0xff] }
 0x137   : > { %2669 = vst [vmem:[%s3648_s20 + $0xe70] sm:$0xff] %v1645_v46  ;;  %2670 = vst [vmem:[%s3648_s20 + $0xe78] sm:$0xff] %v1646_v47  ;;  %v646_v30 = vld [vmem:[%s3625_s8 + $0xf40] sm:$0xff]  ;;  %v1669_v31 = vmul.f32 %v3632_v1, %v644_v28  ;;  %v1670_v32 = vmul.f32 %v3632_v1, %v645_v29  ;;  %v647_v34 = vld [vmem:[%s3625_s8 + $0xf48] sm:$0xff] }
 0x138   : > { %2671 = vst [vmem:[%s3648_s20 + $0xe80] sm:$0xff] %v1647_v48  ;;  %2672 = vst [vmem:[%s3648_s20 + $0xe88] sm:$0xff] %v1648_v52  ;;  %v1671_v33 = vmul.f32 %v3632_v1, %v646_v30  ;;  %v648_v35 = vld [vmem:[%s3625_s8 + $0xf50] sm:$0xff]  ;;  %v649_v36 = vld [vmem:[%s3625_s8 + $0xf58] sm:$0xff]  ;;  %v1672_v37 = vmul.f32 %v3632_v1, %v647_v34 }
 0x139   : > { %2673 = vst [vmem:[%s3648_s20 + $0xe90] sm:$0xff] %v1649_v53  ;;  %2674 = vst [vmem:[%s3648_s20 + $0xe98] sm:$0xff] %v1650_v54  ;;  %v1673_v38 = vmul.f32 %v3632_v1, %v648_v35  ;;  %v1674_v39 = vmul.f32 %v3632_v1, %v649_v36  ;;  %v650_v40 = vld [vmem:[%s3625_s8 + $0xf60] sm:$0xff]  ;;  %v651_v41 = vld [vmem:[%s3625_s8 + $0xf68] sm:$0xff] }
 0x13a   : > { %2675 = vst [vmem:[%s3648_s20 + $0xea0] sm:$0xff] %v1651_v58  ;;  %2676 = vst [vmem:[%s3648_s20 + $0xea8] sm:$0xff] %v1652_v59  ;;  %v652_v42 = vld [vmem:[%s3625_s8 + $0xf70] sm:$0xff]  ;;  %v1675_v43 = vmul.f32 %v3632_v1, %v650_v40  ;;  %v1676_v44 = vmul.f32 %v3632_v1, %v651_v41  ;;  %v653_v46 = vld [vmem:[%s3625_s8 + $0xf78] sm:$0xff] }
 0x13b   : > { %2677 = vst [vmem:[%s3648_s20 + $0xeb0] sm:$0xff] %v1653_v60  ;;  %2678 = vst [vmem:[%s3648_s20 + $0xeb8] sm:$0xff] %v1654_v0  ;;  %v1677_v45 = vmul.f32 %v3632_v1, %v652_v42  ;;  %v654_v47 = vld [vmem:[%s3625_s8 + $0xf80] sm:$0xff]  ;;  %v655_v48 = vld [vmem:[%s3625_s8 + $0xf88] sm:$0xff]  ;;  %v1678_v49 = vmul.f32 %v3632_v1, %v653_v46 }
 0x13c   : > { %2679 = vst [vmem:[%s3648_s20 + $0xec0] sm:$0xff] %v1655_v2  ;;  %2680 = vst [vmem:[%s3648_s20 + $0xec8] sm:$0xff] %v1656_v3  ;;  %v1679_v50 = vmul.f32 %v3632_v1, %v654_v47  ;;  %v1680_v51 = vmul.f32 %v3632_v1, %v655_v48  ;;  %v656_v52 = vld [vmem:[%s3625_s8 + $0xf90] sm:$0xff]  ;;  %v657_v53 = vld [vmem:[%s3625_s8 + $0xf98] sm:$0xff] }
 0x13d   : > { %2681 = vst [vmem:[%s3648_s20 + $0xed0] sm:$0xff] %v1657_v7  ;;  %2682 = vst [vmem:[%s3648_s20 + $0xed8] sm:$0xff] %v1658_v8  ;;  %v658_v54 = vld [vmem:[%s3625_s8 + $0xfa0] sm:$0xff]  ;;  %v1681_v55 = vmul.f32 %v3632_v1, %v656_v52  ;;  %v1682_v56 = vmul.f32 %v3632_v1, %v657_v53  ;;  %v659_v58 = vld [vmem:[%s3625_s8 + $0xfa8] sm:$0xff] }
 0x13e   : > { %2683 = vst [vmem:[%s3648_s20 + $0xee0] sm:$0xff] %v1659_v9  ;;  %2684 = vst [vmem:[%s3648_s20 + $0xee8] sm:$0xff] %v1660_v13  ;;  %v1683_v57 = vmul.f32 %v3632_v1, %v658_v54  ;;  %v660_v59 = vld [vmem:[%s3625_s8 + $0xfb0] sm:$0xff]  ;;  %v661_v60 = vld [vmem:[%s3625_s8 + $0xfb8] sm:$0xff]  ;;  %v1684_v61 = vmul.f32 %v3632_v1, %v659_v58 }
 0x13f   : > { %2685 = vst [vmem:[%s3648_s20 + $0xef0] sm:$0xff] %v1661_v14  ;;  %2686 = vst [vmem:[%s3648_s20 + $0xef8] sm:$0xff] %v1662_v15  ;;  %v1685_v62 = vmul.f32 %v3632_v1, %v660_v59  ;;  %v1686_v63 = vmul.f32 %v3632_v1, %v661_v60  ;;  %v662_v0 = vld [vmem:[%s3625_s8 + $0xfc0] sm:$0xff]  ;;  %v663_v2 = vld [vmem:[%s3625_s8 + $0xfc8] sm:$0xff] }
 0x140   : > { %2687 = vst [vmem:[%s3648_s20 + $0xf00] sm:$0xff] %v1663_v19  ;;  %2688 = vst [vmem:[%s3648_s20 + $0xf08] sm:$0xff] %v1664_v20  ;;  %v664_v3 = vld [vmem:[%s3625_s8 + $0xfd0] sm:$0xff]  ;;  %v1687_v4 = vmul.f32 %v3632_v1, %v662_v0  ;;  %v1688_v5 = vmul.f32 %v3632_v1, %v663_v2  ;;  %v665_v7 = vld [vmem:[%s3625_s8 + $0xfd8] sm:$0xff] }
 0x141   : > { %2689 = vst [vmem:[%s3648_s20 + $0xf10] sm:$0xff] %v1665_v21  ;;  %2690 = vst [vmem:[%s3648_s20 + $0xf18] sm:$0xff] %v1666_v25  ;;  %v1689_v6 = vmul.f32 %v3632_v1, %v664_v3  ;;  %v666_v8 = vld [vmem:[%s3625_s8 + $0xfe0] sm:$0xff]  ;;  %v667_v9 = vld [vmem:[%s3625_s8 + $0xfe8] sm:$0xff]  ;;  %v1690_v10 = vmul.f32 %v3632_v1, %v665_v7 }
 0x142   : > { %2691 = vst [vmem:[%s3648_s20 + $0xf20] sm:$0xff] %v1667_v26  ;;  %2692 = vst [vmem:[%s3648_s20 + $0xf28] sm:$0xff] %v1668_v27  ;;  %v1691_v11 = vmul.f32 %v3632_v1, %v666_v8  ;;  %v1692_v12 = vmul.f32 %v3632_v1, %v667_v9  ;;  %v668_v13 = vld [vmem:[%s3625_s8 + $0xff0] sm:$0xff]  ;;  %v669_v14 = vld [vmem:[%s3625_s8 + $0xff8] sm:$0xff] }
 0x143   : > { %2693 = vst [vmem:[%s3648_s20 + $0xf30] sm:$0xff] %v1669_v31  ;;  %2694 = vst [vmem:[%s3648_s20 + $0xf38] sm:$0xff] %v1670_v32  ;;  %v670_v15 = vld [vmem:[%s3625_s8 + $0x1000] sm:$0xff]  ;;  %v1693_v16 = vmul.f32 %v3632_v1, %v668_v13  ;;  %v1694_v17 = vmul.f32 %v3632_v1, %v669_v14  ;;  %v671_v19 = vld [vmem:[%s3625_s8 + $0x1008] sm:$0xff] }
 0x144   : > { %2695 = vst [vmem:[%s3648_s20 + $0xf40] sm:$0xff] %v1671_v33  ;;  %2696 = vst [vmem:[%s3648_s20 + $0xf48] sm:$0xff] %v1672_v37  ;;  %v1695_v18 = vmul.f32 %v3632_v1, %v670_v15  ;;  %v672_v20 = vld [vmem:[%s3625_s8 + $0x1010] sm:$0xff]  ;;  %v673_v21 = vld [vmem:[%s3625_s8 + $0x1018] sm:$0xff]  ;;  %v1696_v22 = vmul.f32 %v3632_v1, %v671_v19 }
 0x145   : > { %2697 = vst [vmem:[%s3648_s20 + $0xf50] sm:$0xff] %v1673_v38  ;;  %2698 = vst [vmem:[%s3648_s20 + $0xf58] sm:$0xff] %v1674_v39  ;;  %v1697_v23 = vmul.f32 %v3632_v1, %v672_v20  ;;  %v1698_v24 = vmul.f32 %v3632_v1, %v673_v21  ;;  %v674_v25 = vld [vmem:[%s3625_s8 + $0x1020] sm:$0xff]  ;;  %v675_v26 = vld [vmem:[%s3625_s8 + $0x1028] sm:$0xff] }
 0x146   : > { %2699 = vst [vmem:[%s3648_s20 + $0xf60] sm:$0xff] %v1675_v43  ;;  %2700 = vst [vmem:[%s3648_s20 + $0xf68] sm:$0xff] %v1676_v44  ;;  %v676_v27 = vld [vmem:[%s3625_s8 + $0x1030] sm:$0xff]  ;;  %v1699_v28 = vmul.f32 %v3632_v1, %v674_v25  ;;  %v1700_v29 = vmul.f32 %v3632_v1, %v675_v26  ;;  %v677_v31 = vld [vmem:[%s3625_s8 + $0x1038] sm:$0xff] }
 0x147   : > { %2701 = vst [vmem:[%s3648_s20 + $0xf70] sm:$0xff] %v1677_v45  ;;  %2702 = vst [vmem:[%s3648_s20 + $0xf78] sm:$0xff] %v1678_v49  ;;  %v1701_v30 = vmul.f32 %v3632_v1, %v676_v27  ;;  %v678_v32 = vld [vmem:[%s3625_s8 + $0x1040] sm:$0xff]  ;;  %v679_v33 = vld [vmem:[%s3625_s8 + $0x1048] sm:$0xff]  ;;  %v1702_v34 = vmul.f32 %v3632_v1, %v677_v31 }
 0x148   : > { %2703 = vst [vmem:[%s3648_s20 + $0xf80] sm:$0xff] %v1679_v50  ;;  %2704 = vst [vmem:[%s3648_s20 + $0xf88] sm:$0xff] %v1680_v51  ;;  %v1703_v35 = vmul.f32 %v3632_v1, %v678_v32  ;;  %v1704_v36 = vmul.f32 %v3632_v1, %v679_v33  ;;  %v680_v37 = vld [vmem:[%s3625_s8 + $0x1050] sm:$0xff]  ;;  %v681_v38 = vld [vmem:[%s3625_s8 + $0x1058] sm:$0xff] }
 0x149   : > { %2705 = vst [vmem:[%s3648_s20 + $0xf90] sm:$0xff] %v1681_v55  ;;  %2706 = vst [vmem:[%s3648_s20 + $0xf98] sm:$0xff] %v1682_v56  ;;  %v682_v39 = vld [vmem:[%s3625_s8 + $0x1060] sm:$0xff]  ;;  %v1705_v40 = vmul.f32 %v3632_v1, %v680_v37  ;;  %v1706_v41 = vmul.f32 %v3632_v1, %v681_v38  ;;  %v683_v43 = vld [vmem:[%s3625_s8 + $0x1068] sm:$0xff] }
 0x14a   : > { %2707 = vst [vmem:[%s3648_s20 + $0xfa0] sm:$0xff] %v1683_v57  ;;  %2708 = vst [vmem:[%s3648_s20 + $0xfa8] sm:$0xff] %v1684_v61  ;;  %v1707_v42 = vmul.f32 %v3632_v1, %v682_v39  ;;  %v684_v44 = vld [vmem:[%s3625_s8 + $0x1070] sm:$0xff]  ;;  %v685_v45 = vld [vmem:[%s3625_s8 + $0x1078] sm:$0xff]  ;;  %v1708_v46 = vmul.f32 %v3632_v1, %v683_v43 }
 0x14b   : > { %2709 = vst [vmem:[%s3648_s20 + $0xfb0] sm:$0xff] %v1685_v62  ;;  %2710 = vst [vmem:[%s3648_s20 + $0xfb8] sm:$0xff] %v1686_v63  ;;  %v1709_v47 = vmul.f32 %v3632_v1, %v684_v44  ;;  %v1710_v48 = vmul.f32 %v3632_v1, %v685_v45  ;;  %v686_v49 = vld [vmem:[%s3625_s8 + $0x1080] sm:$0xff]  ;;  %v687_v50 = vld [vmem:[%s3625_s8 + $0x1088] sm:$0xff] }
 0x14c   : > { %2711 = vst [vmem:[%s3648_s20 + $0xfc0] sm:$0xff] %v1687_v4  ;;  %2712 = vst [vmem:[%s3648_s20 + $0xfc8] sm:$0xff] %v1688_v5  ;;  %v688_v51 = vld [vmem:[%s3625_s8 + $0x1090] sm:$0xff]  ;;  %v1711_v52 = vmul.f32 %v3632_v1, %v686_v49  ;;  %v1712_v53 = vmul.f32 %v3632_v1, %v687_v50  ;;  %v689_v55 = vld [vmem:[%s3625_s8 + $0x1098] sm:$0xff] }
 0x14d   : > { %2713 = vst [vmem:[%s3648_s20 + $0xfd0] sm:$0xff] %v1689_v6  ;;  %2714 = vst [vmem:[%s3648_s20 + $0xfd8] sm:$0xff] %v1690_v10  ;;  %v1713_v54 = vmul.f32 %v3632_v1, %v688_v51  ;;  %v690_v56 = vld [vmem:[%s3625_s8 + $0x10a0] sm:$0xff]  ;;  %v691_v57 = vld [vmem:[%s3625_s8 + $0x10a8] sm:$0xff]  ;;  %v1714_v58 = vmul.f32 %v3632_v1, %v689_v55 }
 0x14e   : > { %2715 = vst [vmem:[%s3648_s20 + $0xfe0] sm:$0xff] %v1691_v11  ;;  %2716 = vst [vmem:[%s3648_s20 + $0xfe8] sm:$0xff] %v1692_v12  ;;  %v1715_v59 = vmul.f32 %v3632_v1, %v690_v56  ;;  %v1716_v60 = vmul.f32 %v3632_v1, %v691_v57  ;;  %v692_v61 = vld [vmem:[%s3625_s8 + $0x10b0] sm:$0xff]  ;;  %v693_v62 = vld [vmem:[%s3625_s8 + $0x10b8] sm:$0xff] }
 0x14f   : > { %2717 = vst [vmem:[%s3648_s20 + $0xff0] sm:$0xff] %v1693_v16  ;;  %2718 = vst [vmem:[%s3648_s20 + $0xff8] sm:$0xff] %v1694_v17  ;;  %v694_v63 = vld [vmem:[%s3625_s8 + $0x10c0] sm:$0xff]  ;;  %v1717_v0 = vmul.f32 %v3632_v1, %v692_v61  ;;  %v1718_v2 = vmul.f32 %v3632_v1, %v693_v62  ;;  %v695_v4 = vld [vmem:[%s3625_s8 + $0x10c8] sm:$0xff] }
 0x150   : > { %2719 = vst [vmem:[%s3648_s20 + $0x1000] sm:$0xff] %v1695_v18  ;;  %2720 = vst [vmem:[%s3648_s20 + $0x1008] sm:$0xff] %v1696_v22  ;;  %v1719_v3 = vmul.f32 %v3632_v1, %v694_v63  ;;  %v696_v5 = vld [vmem:[%s3625_s8 + $0x10d0] sm:$0xff]  ;;  %v697_v6 = vld [vmem:[%s3625_s8 + $0x10d8] sm:$0xff]  ;;  %v1720_v7 = vmul.f32 %v3632_v1, %v695_v4 }
 0x151   : > { %2721 = vst [vmem:[%s3648_s20 + $0x1010] sm:$0xff] %v1697_v23  ;;  %2722 = vst [vmem:[%s3648_s20 + $0x1018] sm:$0xff] %v1698_v24  ;;  %v1721_v8 = vmul.f32 %v3632_v1, %v696_v5  ;;  %v1722_v9 = vmul.f32 %v3632_v1, %v697_v6  ;;  %v698_v10 = vld [vmem:[%s3625_s8 + $0x10e0] sm:$0xff]  ;;  %v699_v11 = vld [vmem:[%s3625_s8 + $0x10e8] sm:$0xff] }
 0x152   : > { %2723 = vst [vmem:[%s3648_s20 + $0x1020] sm:$0xff] %v1699_v28  ;;  %2724 = vst [vmem:[%s3648_s20 + $0x1028] sm:$0xff] %v1700_v29  ;;  %v700_v12 = vld [vmem:[%s3625_s8 + $0x10f0] sm:$0xff]  ;;  %v1723_v13 = vmul.f32 %v3632_v1, %v698_v10  ;;  %v1724_v14 = vmul.f32 %v3632_v1, %v699_v11  ;;  %v701_v16 = vld [vmem:[%s3625_s8 + $0x10f8] sm:$0xff] }
 0x153   : > { %2725 = vst [vmem:[%s3648_s20 + $0x1030] sm:$0xff] %v1701_v30  ;;  %2726 = vst [vmem:[%s3648_s20 + $0x1038] sm:$0xff] %v1702_v34  ;;  %v1725_v15 = vmul.f32 %v3632_v1, %v700_v12  ;;  %v702_v17 = vld [vmem:[%s3625_s8 + $0x1100] sm:$0xff]  ;;  %v703_v18 = vld [vmem:[%s3625_s8 + $0x1108] sm:$0xff]  ;;  %v1726_v19 = vmul.f32 %v3632_v1, %v701_v16 }
 0x154   : > { %2727 = vst [vmem:[%s3648_s20 + $0x1040] sm:$0xff] %v1703_v35  ;;  %2728 = vst [vmem:[%s3648_s20 + $0x1048] sm:$0xff] %v1704_v36  ;;  %v1727_v20 = vmul.f32 %v3632_v1, %v702_v17  ;;  %v1728_v21 = vmul.f32 %v3632_v1, %v703_v18  ;;  %v704_v22 = vld [vmem:[%s3625_s8 + $0x1110] sm:$0xff]  ;;  %v705_v23 = vld [vmem:[%s3625_s8 + $0x1118] sm:$0xff] }
 0x155   : > { %2729 = vst [vmem:[%s3648_s20 + $0x1050] sm:$0xff] %v1705_v40  ;;  %2730 = vst [vmem:[%s3648_s20 + $0x1058] sm:$0xff] %v1706_v41  ;;  %v706_v24 = vld [vmem:[%s3625_s8 + $0x1120] sm:$0xff]  ;;  %v1729_v25 = vmul.f32 %v3632_v1, %v704_v22  ;;  %v1730_v26 = vmul.f32 %v3632_v1, %v705_v23  ;;  %v707_v28 = vld [vmem:[%s3625_s8 + $0x1128] sm:$0xff] }
 0x156   : > { %2731 = vst [vmem:[%s3648_s20 + $0x1060] sm:$0xff] %v1707_v42  ;;  %2732 = vst [vmem:[%s3648_s20 + $0x1068] sm:$0xff] %v1708_v46  ;;  %v1731_v27 = vmul.f32 %v3632_v1, %v706_v24  ;;  %v708_v29 = vld [vmem:[%s3625_s8 + $0x1130] sm:$0xff]  ;;  %v709_v30 = vld [vmem:[%s3625_s8 + $0x1138] sm:$0xff]  ;;  %v1732_v31 = vmul.f32 %v3632_v1, %v707_v28 }
 0x157   : > { %2733 = vst [vmem:[%s3648_s20 + $0x1070] sm:$0xff] %v1709_v47  ;;  %2734 = vst [vmem:[%s3648_s20 + $0x1078] sm:$0xff] %v1710_v48  ;;  %v1733_v32 = vmul.f32 %v3632_v1, %v708_v29  ;;  %v1734_v33 = vmul.f32 %v3632_v1, %v709_v30  ;;  %v710_v34 = vld [vmem:[%s3625_s8 + $0x1140] sm:$0xff]  ;;  %v711_v35 = vld [vmem:[%s3625_s8 + $0x1148] sm:$0xff] }
 0x158   : > { %2735 = vst [vmem:[%s3648_s20 + $0x1080] sm:$0xff] %v1711_v52  ;;  %2736 = vst [vmem:[%s3648_s20 + $0x1088] sm:$0xff] %v1712_v53  ;;  %v712_v36 = vld [vmem:[%s3625_s8 + $0x1150] sm:$0xff]  ;;  %v1735_v37 = vmul.f32 %v3632_v1, %v710_v34  ;;  %v1736_v38 = vmul.f32 %v3632_v1, %v711_v35  ;;  %v713_v40 = vld [vmem:[%s3625_s8 + $0x1158] sm:$0xff] }
 0x159   : > { %2737 = vst [vmem:[%s3648_s20 + $0x1090] sm:$0xff] %v1713_v54  ;;  %2738 = vst [vmem:[%s3648_s20 + $0x1098] sm:$0xff] %v1714_v58  ;;  %v1737_v39 = vmul.f32 %v3632_v1, %v712_v36  ;;  %v714_v41 = vld [vmem:[%s3625_s8 + $0x1160] sm:$0xff]  ;;  %v715_v42 = vld [vmem:[%s3625_s8 + $0x1168] sm:$0xff]  ;;  %v1738_v43 = vmul.f32 %v3632_v1, %v713_v40 }
 0x15a   : > { %2739 = vst [vmem:[%s3648_s20 + $0x10a0] sm:$0xff] %v1715_v59  ;;  %2740 = vst [vmem:[%s3648_s20 + $0x10a8] sm:$0xff] %v1716_v60  ;;  %v1739_v44 = vmul.f32 %v3632_v1, %v714_v41  ;;  %v1740_v45 = vmul.f32 %v3632_v1, %v715_v42  ;;  %v716_v46 = vld [vmem:[%s3625_s8 + $0x1170] sm:$0xff]  ;;  %v717_v47 = vld [vmem:[%s3625_s8 + $0x1178] sm:$0xff] }
 0x15b   : > { %2741 = vst [vmem:[%s3648_s20 + $0x10b0] sm:$0xff] %v1717_v0  ;;  %2742 = vst [vmem:[%s3648_s20 + $0x10b8] sm:$0xff] %v1718_v2  ;;  %v718_v48 = vld [vmem:[%s3625_s8 + $0x1180] sm:$0xff]  ;;  %v1741_v49 = vmul.f32 %v3632_v1, %v716_v46  ;;  %v1742_v50 = vmul.f32 %v3632_v1, %v717_v47  ;;  %v719_v52 = vld [vmem:[%s3625_s8 + $0x1188] sm:$0xff] }
 0x15c   : > { %2743 = vst [vmem:[%s3648_s20 + $0x10c0] sm:$0xff] %v1719_v3  ;;  %2744 = vst [vmem:[%s3648_s20 + $0x10c8] sm:$0xff] %v1720_v7  ;;  %v1743_v51 = vmul.f32 %v3632_v1, %v718_v48  ;;  %v720_v53 = vld [vmem:[%s3625_s8 + $0x1190] sm:$0xff]  ;;  %v721_v54 = vld [vmem:[%s3625_s8 + $0x1198] sm:$0xff]  ;;  %v1744_v55 = vmul.f32 %v3632_v1, %v719_v52 }
 0x15d   : > { %2745 = vst [vmem:[%s3648_s20 + $0x10d0] sm:$0xff] %v1721_v8  ;;  %2746 = vst [vmem:[%s3648_s20 + $0x10d8] sm:$0xff] %v1722_v9  ;;  %v1745_v56 = vmul.f32 %v3632_v1, %v720_v53  ;;  %v1746_v57 = vmul.f32 %v3632_v1, %v721_v54  ;;  %v722_v58 = vld [vmem:[%s3625_s8 + $0x11a0] sm:$0xff]  ;;  %v723_v59 = vld [vmem:[%s3625_s8 + $0x11a8] sm:$0xff] }
 0x15e   : > { %2747 = vst [vmem:[%s3648_s20 + $0x10e0] sm:$0xff] %v1723_v13  ;;  %2748 = vst [vmem:[%s3648_s20 + $0x10e8] sm:$0xff] %v1724_v14  ;;  %v724_v60 = vld [vmem:[%s3625_s8 + $0x11b0] sm:$0xff]  ;;  %v1747_v61 = vmul.f32 %v3632_v1, %v722_v58  ;;  %v1748_v62 = vmul.f32 %v3632_v1, %v723_v59  ;;  %v725_v0 = vld [vmem:[%s3625_s8 + $0x11b8] sm:$0xff] }
 0x15f   : > { %2749 = vst [vmem:[%s3648_s20 + $0x10f0] sm:$0xff] %v1725_v15  ;;  %2750 = vst [vmem:[%s3648_s20 + $0x10f8] sm:$0xff] %v1726_v19  ;;  %v1749_v63 = vmul.f32 %v3632_v1, %v724_v60  ;;  %v726_v2 = vld [vmem:[%s3625_s8 + $0x11c0] sm:$0xff]  ;;  %v727_v3 = vld [vmem:[%s3625_s8 + $0x11c8] sm:$0xff]  ;;  %v1750_v4 = vmul.f32 %v3632_v1, %v725_v0 }
 0x160   : > { %2751 = vst [vmem:[%s3648_s20 + $0x1100] sm:$0xff] %v1727_v20  ;;  %2752 = vst [vmem:[%s3648_s20 + $0x1108] sm:$0xff] %v1728_v21  ;;  %v1751_v5 = vmul.f32 %v3632_v1, %v726_v2  ;;  %v1752_v6 = vmul.f32 %v3632_v1, %v727_v3  ;;  %v728_v7 = vld [vmem:[%s3625_s8 + $0x11d0] sm:$0xff]  ;;  %v729_v8 = vld [vmem:[%s3625_s8 + $0x11d8] sm:$0xff] }
 0x161   : > { %2753 = vst [vmem:[%s3648_s20 + $0x1110] sm:$0xff] %v1729_v25  ;;  %2754 = vst [vmem:[%s3648_s20 + $0x1118] sm:$0xff] %v1730_v26  ;;  %v730_v9 = vld [vmem:[%s3625_s8 + $0x11e0] sm:$0xff]  ;;  %v1753_v10 = vmul.f32 %v3632_v1, %v728_v7  ;;  %v1754_v11 = vmul.f32 %v3632_v1, %v729_v8  ;;  %v731_v13 = vld [vmem:[%s3625_s8 + $0x11e8] sm:$0xff] }
 0x162   : > { %2755 = vst [vmem:[%s3648_s20 + $0x1120] sm:$0xff] %v1731_v27  ;;  %2756 = vst [vmem:[%s3648_s20 + $0x1128] sm:$0xff] %v1732_v31  ;;  %v1755_v12 = vmul.f32 %v3632_v1, %v730_v9  ;;  %v732_v14 = vld [vmem:[%s3625_s8 + $0x11f0] sm:$0xff]  ;;  %v733_v15 = vld [vmem:[%s3625_s8 + $0x11f8] sm:$0xff]  ;;  %v1756_v16 = vmul.f32 %v3632_v1, %v731_v13 }
 0x163   : > { %2757 = vst [vmem:[%s3648_s20 + $0x1130] sm:$0xff] %v1733_v32  ;;  %2758 = vst [vmem:[%s3648_s20 + $0x1138] sm:$0xff] %v1734_v33  ;;  %v1757_v17 = vmul.f32 %v3632_v1, %v732_v14  ;;  %v1758_v18 = vmul.f32 %v3632_v1, %v733_v15  ;;  %v734_v19 = vld [vmem:[%s3625_s8 + $0x1200] sm:$0xff]  ;;  %v735_v20 = vld [vmem:[%s3625_s8 + $0x1208] sm:$0xff] }
 0x164   : > { %2759 = vst [vmem:[%s3648_s20 + $0x1140] sm:$0xff] %v1735_v37  ;;  %2760 = vst [vmem:[%s3648_s20 + $0x1148] sm:$0xff] %v1736_v38  ;;  %v736_v21 = vld [vmem:[%s3625_s8 + $0x1210] sm:$0xff]  ;;  %v1759_v22 = vmul.f32 %v3632_v1, %v734_v19  ;;  %v1760_v23 = vmul.f32 %v3632_v1, %v735_v20  ;;  %v737_v25 = vld [vmem:[%s3625_s8 + $0x1218] sm:$0xff] }
 0x165   : > { %2761 = vst [vmem:[%s3648_s20 + $0x1150] sm:$0xff] %v1737_v39  ;;  %2762 = vst [vmem:[%s3648_s20 + $0x1158] sm:$0xff] %v1738_v43  ;;  %v1761_v24 = vmul.f32 %v3632_v1, %v736_v21  ;;  %v738_v26 = vld [vmem:[%s3625_s8 + $0x1220] sm:$0xff]  ;;  %v739_v27 = vld [vmem:[%s3625_s8 + $0x1228] sm:$0xff]  ;;  %v1762_v28 = vmul.f32 %v3632_v1, %v737_v25 }
 0x166   : > { %2763 = vst [vmem:[%s3648_s20 + $0x1160] sm:$0xff] %v1739_v44  ;;  %2764 = vst [vmem:[%s3648_s20 + $0x1168] sm:$0xff] %v1740_v45  ;;  %v1763_v29 = vmul.f32 %v3632_v1, %v738_v26  ;;  %v1764_v30 = vmul.f32 %v3632_v1, %v739_v27  ;;  %v740_v31 = vld [vmem:[%s3625_s8 + $0x1230] sm:$0xff]  ;;  %v741_v32 = vld [vmem:[%s3625_s8 + $0x1238] sm:$0xff] }
 0x167   : > { %2765 = vst [vmem:[%s3648_s20 + $0x1170] sm:$0xff] %v1741_v49  ;;  %2766 = vst [vmem:[%s3648_s20 + $0x1178] sm:$0xff] %v1742_v50  ;;  %v742_v33 = vld [vmem:[%s3625_s8 + $0x1240] sm:$0xff]  ;;  %v1765_v34 = vmul.f32 %v3632_v1, %v740_v31  ;;  %v1766_v35 = vmul.f32 %v3632_v1, %v741_v32  ;;  %v743_v37 = vld [vmem:[%s3625_s8 + $0x1248] sm:$0xff] }
 0x168   : > { %2767 = vst [vmem:[%s3648_s20 + $0x1180] sm:$0xff] %v1743_v51  ;;  %2768 = vst [vmem:[%s3648_s20 + $0x1188] sm:$0xff] %v1744_v55  ;;  %v1767_v36 = vmul.f32 %v3632_v1, %v742_v33  ;;  %v744_v38 = vld [vmem:[%s3625_s8 + $0x1250] sm:$0xff]  ;;  %v745_v39 = vld [vmem:[%s3625_s8 + $0x1258] sm:$0xff]  ;;  %v1768_v40 = vmul.f32 %v3632_v1, %v743_v37 }
 0x169   : > { %2769 = vst [vmem:[%s3648_s20 + $0x1190] sm:$0xff] %v1745_v56  ;;  %2770 = vst [vmem:[%s3648_s20 + $0x1198] sm:$0xff] %v1746_v57  ;;  %v1769_v41 = vmul.f32 %v3632_v1, %v744_v38  ;;  %v1770_v42 = vmul.f32 %v3632_v1, %v745_v39  ;;  %v746_v43 = vld [vmem:[%s3625_s8 + $0x1260] sm:$0xff]  ;;  %v747_v44 = vld [vmem:[%s3625_s8 + $0x1268] sm:$0xff] }
 0x16a   : > { %2771 = vst [vmem:[%s3648_s20 + $0x11a0] sm:$0xff] %v1747_v61  ;;  %2772 = vst [vmem:[%s3648_s20 + $0x11a8] sm:$0xff] %v1748_v62  ;;  %v748_v45 = vld [vmem:[%s3625_s8 + $0x1270] sm:$0xff]  ;;  %v1771_v46 = vmul.f32 %v3632_v1, %v746_v43  ;;  %v1772_v47 = vmul.f32 %v3632_v1, %v747_v44  ;;  %v749_v49 = vld [vmem:[%s3625_s8 + $0x1278] sm:$0xff] }
 0x16b   : > { %2773 = vst [vmem:[%s3648_s20 + $0x11b0] sm:$0xff] %v1749_v63  ;;  %2774 = vst [vmem:[%s3648_s20 + $0x11b8] sm:$0xff] %v1750_v4  ;;  %v1773_v48 = vmul.f32 %v3632_v1, %v748_v45  ;;  %v750_v50 = vld [vmem:[%s3625_s8 + $0x1280] sm:$0xff]  ;;  %v751_v51 = vld [vmem:[%s3625_s8 + $0x1288] sm:$0xff]  ;;  %v1774_v52 = vmul.f32 %v3632_v1, %v749_v49 }
 0x16c   : > { %2775 = vst [vmem:[%s3648_s20 + $0x11c0] sm:$0xff] %v1751_v5  ;;  %2776 = vst [vmem:[%s3648_s20 + $0x11c8] sm:$0xff] %v1752_v6  ;;  %v1775_v53 = vmul.f32 %v3632_v1, %v750_v50  ;;  %v1776_v54 = vmul.f32 %v3632_v1, %v751_v51  ;;  %v752_v55 = vld [vmem:[%s3625_s8 + $0x1290] sm:$0xff]  ;;  %v753_v56 = vld [vmem:[%s3625_s8 + $0x1298] sm:$0xff] }
 0x16d   : > { %2777 = vst [vmem:[%s3648_s20 + $0x11d0] sm:$0xff] %v1753_v10  ;;  %2778 = vst [vmem:[%s3648_s20 + $0x11d8] sm:$0xff] %v1754_v11  ;;  %v754_v57 = vld [vmem:[%s3625_s8 + $0x12a0] sm:$0xff]  ;;  %v1777_v58 = vmul.f32 %v3632_v1, %v752_v55  ;;  %v1778_v59 = vmul.f32 %v3632_v1, %v753_v56  ;;  %v755_v61 = vld [vmem:[%s3625_s8 + $0x12a8] sm:$0xff] }
 0x16e   : > { %2779 = vst [vmem:[%s3648_s20 + $0x11e0] sm:$0xff] %v1755_v12  ;;  %2780 = vst [vmem:[%s3648_s20 + $0x11e8] sm:$0xff] %v1756_v16  ;;  %v1779_v60 = vmul.f32 %v3632_v1, %v754_v57  ;;  %v756_v62 = vld [vmem:[%s3625_s8 + $0x12b0] sm:$0xff]  ;;  %v757_v63 = vld [vmem:[%s3625_s8 + $0x12b8] sm:$0xff]  ;;  %v1780_v0 = vmul.f32 %v3632_v1, %v755_v61 }
 0x16f   : > { %2781 = vst [vmem:[%s3648_s20 + $0x11f0] sm:$0xff] %v1757_v17  ;;  %2782 = vst [vmem:[%s3648_s20 + $0x11f8] sm:$0xff] %v1758_v18  ;;  %v1781_v2 = vmul.f32 %v3632_v1, %v756_v62  ;;  %v1782_v3 = vmul.f32 %v3632_v1, %v757_v63  ;;  %v758_v4 = vld [vmem:[%s3625_s8 + $0x12c0] sm:$0xff]  ;;  %v759_v5 = vld [vmem:[%s3625_s8 + $0x12c8] sm:$0xff] }
 0x170   : > { %2783 = vst [vmem:[%s3648_s20 + $0x1200] sm:$0xff] %v1759_v22  ;;  %2784 = vst [vmem:[%s3648_s20 + $0x1208] sm:$0xff] %v1760_v23  ;;  %v760_v6 = vld [vmem:[%s3625_s8 + $0x12d0] sm:$0xff]  ;;  %v1783_v7 = vmul.f32 %v3632_v1, %v758_v4  ;;  %v1784_v8 = vmul.f32 %v3632_v1, %v759_v5  ;;  %v761_v10 = vld [vmem:[%s3625_s8 + $0x12d8] sm:$0xff] }
 0x171   : > { %2785 = vst [vmem:[%s3648_s20 + $0x1210] sm:$0xff] %v1761_v24  ;;  %2786 = vst [vmem:[%s3648_s20 + $0x1218] sm:$0xff] %v1762_v28  ;;  %v1785_v9 = vmul.f32 %v3632_v1, %v760_v6  ;;  %v762_v11 = vld [vmem:[%s3625_s8 + $0x12e0] sm:$0xff]  ;;  %v763_v12 = vld [vmem:[%s3625_s8 + $0x12e8] sm:$0xff]  ;;  %v1786_v13 = vmul.f32 %v3632_v1, %v761_v10 }
 0x172   : > { %2787 = vst [vmem:[%s3648_s20 + $0x1220] sm:$0xff] %v1763_v29  ;;  %2788 = vst [vmem:[%s3648_s20 + $0x1228] sm:$0xff] %v1764_v30  ;;  %v1787_v14 = vmul.f32 %v3632_v1, %v762_v11  ;;  %v1788_v15 = vmul.f32 %v3632_v1, %v763_v12  ;;  %v764_v16 = vld [vmem:[%s3625_s8 + $0x12f0] sm:$0xff]  ;;  %v765_v17 = vld [vmem:[%s3625_s8 + $0x12f8] sm:$0xff] }
 0x173   : > { %2789 = vst [vmem:[%s3648_s20 + $0x1230] sm:$0xff] %v1765_v34  ;;  %2790 = vst [vmem:[%s3648_s20 + $0x1238] sm:$0xff] %v1766_v35  ;;  %v766_v18 = vld [vmem:[%s3625_s8 + $0x1300] sm:$0xff]  ;;  %v1789_v19 = vmul.f32 %v3632_v1, %v764_v16  ;;  %v1790_v20 = vmul.f32 %v3632_v1, %v765_v17  ;;  %v767_v22 = vld [vmem:[%s3625_s8 + $0x1308] sm:$0xff] }
 0x174   : > { %2791 = vst [vmem:[%s3648_s20 + $0x1240] sm:$0xff] %v1767_v36  ;;  %2792 = vst [vmem:[%s3648_s20 + $0x1248] sm:$0xff] %v1768_v40  ;;  %v1791_v21 = vmul.f32 %v3632_v1, %v766_v18  ;;  %v768_v23 = vld [vmem:[%s3625_s8 + $0x1310] sm:$0xff]  ;;  %v769_v24 = vld [vmem:[%s3625_s8 + $0x1318] sm:$0xff]  ;;  %v1792_v25 = vmul.f32 %v3632_v1, %v767_v22 }
 0x175   : > { %2793 = vst [vmem:[%s3648_s20 + $0x1250] sm:$0xff] %v1769_v41  ;;  %2794 = vst [vmem:[%s3648_s20 + $0x1258] sm:$0xff] %v1770_v42  ;;  %v1793_v26 = vmul.f32 %v3632_v1, %v768_v23  ;;  %v1794_v27 = vmul.f32 %v3632_v1, %v769_v24  ;;  %v770_v28 = vld [vmem:[%s3625_s8 + $0x1320] sm:$0xff]  ;;  %v771_v29 = vld [vmem:[%s3625_s8 + $0x1328] sm:$0xff] }
 0x176   : > { %2795 = vst [vmem:[%s3648_s20 + $0x1260] sm:$0xff] %v1771_v46  ;;  %2796 = vst [vmem:[%s3648_s20 + $0x1268] sm:$0xff] %v1772_v47  ;;  %v772_v30 = vld [vmem:[%s3625_s8 + $0x1330] sm:$0xff]  ;;  %v1795_v31 = vmul.f32 %v3632_v1, %v770_v28  ;;  %v1796_v32 = vmul.f32 %v3632_v1, %v771_v29  ;;  %v773_v34 = vld [vmem:[%s3625_s8 + $0x1338] sm:$0xff] }
 0x177   : > { %2797 = vst [vmem:[%s3648_s20 + $0x1270] sm:$0xff] %v1773_v48  ;;  %2798 = vst [vmem:[%s3648_s20 + $0x1278] sm:$0xff] %v1774_v52  ;;  %v1797_v33 = vmul.f32 %v3632_v1, %v772_v30  ;;  %v774_v35 = vld [vmem:[%s3625_s8 + $0x1340] sm:$0xff]  ;;  %v775_v36 = vld [vmem:[%s3625_s8 + $0x1348] sm:$0xff]  ;;  %v1798_v37 = vmul.f32 %v3632_v1, %v773_v34 }
 0x178   : > { %2799 = vst [vmem:[%s3648_s20 + $0x1280] sm:$0xff] %v1775_v53  ;;  %2800 = vst [vmem:[%s3648_s20 + $0x1288] sm:$0xff] %v1776_v54  ;;  %v1799_v38 = vmul.f32 %v3632_v1, %v774_v35  ;;  %v1800_v39 = vmul.f32 %v3632_v1, %v775_v36  ;;  %v776_v40 = vld [vmem:[%s3625_s8 + $0x1350] sm:$0xff]  ;;  %v777_v41 = vld [vmem:[%s3625_s8 + $0x1358] sm:$0xff] }
 0x179   : > { %2801 = vst [vmem:[%s3648_s20 + $0x1290] sm:$0xff] %v1777_v58  ;;  %2802 = vst [vmem:[%s3648_s20 + $0x1298] sm:$0xff] %v1778_v59  ;;  %v778_v42 = vld [vmem:[%s3625_s8 + $0x1360] sm:$0xff]  ;;  %v1801_v43 = vmul.f32 %v3632_v1, %v776_v40  ;;  %v1802_v44 = vmul.f32 %v3632_v1, %v777_v41  ;;  %v779_v46 = vld [vmem:[%s3625_s8 + $0x1368] sm:$0xff] }
 0x17a   : > { %2803 = vst [vmem:[%s3648_s20 + $0x12a0] sm:$0xff] %v1779_v60  ;;  %2804 = vst [vmem:[%s3648_s20 + $0x12a8] sm:$0xff] %v1780_v0  ;;  %v1803_v45 = vmul.f32 %v3632_v1, %v778_v42  ;;  %v780_v47 = vld [vmem:[%s3625_s8 + $0x1370] sm:$0xff]  ;;  %v781_v48 = vld [vmem:[%s3625_s8 + $0x1378] sm:$0xff]  ;;  %v1804_v49 = vmul.f32 %v3632_v1, %v779_v46 }
 0x17b   : > { %2805 = vst [vmem:[%s3648_s20 + $0x12b0] sm:$0xff] %v1781_v2  ;;  %2806 = vst [vmem:[%s3648_s20 + $0x12b8] sm:$0xff] %v1782_v3  ;;  %v1805_v50 = vmul.f32 %v3632_v1, %v780_v47  ;;  %v1806_v51 = vmul.f32 %v3632_v1, %v781_v48  ;;  %v782_v52 = vld [vmem:[%s3625_s8 + $0x1380] sm:$0xff]  ;;  %v783_v53 = vld [vmem:[%s3625_s8 + $0x1388] sm:$0xff] }
 0x17c   : > { %2807 = vst [vmem:[%s3648_s20 + $0x12c0] sm:$0xff] %v1783_v7  ;;  %2808 = vst [vmem:[%s3648_s20 + $0x12c8] sm:$0xff] %v1784_v8  ;;  %v784_v54 = vld [vmem:[%s3625_s8 + $0x1390] sm:$0xff]  ;;  %v1807_v55 = vmul.f32 %v3632_v1, %v782_v52  ;;  %v1808_v56 = vmul.f32 %v3632_v1, %v783_v53  ;;  %v785_v58 = vld [vmem:[%s3625_s8 + $0x1398] sm:$0xff] }
 0x17d   : > { %2809 = vst [vmem:[%s3648_s20 + $0x12d0] sm:$0xff] %v1785_v9  ;;  %2810 = vst [vmem:[%s3648_s20 + $0x12d8] sm:$0xff] %v1786_v13  ;;  %v1809_v57 = vmul.f32 %v3632_v1, %v784_v54  ;;  %v786_v59 = vld [vmem:[%s3625_s8 + $0x13a0] sm:$0xff]  ;;  %v787_v60 = vld [vmem:[%s3625_s8 + $0x13a8] sm:$0xff]  ;;  %v1810_v61 = vmul.f32 %v3632_v1, %v785_v58 }
 0x17e   : > { %2811 = vst [vmem:[%s3648_s20 + $0x12e0] sm:$0xff] %v1787_v14  ;;  %2812 = vst [vmem:[%s3648_s20 + $0x12e8] sm:$0xff] %v1788_v15  ;;  %v1811_v62 = vmul.f32 %v3632_v1, %v786_v59  ;;  %v1812_v63 = vmul.f32 %v3632_v1, %v787_v60  ;;  %v788_v0 = vld [vmem:[%s3625_s8 + $0x13b0] sm:$0xff]  ;;  %v789_v2 = vld [vmem:[%s3625_s8 + $0x13b8] sm:$0xff] }
 0x17f   : > { %2813 = vst [vmem:[%s3648_s20 + $0x12f0] sm:$0xff] %v1789_v19  ;;  %2814 = vst [vmem:[%s3648_s20 + $0x12f8] sm:$0xff] %v1790_v20  ;;  %v790_v3 = vld [vmem:[%s3625_s8 + $0x13c0] sm:$0xff]  ;;  %v1813_v4 = vmul.f32 %v3632_v1, %v788_v0  ;;  %v1814_v5 = vmul.f32 %v3632_v1, %v789_v2  ;;  %v791_v7 = vld [vmem:[%s3625_s8 + $0x13c8] sm:$0xff] }
 0x180   : > { %2815 = vst [vmem:[%s3648_s20 + $0x1300] sm:$0xff] %v1791_v21  ;;  %2816 = vst [vmem:[%s3648_s20 + $0x1308] sm:$0xff] %v1792_v25  ;;  %v1815_v6 = vmul.f32 %v3632_v1, %v790_v3  ;;  %v792_v8 = vld [vmem:[%s3625_s8 + $0x13d0] sm:$0xff]  ;;  %v793_v9 = vld [vmem:[%s3625_s8 + $0x13d8] sm:$0xff]  ;;  %v1816_v10 = vmul.f32 %v3632_v1, %v791_v7 }
 0x181   : > { %2817 = vst [vmem:[%s3648_s20 + $0x1310] sm:$0xff] %v1793_v26  ;;  %2818 = vst [vmem:[%s3648_s20 + $0x1318] sm:$0xff] %v1794_v27  ;;  %v1817_v11 = vmul.f32 %v3632_v1, %v792_v8  ;;  %v1818_v12 = vmul.f32 %v3632_v1, %v793_v9  ;;  %v794_v13 = vld [vmem:[%s3625_s8 + $0x13e0] sm:$0xff]  ;;  %v795_v14 = vld [vmem:[%s3625_s8 + $0x13e8] sm:$0xff] }
 0x182   : > { %2819 = vst [vmem:[%s3648_s20 + $0x1320] sm:$0xff] %v1795_v31  ;;  %2820 = vst [vmem:[%s3648_s20 + $0x1328] sm:$0xff] %v1796_v32  ;;  %v796_v15 = vld [vmem:[%s3625_s8 + $0x13f0] sm:$0xff]  ;;  %v1819_v16 = vmul.f32 %v3632_v1, %v794_v13  ;;  %v1820_v17 = vmul.f32 %v3632_v1, %v795_v14  ;;  %v797_v19 = vld [vmem:[%s3625_s8 + $0x13f8] sm:$0xff] }
 0x183   : > { %2821 = vst [vmem:[%s3648_s20 + $0x1330] sm:$0xff] %v1797_v33  ;;  %2822 = vst [vmem:[%s3648_s20 + $0x1338] sm:$0xff] %v1798_v37  ;;  %v1821_v18 = vmul.f32 %v3632_v1, %v796_v15  ;;  %v798_v20 = vld [vmem:[%s3625_s8 + $0x1400] sm:$0xff]  ;;  %v799_v21 = vld [vmem:[%s3625_s8 + $0x1408] sm:$0xff]  ;;  %v1822_v22 = vmul.f32 %v3632_v1, %v797_v19 }
 0x184   : > { %2823 = vst [vmem:[%s3648_s20 + $0x1340] sm:$0xff] %v1799_v38  ;;  %2824 = vst [vmem:[%s3648_s20 + $0x1348] sm:$0xff] %v1800_v39  ;;  %v1823_v23 = vmul.f32 %v3632_v1, %v798_v20  ;;  %v1824_v24 = vmul.f32 %v3632_v1, %v799_v21  ;;  %v800_v25 = vld [vmem:[%s3625_s8 + $0x1410] sm:$0xff]  ;;  %v801_v26 = vld [vmem:[%s3625_s8 + $0x1418] sm:$0xff] }
 0x185   : > { %2825 = vst [vmem:[%s3648_s20 + $0x1350] sm:$0xff] %v1801_v43  ;;  %2826 = vst [vmem:[%s3648_s20 + $0x1358] sm:$0xff] %v1802_v44  ;;  %v802_v27 = vld [vmem:[%s3625_s8 + $0x1420] sm:$0xff]  ;;  %v1825_v28 = vmul.f32 %v3632_v1, %v800_v25  ;;  %v1826_v29 = vmul.f32 %v3632_v1, %v801_v26  ;;  %v803_v31 = vld [vmem:[%s3625_s8 + $0x1428] sm:$0xff] }
 0x186   : > { %2827 = vst [vmem:[%s3648_s20 + $0x1360] sm:$0xff] %v1803_v45  ;;  %2828 = vst [vmem:[%s3648_s20 + $0x1368] sm:$0xff] %v1804_v49  ;;  %v1827_v30 = vmul.f32 %v3632_v1, %v802_v27  ;;  %v804_v32 = vld [vmem:[%s3625_s8 + $0x1430] sm:$0xff]  ;;  %v805_v33 = vld [vmem:[%s3625_s8 + $0x1438] sm:$0xff]  ;;  %v1828_v34 = vmul.f32 %v3632_v1, %v803_v31 }
 0x187   : > { %2829 = vst [vmem:[%s3648_s20 + $0x1370] sm:$0xff] %v1805_v50  ;;  %2830 = vst [vmem:[%s3648_s20 + $0x1378] sm:$0xff] %v1806_v51  ;;  %v1829_v35 = vmul.f32 %v3632_v1, %v804_v32  ;;  %v1830_v36 = vmul.f32 %v3632_v1, %v805_v33  ;;  %v806_v37 = vld [vmem:[%s3625_s8 + $0x1440] sm:$0xff]  ;;  %v807_v38 = vld [vmem:[%s3625_s8 + $0x1448] sm:$0xff] }
 0x188   : > { %2831 = vst [vmem:[%s3648_s20 + $0x1380] sm:$0xff] %v1807_v55  ;;  %2832 = vst [vmem:[%s3648_s20 + $0x1388] sm:$0xff] %v1808_v56  ;;  %v808_v39 = vld [vmem:[%s3625_s8 + $0x1450] sm:$0xff]  ;;  %v1831_v40 = vmul.f32 %v3632_v1, %v806_v37  ;;  %v1832_v41 = vmul.f32 %v3632_v1, %v807_v38  ;;  %v809_v43 = vld [vmem:[%s3625_s8 + $0x1458] sm:$0xff] }
 0x189   : > { %2833 = vst [vmem:[%s3648_s20 + $0x1390] sm:$0xff] %v1809_v57  ;;  %2834 = vst [vmem:[%s3648_s20 + $0x1398] sm:$0xff] %v1810_v61  ;;  %v1833_v42 = vmul.f32 %v3632_v1, %v808_v39  ;;  %v810_v44 = vld [vmem:[%s3625_s8 + $0x1460] sm:$0xff]  ;;  %v811_v45 = vld [vmem:[%s3625_s8 + $0x1468] sm:$0xff]  ;;  %v1834_v46 = vmul.f32 %v3632_v1, %v809_v43 }
 0x18a   : > { %2835 = vst [vmem:[%s3648_s20 + $0x13a0] sm:$0xff] %v1811_v62  ;;  %2836 = vst [vmem:[%s3648_s20 + $0x13a8] sm:$0xff] %v1812_v63  ;;  %v1835_v47 = vmul.f32 %v3632_v1, %v810_v44  ;;  %v1836_v48 = vmul.f32 %v3632_v1, %v811_v45  ;;  %v812_v49 = vld [vmem:[%s3625_s8 + $0x1470] sm:$0xff]  ;;  %v813_v50 = vld [vmem:[%s3625_s8 + $0x1478] sm:$0xff] }
 0x18b   : > { %2837 = vst [vmem:[%s3648_s20 + $0x13b0] sm:$0xff] %v1813_v4  ;;  %2838 = vst [vmem:[%s3648_s20 + $0x13b8] sm:$0xff] %v1814_v5  ;;  %v814_v51 = vld [vmem:[%s3625_s8 + $0x1480] sm:$0xff]  ;;  %v1837_v52 = vmul.f32 %v3632_v1, %v812_v49  ;;  %v1838_v53 = vmul.f32 %v3632_v1, %v813_v50  ;;  %v815_v55 = vld [vmem:[%s3625_s8 + $0x1488] sm:$0xff] }
 0x18c   : > { %2839 = vst [vmem:[%s3648_s20 + $0x13c0] sm:$0xff] %v1815_v6  ;;  %2840 = vst [vmem:[%s3648_s20 + $0x13c8] sm:$0xff] %v1816_v10  ;;  %v1839_v54 = vmul.f32 %v3632_v1, %v814_v51  ;;  %v816_v56 = vld [vmem:[%s3625_s8 + $0x1490] sm:$0xff]  ;;  %v817_v57 = vld [vmem:[%s3625_s8 + $0x1498] sm:$0xff]  ;;  %v1840_v58 = vmul.f32 %v3632_v1, %v815_v55 }
 0x18d   : > { %2841 = vst [vmem:[%s3648_s20 + $0x13d0] sm:$0xff] %v1817_v11  ;;  %2842 = vst [vmem:[%s3648_s20 + $0x13d8] sm:$0xff] %v1818_v12  ;;  %v1841_v59 = vmul.f32 %v3632_v1, %v816_v56  ;;  %v1842_v60 = vmul.f32 %v3632_v1, %v817_v57  ;;  %v818_v61 = vld [vmem:[%s3625_s8 + $0x14a0] sm:$0xff]  ;;  %v819_v62 = vld [vmem:[%s3625_s8 + $0x14a8] sm:$0xff] }
 0x18e   : > { %2843 = vst [vmem:[%s3648_s20 + $0x13e0] sm:$0xff] %v1819_v16  ;;  %2844 = vst [vmem:[%s3648_s20 + $0x13e8] sm:$0xff] %v1820_v17  ;;  %v820_v63 = vld [vmem:[%s3625_s8 + $0x14b0] sm:$0xff]  ;;  %v1843_v0 = vmul.f32 %v3632_v1, %v818_v61  ;;  %v1844_v2 = vmul.f32 %v3632_v1, %v819_v62  ;;  %v821_v4 = vld [vmem:[%s3625_s8 + $0x14b8] sm:$0xff] }
 0x18f   : > { %2845 = vst [vmem:[%s3648_s20 + $0x13f0] sm:$0xff] %v1821_v18  ;;  %2846 = vst [vmem:[%s3648_s20 + $0x13f8] sm:$0xff] %v1822_v22  ;;  %v1845_v3 = vmul.f32 %v3632_v1, %v820_v63  ;;  %v822_v5 = vld [vmem:[%s3625_s8 + $0x14c0] sm:$0xff]  ;;  %v823_v6 = vld [vmem:[%s3625_s8 + $0x14c8] sm:$0xff]  ;;  %v1846_v7 = vmul.f32 %v3632_v1, %v821_v4 }
 0x190   : > { %2847 = vst [vmem:[%s3648_s20 + $0x1400] sm:$0xff] %v1823_v23  ;;  %2848 = vst [vmem:[%s3648_s20 + $0x1408] sm:$0xff] %v1824_v24  ;;  %v1847_v8 = vmul.f32 %v3632_v1, %v822_v5  ;;  %v1848_v9 = vmul.f32 %v3632_v1, %v823_v6  ;;  %v824_v10 = vld [vmem:[%s3625_s8 + $0x14d0] sm:$0xff]  ;;  %v825_v11 = vld [vmem:[%s3625_s8 + $0x14d8] sm:$0xff] }
 0x191   : > { %2849 = vst [vmem:[%s3648_s20 + $0x1410] sm:$0xff] %v1825_v28  ;;  %2850 = vst [vmem:[%s3648_s20 + $0x1418] sm:$0xff] %v1826_v29  ;;  %v826_v12 = vld [vmem:[%s3625_s8 + $0x14e0] sm:$0xff]  ;;  %v1849_v13 = vmul.f32 %v3632_v1, %v824_v10  ;;  %v1850_v14 = vmul.f32 %v3632_v1, %v825_v11  ;;  %v827_v16 = vld [vmem:[%s3625_s8 + $0x14e8] sm:$0xff] }
 0x192   : > { %2851 = vst [vmem:[%s3648_s20 + $0x1420] sm:$0xff] %v1827_v30  ;;  %2852 = vst [vmem:[%s3648_s20 + $0x1428] sm:$0xff] %v1828_v34  ;;  %v1851_v15 = vmul.f32 %v3632_v1, %v826_v12  ;;  %v828_v17 = vld [vmem:[%s3625_s8 + $0x14f0] sm:$0xff]  ;;  %v829_v18 = vld [vmem:[%s3625_s8 + $0x14f8] sm:$0xff]  ;;  %v1852_v19 = vmul.f32 %v3632_v1, %v827_v16 }
 0x193   : > { %2853 = vst [vmem:[%s3648_s20 + $0x1430] sm:$0xff] %v1829_v35  ;;  %2854 = vst [vmem:[%s3648_s20 + $0x1438] sm:$0xff] %v1830_v36  ;;  %v1853_v20 = vmul.f32 %v3632_v1, %v828_v17  ;;  %v1854_v21 = vmul.f32 %v3632_v1, %v829_v18  ;;  %v830_v22 = vld [vmem:[%s3625_s8 + $0x1500] sm:$0xff]  ;;  %v831_v23 = vld [vmem:[%s3625_s8 + $0x1508] sm:$0xff] }
 0x194   : > { %2855 = vst [vmem:[%s3648_s20 + $0x1440] sm:$0xff] %v1831_v40  ;;  %2856 = vst [vmem:[%s3648_s20 + $0x1448] sm:$0xff] %v1832_v41  ;;  %v832_v24 = vld [vmem:[%s3625_s8 + $0x1510] sm:$0xff]  ;;  %v1855_v25 = vmul.f32 %v3632_v1, %v830_v22  ;;  %v1856_v26 = vmul.f32 %v3632_v1, %v831_v23  ;;  %v833_v28 = vld [vmem:[%s3625_s8 + $0x1518] sm:$0xff] }
 0x195   : > { %2857 = vst [vmem:[%s3648_s20 + $0x1450] sm:$0xff] %v1833_v42  ;;  %2858 = vst [vmem:[%s3648_s20 + $0x1458] sm:$0xff] %v1834_v46  ;;  %v1857_v27 = vmul.f32 %v3632_v1, %v832_v24  ;;  %v834_v29 = vld [vmem:[%s3625_s8 + $0x1520] sm:$0xff]  ;;  %v835_v30 = vld [vmem:[%s3625_s8 + $0x1528] sm:$0xff]  ;;  %v1858_v31 = vmul.f32 %v3632_v1, %v833_v28 }
 0x196   : > { %2859 = vst [vmem:[%s3648_s20 + $0x1460] sm:$0xff] %v1835_v47  ;;  %2860 = vst [vmem:[%s3648_s20 + $0x1468] sm:$0xff] %v1836_v48  ;;  %v1859_v32 = vmul.f32 %v3632_v1, %v834_v29  ;;  %v1860_v33 = vmul.f32 %v3632_v1, %v835_v30  ;;  %v836_v34 = vld [vmem:[%s3625_s8 + $0x1530] sm:$0xff]  ;;  %v837_v35 = vld [vmem:[%s3625_s8 + $0x1538] sm:$0xff] }
 0x197   : > { %2861 = vst [vmem:[%s3648_s20 + $0x1470] sm:$0xff] %v1837_v52  ;;  %2862 = vst [vmem:[%s3648_s20 + $0x1478] sm:$0xff] %v1838_v53  ;;  %v838_v36 = vld [vmem:[%s3625_s8 + $0x1540] sm:$0xff]  ;;  %v1861_v37 = vmul.f32 %v3632_v1, %v836_v34  ;;  %v1862_v38 = vmul.f32 %v3632_v1, %v837_v35  ;;  %v839_v40 = vld [vmem:[%s3625_s8 + $0x1548] sm:$0xff] }
 0x198   : > { %2863 = vst [vmem:[%s3648_s20 + $0x1480] sm:$0xff] %v1839_v54  ;;  %2864 = vst [vmem:[%s3648_s20 + $0x1488] sm:$0xff] %v1840_v58  ;;  %v1863_v39 = vmul.f32 %v3632_v1, %v838_v36  ;;  %v840_v41 = vld [vmem:[%s3625_s8 + $0x1550] sm:$0xff]  ;;  %v841_v42 = vld [vmem:[%s3625_s8 + $0x1558] sm:$0xff]  ;;  %v1864_v43 = vmul.f32 %v3632_v1, %v839_v40 }
 0x199   : > { %2865 = vst [vmem:[%s3648_s20 + $0x1490] sm:$0xff] %v1841_v59  ;;  %2866 = vst [vmem:[%s3648_s20 + $0x1498] sm:$0xff] %v1842_v60  ;;  %v1865_v44 = vmul.f32 %v3632_v1, %v840_v41  ;;  %v1866_v45 = vmul.f32 %v3632_v1, %v841_v42  ;;  %v842_v46 = vld [vmem:[%s3625_s8 + $0x1560] sm:$0xff]  ;;  %v843_v47 = vld [vmem:[%s3625_s8 + $0x1568] sm:$0xff] }
 0x19a   : > { %2867 = vst [vmem:[%s3648_s20 + $0x14a0] sm:$0xff] %v1843_v0  ;;  %2868 = vst [vmem:[%s3648_s20 + $0x14a8] sm:$0xff] %v1844_v2  ;;  %v844_v48 = vld [vmem:[%s3625_s8 + $0x1570] sm:$0xff]  ;;  %v1867_v49 = vmul.f32 %v3632_v1, %v842_v46  ;;  %v1868_v50 = vmul.f32 %v3632_v1, %v843_v47  ;;  %v845_v52 = vld [vmem:[%s3625_s8 + $0x1578] sm:$0xff] }
 0x19b   : > { %2869 = vst [vmem:[%s3648_s20 + $0x14b0] sm:$0xff] %v1845_v3  ;;  %2870 = vst [vmem:[%s3648_s20 + $0x14b8] sm:$0xff] %v1846_v7  ;;  %v1869_v51 = vmul.f32 %v3632_v1, %v844_v48  ;;  %v846_v53 = vld [vmem:[%s3625_s8 + $0x1580] sm:$0xff]  ;;  %v847_v54 = vld [vmem:[%s3625_s8 + $0x1588] sm:$0xff]  ;;  %v1870_v55 = vmul.f32 %v3632_v1, %v845_v52 }
 0x19c   : > { %2871 = vst [vmem:[%s3648_s20 + $0x14c0] sm:$0xff] %v1847_v8  ;;  %2872 = vst [vmem:[%s3648_s20 + $0x14c8] sm:$0xff] %v1848_v9  ;;  %v1871_v56 = vmul.f32 %v3632_v1, %v846_v53  ;;  %v1872_v57 = vmul.f32 %v3632_v1, %v847_v54  ;;  %v848_v58 = vld [vmem:[%s3625_s8 + $0x1590] sm:$0xff]  ;;  %v849_v59 = vld [vmem:[%s3625_s8 + $0x1598] sm:$0xff] }
 0x19d   : > { %2873 = vst [vmem:[%s3648_s20 + $0x14d0] sm:$0xff] %v1849_v13  ;;  %2874 = vst [vmem:[%s3648_s20 + $0x14d8] sm:$0xff] %v1850_v14  ;;  %v850_v60 = vld [vmem:[%s3625_s8 + $0x15a0] sm:$0xff]  ;;  %v1873_v61 = vmul.f32 %v3632_v1, %v848_v58  ;;  %v1874_v62 = vmul.f32 %v3632_v1, %v849_v59  ;;  %v851_v0 = vld [vmem:[%s3625_s8 + $0x15a8] sm:$0xff] }
 0x19e   : > { %2875 = vst [vmem:[%s3648_s20 + $0x14e0] sm:$0xff] %v1851_v15  ;;  %2876 = vst [vmem:[%s3648_s20 + $0x14e8] sm:$0xff] %v1852_v19  ;;  %v1875_v63 = vmul.f32 %v3632_v1, %v850_v60  ;;  %v852_v2 = vld [vmem:[%s3625_s8 + $0x15b0] sm:$0xff]  ;;  %v853_v3 = vld [vmem:[%s3625_s8 + $0x15b8] sm:$0xff]  ;;  %v1876_v4 = vmul.f32 %v3632_v1, %v851_v0 }
 0x19f   : > { %2877 = vst [vmem:[%s3648_s20 + $0x14f0] sm:$0xff] %v1853_v20  ;;  %2878 = vst [vmem:[%s3648_s20 + $0x14f8] sm:$0xff] %v1854_v21  ;;  %v1877_v5 = vmul.f32 %v3632_v1, %v852_v2  ;;  %v1878_v6 = vmul.f32 %v3632_v1, %v853_v3  ;;  %v854_v7 = vld [vmem:[%s3625_s8 + $0x15c0] sm:$0xff]  ;;  %v855_v8 = vld [vmem:[%s3625_s8 + $0x15c8] sm:$0xff] }
 0x1a0   : > { %2879 = vst [vmem:[%s3648_s20 + $0x1500] sm:$0xff] %v1855_v25  ;;  %2880 = vst [vmem:[%s3648_s20 + $0x1508] sm:$0xff] %v1856_v26  ;;  %v856_v9 = vld [vmem:[%s3625_s8 + $0x15d0] sm:$0xff]  ;;  %v1879_v10 = vmul.f32 %v3632_v1, %v854_v7  ;;  %v1880_v11 = vmul.f32 %v3632_v1, %v855_v8  ;;  %v857_v13 = vld [vmem:[%s3625_s8 + $0x15d8] sm:$0xff] }
 0x1a1   : > { %2881 = vst [vmem:[%s3648_s20 + $0x1510] sm:$0xff] %v1857_v27  ;;  %2882 = vst [vmem:[%s3648_s20 + $0x1518] sm:$0xff] %v1858_v31  ;;  %v1881_v12 = vmul.f32 %v3632_v1, %v856_v9  ;;  %v858_v14 = vld [vmem:[%s3625_s8 + $0x15e0] sm:$0xff]  ;;  %v859_v15 = vld [vmem:[%s3625_s8 + $0x15e8] sm:$0xff]  ;;  %v1882_v16 = vmul.f32 %v3632_v1, %v857_v13 }
 0x1a2   : > { %2883 = vst [vmem:[%s3648_s20 + $0x1520] sm:$0xff] %v1859_v32  ;;  %2884 = vst [vmem:[%s3648_s20 + $0x1528] sm:$0xff] %v1860_v33  ;;  %v1883_v17 = vmul.f32 %v3632_v1, %v858_v14  ;;  %v1884_v18 = vmul.f32 %v3632_v1, %v859_v15  ;;  %v860_v19 = vld [vmem:[%s3625_s8 + $0x15f0] sm:$0xff]  ;;  %v861_v20 = vld [vmem:[%s3625_s8 + $0x15f8] sm:$0xff] }
 0x1a3   : > { %2885 = vst [vmem:[%s3648_s20 + $0x1530] sm:$0xff] %v1861_v37  ;;  %2886 = vst [vmem:[%s3648_s20 + $0x1538] sm:$0xff] %v1862_v38  ;;  %v862_v21 = vld [vmem:[%s3625_s8 + $0x1600] sm:$0xff]  ;;  %v1885_v22 = vmul.f32 %v3632_v1, %v860_v19  ;;  %v1886_v23 = vmul.f32 %v3632_v1, %v861_v20  ;;  %v863_v25 = vld [vmem:[%s3625_s8 + $0x1608] sm:$0xff] }
 0x1a4   : > { %2887 = vst [vmem:[%s3648_s20 + $0x1540] sm:$0xff] %v1863_v39  ;;  %2888 = vst [vmem:[%s3648_s20 + $0x1548] sm:$0xff] %v1864_v43  ;;  %v1887_v24 = vmul.f32 %v3632_v1, %v862_v21  ;;  %v864_v26 = vld [vmem:[%s3625_s8 + $0x1610] sm:$0xff]  ;;  %v865_v27 = vld [vmem:[%s3625_s8 + $0x1618] sm:$0xff]  ;;  %v1888_v28 = vmul.f32 %v3632_v1, %v863_v25 }
 0x1a5   : > { %2889 = vst [vmem:[%s3648_s20 + $0x1550] sm:$0xff] %v1865_v44  ;;  %2890 = vst [vmem:[%s3648_s20 + $0x1558] sm:$0xff] %v1866_v45  ;;  %v1889_v29 = vmul.f32 %v3632_v1, %v864_v26  ;;  %v1890_v30 = vmul.f32 %v3632_v1, %v865_v27  ;;  %v866_v31 = vld [vmem:[%s3625_s8 + $0x1620] sm:$0xff]  ;;  %v867_v32 = vld [vmem:[%s3625_s8 + $0x1628] sm:$0xff] }
 0x1a6   : > { %2891 = vst [vmem:[%s3648_s20 + $0x1560] sm:$0xff] %v1867_v49  ;;  %2892 = vst [vmem:[%s3648_s20 + $0x1568] sm:$0xff] %v1868_v50  ;;  %v868_v33 = vld [vmem:[%s3625_s8 + $0x1630] sm:$0xff]  ;;  %v1891_v34 = vmul.f32 %v3632_v1, %v866_v31  ;;  %v1892_v35 = vmul.f32 %v3632_v1, %v867_v32  ;;  %v869_v37 = vld [vmem:[%s3625_s8 + $0x1638] sm:$0xff] }
 0x1a7   : > { %2893 = vst [vmem:[%s3648_s20 + $0x1570] sm:$0xff] %v1869_v51  ;;  %2894 = vst [vmem:[%s3648_s20 + $0x1578] sm:$0xff] %v1870_v55  ;;  %v1893_v36 = vmul.f32 %v3632_v1, %v868_v33  ;;  %v870_v38 = vld [vmem:[%s3625_s8 + $0x1640] sm:$0xff]  ;;  %v871_v39 = vld [vmem:[%s3625_s8 + $0x1648] sm:$0xff]  ;;  %v1894_v40 = vmul.f32 %v3632_v1, %v869_v37 }
 0x1a8   : > { %2895 = vst [vmem:[%s3648_s20 + $0x1580] sm:$0xff] %v1871_v56  ;;  %2896 = vst [vmem:[%s3648_s20 + $0x1588] sm:$0xff] %v1872_v57  ;;  %v1895_v41 = vmul.f32 %v3632_v1, %v870_v38  ;;  %v1896_v42 = vmul.f32 %v3632_v1, %v871_v39  ;;  %v872_v43 = vld [vmem:[%s3625_s8 + $0x1650] sm:$0xff]  ;;  %v873_v44 = vld [vmem:[%s3625_s8 + $0x1658] sm:$0xff] }
 0x1a9   : > { %2897 = vst [vmem:[%s3648_s20 + $0x1590] sm:$0xff] %v1873_v61  ;;  %2898 = vst [vmem:[%s3648_s20 + $0x1598] sm:$0xff] %v1874_v62  ;;  %v874_v45 = vld [vmem:[%s3625_s8 + $0x1660] sm:$0xff]  ;;  %v1897_v46 = vmul.f32 %v3632_v1, %v872_v43  ;;  %v1898_v47 = vmul.f32 %v3632_v1, %v873_v44  ;;  %v875_v49 = vld [vmem:[%s3625_s8 + $0x1668] sm:$0xff] }
 0x1aa   : > { %2899 = vst [vmem:[%s3648_s20 + $0x15a0] sm:$0xff] %v1875_v63  ;;  %2900 = vst [vmem:[%s3648_s20 + $0x15a8] sm:$0xff] %v1876_v4  ;;  %v1899_v48 = vmul.f32 %v3632_v1, %v874_v45  ;;  %v876_v50 = vld [vmem:[%s3625_s8 + $0x1670] sm:$0xff]  ;;  %v877_v51 = vld [vmem:[%s3625_s8 + $0x1678] sm:$0xff]  ;;  %v1900_v52 = vmul.f32 %v3632_v1, %v875_v49 }
 0x1ab   : > { %2901 = vst [vmem:[%s3648_s20 + $0x15b0] sm:$0xff] %v1877_v5  ;;  %2902 = vst [vmem:[%s3648_s20 + $0x15b8] sm:$0xff] %v1878_v6  ;;  %v1901_v53 = vmul.f32 %v3632_v1, %v876_v50  ;;  %v1902_v54 = vmul.f32 %v3632_v1, %v877_v51  ;;  %v878_v55 = vld [vmem:[%s3625_s8 + $0x1680] sm:$0xff]  ;;  %v879_v56 = vld [vmem:[%s3625_s8 + $0x1688] sm:$0xff] }
 0x1ac   : > { %2903 = vst [vmem:[%s3648_s20 + $0x15c0] sm:$0xff] %v1879_v10  ;;  %2904 = vst [vmem:[%s3648_s20 + $0x15c8] sm:$0xff] %v1880_v11  ;;  %v880_v57 = vld [vmem:[%s3625_s8 + $0x1690] sm:$0xff]  ;;  %v1903_v58 = vmul.f32 %v3632_v1, %v878_v55  ;;  %v1904_v59 = vmul.f32 %v3632_v1, %v879_v56  ;;  %v881_v61 = vld [vmem:[%s3625_s8 + $0x1698] sm:$0xff] }
 0x1ad   : > { %2905 = vst [vmem:[%s3648_s20 + $0x15d0] sm:$0xff] %v1881_v12  ;;  %2906 = vst [vmem:[%s3648_s20 + $0x15d8] sm:$0xff] %v1882_v16  ;;  %v1905_v60 = vmul.f32 %v3632_v1, %v880_v57  ;;  %v882_v62 = vld [vmem:[%s3625_s8 + $0x16a0] sm:$0xff]  ;;  %v883_v63 = vld [vmem:[%s3625_s8 + $0x16a8] sm:$0xff]  ;;  %v1906_v0 = vmul.f32 %v3632_v1, %v881_v61 }
 0x1ae   : > { %2907 = vst [vmem:[%s3648_s20 + $0x15e0] sm:$0xff] %v1883_v17  ;;  %2908 = vst [vmem:[%s3648_s20 + $0x15e8] sm:$0xff] %v1884_v18  ;;  %v1907_v2 = vmul.f32 %v3632_v1, %v882_v62  ;;  %v1908_v3 = vmul.f32 %v3632_v1, %v883_v63  ;;  %v884_v4 = vld [vmem:[%s3625_s8 + $0x16b0] sm:$0xff]  ;;  %v885_v5 = vld [vmem:[%s3625_s8 + $0x16b8] sm:$0xff] }
 0x1af   : > { %2909 = vst [vmem:[%s3648_s20 + $0x15f0] sm:$0xff] %v1885_v22  ;;  %2910 = vst [vmem:[%s3648_s20 + $0x15f8] sm:$0xff] %v1886_v23  ;;  %v886_v6 = vld [vmem:[%s3625_s8 + $0x16c0] sm:$0xff]  ;;  %v1909_v7 = vmul.f32 %v3632_v1, %v884_v4  ;;  %v1910_v8 = vmul.f32 %v3632_v1, %v885_v5  ;;  %v887_v10 = vld [vmem:[%s3625_s8 + $0x16c8] sm:$0xff] }
 0x1b0   : > { %2911 = vst [vmem:[%s3648_s20 + $0x1600] sm:$0xff] %v1887_v24  ;;  %2912 = vst [vmem:[%s3648_s20 + $0x1608] sm:$0xff] %v1888_v28  ;;  %v1911_v9 = vmul.f32 %v3632_v1, %v886_v6  ;;  %v888_v11 = vld [vmem:[%s3625_s8 + $0x16d0] sm:$0xff]  ;;  %v889_v12 = vld [vmem:[%s3625_s8 + $0x16d8] sm:$0xff]  ;;  %v1912_v13 = vmul.f32 %v3632_v1, %v887_v10 }
 0x1b1   : > { %2913 = vst [vmem:[%s3648_s20 + $0x1610] sm:$0xff] %v1889_v29  ;;  %2914 = vst [vmem:[%s3648_s20 + $0x1618] sm:$0xff] %v1890_v30  ;;  %v1913_v14 = vmul.f32 %v3632_v1, %v888_v11  ;;  %v1914_v15 = vmul.f32 %v3632_v1, %v889_v12  ;;  %v890_v16 = vld [vmem:[%s3625_s8 + $0x16e0] sm:$0xff]  ;;  %v891_v17 = vld [vmem:[%s3625_s8 + $0x16e8] sm:$0xff] }
 0x1b2   : > { %2915 = vst [vmem:[%s3648_s20 + $0x1620] sm:$0xff] %v1891_v34  ;;  %2916 = vst [vmem:[%s3648_s20 + $0x1628] sm:$0xff] %v1892_v35  ;;  %v892_v18 = vld [vmem:[%s3625_s8 + $0x16f0] sm:$0xff]  ;;  %v1915_v19 = vmul.f32 %v3632_v1, %v890_v16  ;;  %v1916_v20 = vmul.f32 %v3632_v1, %v891_v17  ;;  %v893_v22 = vld [vmem:[%s3625_s8 + $0x16f8] sm:$0xff] }
 0x1b3   : > { %2917 = vst [vmem:[%s3648_s20 + $0x1630] sm:$0xff] %v1893_v36  ;;  %2918 = vst [vmem:[%s3648_s20 + $0x1638] sm:$0xff] %v1894_v40  ;;  %v1917_v21 = vmul.f32 %v3632_v1, %v892_v18  ;;  %v894_v23 = vld [vmem:[%s3625_s8 + $0x1700] sm:$0xff]  ;;  %v895_v24 = vld [vmem:[%s3625_s8 + $0x1708] sm:$0xff]  ;;  %v1918_v25 = vmul.f32 %v3632_v1, %v893_v22 }
 0x1b4   : > { %2919 = vst [vmem:[%s3648_s20 + $0x1640] sm:$0xff] %v1895_v41  ;;  %2920 = vst [vmem:[%s3648_s20 + $0x1648] sm:$0xff] %v1896_v42  ;;  %v1919_v26 = vmul.f32 %v3632_v1, %v894_v23  ;;  %v1920_v27 = vmul.f32 %v3632_v1, %v895_v24  ;;  %v896_v28 = vld [vmem:[%s3625_s8 + $0x1710] sm:$0xff]  ;;  %v897_v29 = vld [vmem:[%s3625_s8 + $0x1718] sm:$0xff] }
 0x1b5   : > { %2921 = vst [vmem:[%s3648_s20 + $0x1650] sm:$0xff] %v1897_v46  ;;  %2922 = vst [vmem:[%s3648_s20 + $0x1658] sm:$0xff] %v1898_v47  ;;  %v898_v30 = vld [vmem:[%s3625_s8 + $0x1720] sm:$0xff]  ;;  %v1921_v31 = vmul.f32 %v3632_v1, %v896_v28  ;;  %v1922_v32 = vmul.f32 %v3632_v1, %v897_v29  ;;  %v899_v34 = vld [vmem:[%s3625_s8 + $0x1728] sm:$0xff] }
 0x1b6   : > { %2923 = vst [vmem:[%s3648_s20 + $0x1660] sm:$0xff] %v1899_v48  ;;  %2924 = vst [vmem:[%s3648_s20 + $0x1668] sm:$0xff] %v1900_v52  ;;  %v1923_v33 = vmul.f32 %v3632_v1, %v898_v30  ;;  %v900_v35 = vld [vmem:[%s3625_s8 + $0x1730] sm:$0xff]  ;;  %v901_v36 = vld [vmem:[%s3625_s8 + $0x1738] sm:$0xff]  ;;  %v1924_v37 = vmul.f32 %v3632_v1, %v899_v34 }
 0x1b7   : > { %2925 = vst [vmem:[%s3648_s20 + $0x1670] sm:$0xff] %v1901_v53  ;;  %2926 = vst [vmem:[%s3648_s20 + $0x1678] sm:$0xff] %v1902_v54  ;;  %v1925_v38 = vmul.f32 %v3632_v1, %v900_v35  ;;  %v1926_v39 = vmul.f32 %v3632_v1, %v901_v36  ;;  %v902_v40 = vld [vmem:[%s3625_s8 + $0x1740] sm:$0xff]  ;;  %v903_v41 = vld [vmem:[%s3625_s8 + $0x1748] sm:$0xff] }
 0x1b8   : > { %2927 = vst [vmem:[%s3648_s20 + $0x1680] sm:$0xff] %v1903_v58  ;;  %2928 = vst [vmem:[%s3648_s20 + $0x1688] sm:$0xff] %v1904_v59  ;;  %v904_v42 = vld [vmem:[%s3625_s8 + $0x1750] sm:$0xff]  ;;  %v1927_v43 = vmul.f32 %v3632_v1, %v902_v40  ;;  %v1928_v44 = vmul.f32 %v3632_v1, %v903_v41  ;;  %v905_v46 = vld [vmem:[%s3625_s8 + $0x1758] sm:$0xff] }
 0x1b9   : > { %2929 = vst [vmem:[%s3648_s20 + $0x1690] sm:$0xff] %v1905_v60  ;;  %2930 = vst [vmem:[%s3648_s20 + $0x1698] sm:$0xff] %v1906_v0  ;;  %v1929_v45 = vmul.f32 %v3632_v1, %v904_v42  ;;  %v906_v47 = vld [vmem:[%s3625_s8 + $0x1760] sm:$0xff]  ;;  %v907_v48 = vld [vmem:[%s3625_s8 + $0x1768] sm:$0xff]  ;;  %v1930_v49 = vmul.f32 %v3632_v1, %v905_v46 }
 0x1ba   : > { %2931 = vst [vmem:[%s3648_s20 + $0x16a0] sm:$0xff] %v1907_v2  ;;  %2932 = vst [vmem:[%s3648_s20 + $0x16a8] sm:$0xff] %v1908_v3  ;;  %v1931_v50 = vmul.f32 %v3632_v1, %v906_v47  ;;  %v1932_v51 = vmul.f32 %v3632_v1, %v907_v48  ;;  %v908_v52 = vld [vmem:[%s3625_s8 + $0x1770] sm:$0xff]  ;;  %v909_v53 = vld [vmem:[%s3625_s8 + $0x1778] sm:$0xff] }
 0x1bb   : > { %2933 = vst [vmem:[%s3648_s20 + $0x16b0] sm:$0xff] %v1909_v7  ;;  %2934 = vst [vmem:[%s3648_s20 + $0x16b8] sm:$0xff] %v1910_v8  ;;  %v910_v54 = vld [vmem:[%s3625_s8 + $0x1780] sm:$0xff]  ;;  %v1933_v55 = vmul.f32 %v3632_v1, %v908_v52  ;;  %v1934_v56 = vmul.f32 %v3632_v1, %v909_v53  ;;  %v911_v58 = vld [vmem:[%s3625_s8 + $0x1788] sm:$0xff] }
 0x1bc   : > { %2935 = vst [vmem:[%s3648_s20 + $0x16c0] sm:$0xff] %v1911_v9  ;;  %2936 = vst [vmem:[%s3648_s20 + $0x16c8] sm:$0xff] %v1912_v13  ;;  %v1935_v57 = vmul.f32 %v3632_v1, %v910_v54  ;;  %v912_v59 = vld [vmem:[%s3625_s8 + $0x1790] sm:$0xff]  ;;  %v913_v60 = vld [vmem:[%s3625_s8 + $0x1798] sm:$0xff]  ;;  %v1936_v61 = vmul.f32 %v3632_v1, %v911_v58 }
 0x1bd   : > { %2937 = vst [vmem:[%s3648_s20 + $0x16d0] sm:$0xff] %v1913_v14  ;;  %2938 = vst [vmem:[%s3648_s20 + $0x16d8] sm:$0xff] %v1914_v15  ;;  %v1937_v62 = vmul.f32 %v3632_v1, %v912_v59  ;;  %v1938_v63 = vmul.f32 %v3632_v1, %v913_v60  ;;  %v914_v0 = vld [vmem:[%s3625_s8 + $0x17a0] sm:$0xff]  ;;  %v915_v2 = vld [vmem:[%s3625_s8 + $0x17a8] sm:$0xff] }
 0x1be   : > { %2939 = vst [vmem:[%s3648_s20 + $0x16e0] sm:$0xff] %v1915_v19  ;;  %2940 = vst [vmem:[%s3648_s20 + $0x16e8] sm:$0xff] %v1916_v20  ;;  %v916_v3 = vld [vmem:[%s3625_s8 + $0x17b0] sm:$0xff]  ;;  %v1939_v4 = vmul.f32 %v3632_v1, %v914_v0  ;;  %v1940_v5 = vmul.f32 %v3632_v1, %v915_v2  ;;  %v917_v7 = vld [vmem:[%s3625_s8 + $0x17b8] sm:$0xff] }
 0x1bf   : > { %2941 = vst [vmem:[%s3648_s20 + $0x16f0] sm:$0xff] %v1917_v21  ;;  %2942 = vst [vmem:[%s3648_s20 + $0x16f8] sm:$0xff] %v1918_v25  ;;  %v1941_v6 = vmul.f32 %v3632_v1, %v916_v3  ;;  %v918_v8 = vld [vmem:[%s3625_s8 + $0x17c0] sm:$0xff]  ;;  %v919_v9 = vld [vmem:[%s3625_s8 + $0x17c8] sm:$0xff]  ;;  %v1942_v10 = vmul.f32 %v3632_v1, %v917_v7 }
 0x1c0   : > { %2943 = vst [vmem:[%s3648_s20 + $0x1700] sm:$0xff] %v1919_v26  ;;  %2944 = vst [vmem:[%s3648_s20 + $0x1708] sm:$0xff] %v1920_v27  ;;  %v1943_v11 = vmul.f32 %v3632_v1, %v918_v8  ;;  %v1944_v12 = vmul.f32 %v3632_v1, %v919_v9  ;;  %v920_v13 = vld [vmem:[%s3625_s8 + $0x17d0] sm:$0xff]  ;;  %v921_v14 = vld [vmem:[%s3625_s8 + $0x17d8] sm:$0xff] }
 0x1c1   : > { %2945 = vst [vmem:[%s3648_s20 + $0x1710] sm:$0xff] %v1921_v31  ;;  %2946 = vst [vmem:[%s3648_s20 + $0x1718] sm:$0xff] %v1922_v32  ;;  %v922_v15 = vld [vmem:[%s3625_s8 + $0x17e0] sm:$0xff]  ;;  %v1945_v16 = vmul.f32 %v3632_v1, %v920_v13  ;;  %v1946_v17 = vmul.f32 %v3632_v1, %v921_v14  ;;  %v923_v19 = vld [vmem:[%s3625_s8 + $0x17e8] sm:$0xff] }
 0x1c2   : > { %2947 = vst [vmem:[%s3648_s20 + $0x1720] sm:$0xff] %v1923_v33  ;;  %2948 = vst [vmem:[%s3648_s20 + $0x1728] sm:$0xff] %v1924_v37  ;;  %v1947_v18 = vmul.f32 %v3632_v1, %v922_v15  ;;  %v924_v20 = vld [vmem:[%s3625_s8 + $0x17f0] sm:$0xff]  ;;  %v925_v21 = vld [vmem:[%s3625_s8 + $0x17f8] sm:$0xff]  ;;  %v1948_v22 = vmul.f32 %v3632_v1, %v923_v19 }
 0x1c3   : > { %2949 = vst [vmem:[%s3648_s20 + $0x1730] sm:$0xff] %v1925_v38  ;;  %2950 = vst [vmem:[%s3648_s20 + $0x1738] sm:$0xff] %v1926_v39  ;;  %v1949_v23 = vmul.f32 %v3632_v1, %v924_v20  ;;  %v1950_v24 = vmul.f32 %v3632_v1, %v925_v21  ;;  %v926_v25 = vld [vmem:[%s3625_s8 + $0x1800] sm:$0xff]  ;;  %v927_v26 = vld [vmem:[%s3625_s8 + $0x1808] sm:$0xff] }
 0x1c4   : > { %2951 = vst [vmem:[%s3648_s20 + $0x1740] sm:$0xff] %v1927_v43  ;;  %2952 = vst [vmem:[%s3648_s20 + $0x1748] sm:$0xff] %v1928_v44  ;;  %v928_v27 = vld [vmem:[%s3625_s8 + $0x1810] sm:$0xff]  ;;  %v1951_v28 = vmul.f32 %v3632_v1, %v926_v25  ;;  %v1952_v29 = vmul.f32 %v3632_v1, %v927_v26  ;;  %v929_v31 = vld [vmem:[%s3625_s8 + $0x1818] sm:$0xff] }
 0x1c5   : > { %2953 = vst [vmem:[%s3648_s20 + $0x1750] sm:$0xff] %v1929_v45  ;;  %2954 = vst [vmem:[%s3648_s20 + $0x1758] sm:$0xff] %v1930_v49  ;;  %v1953_v30 = vmul.f32 %v3632_v1, %v928_v27  ;;  %v930_v32 = vld [vmem:[%s3625_s8 + $0x1820] sm:$0xff]  ;;  %v931_v33 = vld [vmem:[%s3625_s8 + $0x1828] sm:$0xff]  ;;  %v1954_v34 = vmul.f32 %v3632_v1, %v929_v31 }
 0x1c6   : > { %2955 = vst [vmem:[%s3648_s20 + $0x1760] sm:$0xff] %v1931_v50  ;;  %2956 = vst [vmem:[%s3648_s20 + $0x1768] sm:$0xff] %v1932_v51  ;;  %v1955_v35 = vmul.f32 %v3632_v1, %v930_v32  ;;  %v1956_v36 = vmul.f32 %v3632_v1, %v931_v33  ;;  %v932_v37 = vld [vmem:[%s3625_s8 + $0x1830] sm:$0xff]  ;;  %v933_v38 = vld [vmem:[%s3625_s8 + $0x1838] sm:$0xff] }
 0x1c7   : > { %2957 = vst [vmem:[%s3648_s20 + $0x1770] sm:$0xff] %v1933_v55  ;;  %2958 = vst [vmem:[%s3648_s20 + $0x1778] sm:$0xff] %v1934_v56  ;;  %v934_v39 = vld [vmem:[%s3625_s8 + $0x1840] sm:$0xff]  ;;  %v1957_v40 = vmul.f32 %v3632_v1, %v932_v37  ;;  %v1958_v41 = vmul.f32 %v3632_v1, %v933_v38  ;;  %v935_v43 = vld [vmem:[%s3625_s8 + $0x1848] sm:$0xff] }
 0x1c8   : > { %2959 = vst [vmem:[%s3648_s20 + $0x1780] sm:$0xff] %v1935_v57  ;;  %2960 = vst [vmem:[%s3648_s20 + $0x1788] sm:$0xff] %v1936_v61  ;;  %v1959_v42 = vmul.f32 %v3632_v1, %v934_v39  ;;  %v936_v44 = vld [vmem:[%s3625_s8 + $0x1850] sm:$0xff]  ;;  %v937_v45 = vld [vmem:[%s3625_s8 + $0x1858] sm:$0xff]  ;;  %v1960_v46 = vmul.f32 %v3632_v1, %v935_v43 }
 0x1c9   : > { %2961 = vst [vmem:[%s3648_s20 + $0x1790] sm:$0xff] %v1937_v62  ;;  %2962 = vst [vmem:[%s3648_s20 + $0x1798] sm:$0xff] %v1938_v63  ;;  %v1961_v47 = vmul.f32 %v3632_v1, %v936_v44  ;;  %v1962_v48 = vmul.f32 %v3632_v1, %v937_v45  ;;  %v938_v49 = vld [vmem:[%s3625_s8 + $0x1860] sm:$0xff]  ;;  %v939_v50 = vld [vmem:[%s3625_s8 + $0x1868] sm:$0xff] }
 0x1ca   : > { %2963 = vst [vmem:[%s3648_s20 + $0x17a0] sm:$0xff] %v1939_v4  ;;  %2964 = vst [vmem:[%s3648_s20 + $0x17a8] sm:$0xff] %v1940_v5  ;;  %v940_v51 = vld [vmem:[%s3625_s8 + $0x1870] sm:$0xff]  ;;  %v1963_v52 = vmul.f32 %v3632_v1, %v938_v49  ;;  %v1964_v53 = vmul.f32 %v3632_v1, %v939_v50  ;;  %v941_v55 = vld [vmem:[%s3625_s8 + $0x1878] sm:$0xff] }
 0x1cb   : > { %2965 = vst [vmem:[%s3648_s20 + $0x17b0] sm:$0xff] %v1941_v6  ;;  %2966 = vst [vmem:[%s3648_s20 + $0x17b8] sm:$0xff] %v1942_v10  ;;  %v1965_v54 = vmul.f32 %v3632_v1, %v940_v51  ;;  %v942_v56 = vld [vmem:[%s3625_s8 + $0x1880] sm:$0xff]  ;;  %v943_v57 = vld [vmem:[%s3625_s8 + $0x1888] sm:$0xff]  ;;  %v1966_v58 = vmul.f32 %v3632_v1, %v941_v55 }
 0x1cc   : > { %2967 = vst [vmem:[%s3648_s20 + $0x17c0] sm:$0xff] %v1943_v11  ;;  %2968 = vst [vmem:[%s3648_s20 + $0x17c8] sm:$0xff] %v1944_v12  ;;  %v1967_v59 = vmul.f32 %v3632_v1, %v942_v56  ;;  %v1968_v60 = vmul.f32 %v3632_v1, %v943_v57  ;;  %v944_v61 = vld [vmem:[%s3625_s8 + $0x1890] sm:$0xff]  ;;  %v945_v62 = vld [vmem:[%s3625_s8 + $0x1898] sm:$0xff] }
 0x1cd   : > { %2969 = vst [vmem:[%s3648_s20 + $0x17d0] sm:$0xff] %v1945_v16  ;;  %2970 = vst [vmem:[%s3648_s20 + $0x17d8] sm:$0xff] %v1946_v17  ;;  %v946_v63 = vld [vmem:[%s3625_s8 + $0x18a0] sm:$0xff]  ;;  %v1969_v0 = vmul.f32 %v3632_v1, %v944_v61  ;;  %v1970_v2 = vmul.f32 %v3632_v1, %v945_v62  ;;  %v947_v4 = vld [vmem:[%s3625_s8 + $0x18a8] sm:$0xff] }
 0x1ce   : > { %2971 = vst [vmem:[%s3648_s20 + $0x17e0] sm:$0xff] %v1947_v18  ;;  %2972 = vst [vmem:[%s3648_s20 + $0x17e8] sm:$0xff] %v1948_v22  ;;  %v1971_v3 = vmul.f32 %v3632_v1, %v946_v63  ;;  %v948_v5 = vld [vmem:[%s3625_s8 + $0x18b0] sm:$0xff]  ;;  %v949_v6 = vld [vmem:[%s3625_s8 + $0x18b8] sm:$0xff]  ;;  %v1972_v7 = vmul.f32 %v3632_v1, %v947_v4 }
 0x1cf   : > { %2973 = vst [vmem:[%s3648_s20 + $0x17f0] sm:$0xff] %v1949_v23  ;;  %2974 = vst [vmem:[%s3648_s20 + $0x17f8] sm:$0xff] %v1950_v24  ;;  %v1973_v8 = vmul.f32 %v3632_v1, %v948_v5  ;;  %v1974_v9 = vmul.f32 %v3632_v1, %v949_v6  ;;  %v950_v10 = vld [vmem:[%s3625_s8 + $0x18c0] sm:$0xff]  ;;  %v951_v11 = vld [vmem:[%s3625_s8 + $0x18c8] sm:$0xff] }
 0x1d0   : > { %2975 = vst [vmem:[%s3648_s20 + $0x1800] sm:$0xff] %v1951_v28  ;;  %2976 = vst [vmem:[%s3648_s20 + $0x1808] sm:$0xff] %v1952_v29  ;;  %v952_v12 = vld [vmem:[%s3625_s8 + $0x18d0] sm:$0xff]  ;;  %v1975_v13 = vmul.f32 %v3632_v1, %v950_v10  ;;  %v1976_v14 = vmul.f32 %v3632_v1, %v951_v11  ;;  %v953_v16 = vld [vmem:[%s3625_s8 + $0x18d8] sm:$0xff] }
 0x1d1   : > { %2977 = vst [vmem:[%s3648_s20 + $0x1810] sm:$0xff] %v1953_v30  ;;  %2978 = vst [vmem:[%s3648_s20 + $0x1818] sm:$0xff] %v1954_v34  ;;  %v1977_v15 = vmul.f32 %v3632_v1, %v952_v12  ;;  %v954_v17 = vld [vmem:[%s3625_s8 + $0x18e0] sm:$0xff]  ;;  %v955_v18 = vld [vmem:[%s3625_s8 + $0x18e8] sm:$0xff]  ;;  %v1978_v19 = vmul.f32 %v3632_v1, %v953_v16 }
 0x1d2   : > { %2979 = vst [vmem:[%s3648_s20 + $0x1820] sm:$0xff] %v1955_v35  ;;  %2980 = vst [vmem:[%s3648_s20 + $0x1828] sm:$0xff] %v1956_v36  ;;  %v1979_v20 = vmul.f32 %v3632_v1, %v954_v17  ;;  %v1980_v21 = vmul.f32 %v3632_v1, %v955_v18  ;;  %v956_v22 = vld [vmem:[%s3625_s8 + $0x18f0] sm:$0xff]  ;;  %v957_v23 = vld [vmem:[%s3625_s8 + $0x18f8] sm:$0xff] }
 0x1d3   : > { %2981 = vst [vmem:[%s3648_s20 + $0x1830] sm:$0xff] %v1957_v40  ;;  %2982 = vst [vmem:[%s3648_s20 + $0x1838] sm:$0xff] %v1958_v41  ;;  %v958_v24 = vld [vmem:[%s3625_s8 + $0x1900] sm:$0xff]  ;;  %v1981_v25 = vmul.f32 %v3632_v1, %v956_v22  ;;  %v1982_v26 = vmul.f32 %v3632_v1, %v957_v23  ;;  %v959_v28 = vld [vmem:[%s3625_s8 + $0x1908] sm:$0xff] }
 0x1d4   : > { %2983 = vst [vmem:[%s3648_s20 + $0x1840] sm:$0xff] %v1959_v42  ;;  %2984 = vst [vmem:[%s3648_s20 + $0x1848] sm:$0xff] %v1960_v46  ;;  %v1983_v27 = vmul.f32 %v3632_v1, %v958_v24  ;;  %v960_v29 = vld [vmem:[%s3625_s8 + $0x1910] sm:$0xff]  ;;  %v961_v30 = vld [vmem:[%s3625_s8 + $0x1918] sm:$0xff]  ;;  %v1984_v31 = vmul.f32 %v3632_v1, %v959_v28 }
 0x1d5   : > { %2985 = vst [vmem:[%s3648_s20 + $0x1850] sm:$0xff] %v1961_v47  ;;  %2986 = vst [vmem:[%s3648_s20 + $0x1858] sm:$0xff] %v1962_v48  ;;  %v1985_v32 = vmul.f32 %v3632_v1, %v960_v29  ;;  %v1986_v33 = vmul.f32 %v3632_v1, %v961_v30  ;;  %v962_v34 = vld [vmem:[%s3625_s8 + $0x1920] sm:$0xff]  ;;  %v963_v35 = vld [vmem:[%s3625_s8 + $0x1928] sm:$0xff] }
 0x1d6   : > { %2987 = vst [vmem:[%s3648_s20 + $0x1860] sm:$0xff] %v1963_v52  ;;  %2988 = vst [vmem:[%s3648_s20 + $0x1868] sm:$0xff] %v1964_v53  ;;  %v964_v36 = vld [vmem:[%s3625_s8 + $0x1930] sm:$0xff]  ;;  %v1987_v37 = vmul.f32 %v3632_v1, %v962_v34  ;;  %v1988_v38 = vmul.f32 %v3632_v1, %v963_v35  ;;  %v965_v40 = vld [vmem:[%s3625_s8 + $0x1938] sm:$0xff] }
 0x1d7   : > { %2989 = vst [vmem:[%s3648_s20 + $0x1870] sm:$0xff] %v1965_v54  ;;  %2990 = vst [vmem:[%s3648_s20 + $0x1878] sm:$0xff] %v1966_v58  ;;  %v1989_v39 = vmul.f32 %v3632_v1, %v964_v36  ;;  %v966_v41 = vld [vmem:[%s3625_s8 + $0x1940] sm:$0xff]  ;;  %v967_v42 = vld [vmem:[%s3625_s8 + $0x1948] sm:$0xff]  ;;  %v1990_v43 = vmul.f32 %v3632_v1, %v965_v40 }
 0x1d8   : > { %2991 = vst [vmem:[%s3648_s20 + $0x1880] sm:$0xff] %v1967_v59  ;;  %2992 = vst [vmem:[%s3648_s20 + $0x1888] sm:$0xff] %v1968_v60  ;;  %v1991_v44 = vmul.f32 %v3632_v1, %v966_v41  ;;  %v1992_v45 = vmul.f32 %v3632_v1, %v967_v42  ;;  %v968_v46 = vld [vmem:[%s3625_s8 + $0x1950] sm:$0xff]  ;;  %v969_v47 = vld [vmem:[%s3625_s8 + $0x1958] sm:$0xff] }
 0x1d9   : > { %2993 = vst [vmem:[%s3648_s20 + $0x1890] sm:$0xff] %v1969_v0  ;;  %2994 = vst [vmem:[%s3648_s20 + $0x1898] sm:$0xff] %v1970_v2  ;;  %v970_v48 = vld [vmem:[%s3625_s8 + $0x1960] sm:$0xff]  ;;  %v1993_v49 = vmul.f32 %v3632_v1, %v968_v46  ;;  %v1994_v50 = vmul.f32 %v3632_v1, %v969_v47  ;;  %v971_v52 = vld [vmem:[%s3625_s8 + $0x1968] sm:$0xff] }
 0x1da   : > { %2995 = vst [vmem:[%s3648_s20 + $0x18a0] sm:$0xff] %v1971_v3  ;;  %2996 = vst [vmem:[%s3648_s20 + $0x18a8] sm:$0xff] %v1972_v7  ;;  %v1995_v51 = vmul.f32 %v3632_v1, %v970_v48  ;;  %v972_v53 = vld [vmem:[%s3625_s8 + $0x1970] sm:$0xff]  ;;  %v973_v54 = vld [vmem:[%s3625_s8 + $0x1978] sm:$0xff]  ;;  %v1996_v55 = vmul.f32 %v3632_v1, %v971_v52 }
 0x1db   : > { %2997 = vst [vmem:[%s3648_s20 + $0x18b0] sm:$0xff] %v1973_v8  ;;  %2998 = vst [vmem:[%s3648_s20 + $0x18b8] sm:$0xff] %v1974_v9  ;;  %v1997_v56 = vmul.f32 %v3632_v1, %v972_v53  ;;  %v1998_v57 = vmul.f32 %v3632_v1, %v973_v54  ;;  %v974_v58 = vld [vmem:[%s3625_s8 + $0x1980] sm:$0xff]  ;;  %v975_v59 = vld [vmem:[%s3625_s8 + $0x1988] sm:$0xff] }
 0x1dc   : > { %2999 = vst [vmem:[%s3648_s20 + $0x18c0] sm:$0xff] %v1975_v13  ;;  %3000 = vst [vmem:[%s3648_s20 + $0x18c8] sm:$0xff] %v1976_v14  ;;  %v976_v60 = vld [vmem:[%s3625_s8 + $0x1990] sm:$0xff]  ;;  %v1999_v61 = vmul.f32 %v3632_v1, %v974_v58  ;;  %v2000_v62 = vmul.f32 %v3632_v1, %v975_v59  ;;  %v977_v0 = vld [vmem:[%s3625_s8 + $0x1998] sm:$0xff] }
 0x1dd   : > { %3001 = vst [vmem:[%s3648_s20 + $0x18d0] sm:$0xff] %v1977_v15  ;;  %3002 = vst [vmem:[%s3648_s20 + $0x18d8] sm:$0xff] %v1978_v19  ;;  %v2001_v63 = vmul.f32 %v3632_v1, %v976_v60  ;;  %v978_v2 = vld [vmem:[%s3625_s8 + $0x19a0] sm:$0xff]  ;;  %v979_v3 = vld [vmem:[%s3625_s8 + $0x19a8] sm:$0xff]  ;;  %v2002_v4 = vmul.f32 %v3632_v1, %v977_v0 }
 0x1de   : > { %3003 = vst [vmem:[%s3648_s20 + $0x18e0] sm:$0xff] %v1979_v20  ;;  %3004 = vst [vmem:[%s3648_s20 + $0x18e8] sm:$0xff] %v1980_v21  ;;  %v2003_v5 = vmul.f32 %v3632_v1, %v978_v2  ;;  %v2004_v6 = vmul.f32 %v3632_v1, %v979_v3  ;;  %v980_v7 = vld [vmem:[%s3625_s8 + $0x19b0] sm:$0xff]  ;;  %v981_v8 = vld [vmem:[%s3625_s8 + $0x19b8] sm:$0xff] }
 0x1df   : > { %3005 = vst [vmem:[%s3648_s20 + $0x18f0] sm:$0xff] %v1981_v25  ;;  %3006 = vst [vmem:[%s3648_s20 + $0x18f8] sm:$0xff] %v1982_v26  ;;  %v982_v9 = vld [vmem:[%s3625_s8 + $0x19c0] sm:$0xff]  ;;  %v2005_v10 = vmul.f32 %v3632_v1, %v980_v7  ;;  %v2006_v11 = vmul.f32 %v3632_v1, %v981_v8  ;;  %v983_v13 = vld [vmem:[%s3625_s8 + $0x19c8] sm:$0xff] }
 0x1e0   : > { %3007 = vst [vmem:[%s3648_s20 + $0x1900] sm:$0xff] %v1983_v27  ;;  %3008 = vst [vmem:[%s3648_s20 + $0x1908] sm:$0xff] %v1984_v31  ;;  %v2007_v12 = vmul.f32 %v3632_v1, %v982_v9  ;;  %v984_v14 = vld [vmem:[%s3625_s8 + $0x19d0] sm:$0xff]  ;;  %v985_v15 = vld [vmem:[%s3625_s8 + $0x19d8] sm:$0xff]  ;;  %v2008_v16 = vmul.f32 %v3632_v1, %v983_v13 }
 0x1e1   : > { %3009 = vst [vmem:[%s3648_s20 + $0x1910] sm:$0xff] %v1985_v32  ;;  %3010 = vst [vmem:[%s3648_s20 + $0x1918] sm:$0xff] %v1986_v33  ;;  %v2009_v17 = vmul.f32 %v3632_v1, %v984_v14  ;;  %v2010_v18 = vmul.f32 %v3632_v1, %v985_v15  ;;  %v986_v19 = vld [vmem:[%s3625_s8 + $0x19e0] sm:$0xff]  ;;  %v987_v20 = vld [vmem:[%s3625_s8 + $0x19e8] sm:$0xff] }
 0x1e2   : > { %3011 = vst [vmem:[%s3648_s20 + $0x1920] sm:$0xff] %v1987_v37  ;;  %3012 = vst [vmem:[%s3648_s20 + $0x1928] sm:$0xff] %v1988_v38  ;;  %v988_v21 = vld [vmem:[%s3625_s8 + $0x19f0] sm:$0xff]  ;;  %v2011_v22 = vmul.f32 %v3632_v1, %v986_v19  ;;  %v2012_v23 = vmul.f32 %v3632_v1, %v987_v20  ;;  %v989_v25 = vld [vmem:[%s3625_s8 + $0x19f8] sm:$0xff] }
 0x1e3   : > { %3013 = vst [vmem:[%s3648_s20 + $0x1930] sm:$0xff] %v1989_v39  ;;  %3014 = vst [vmem:[%s3648_s20 + $0x1938] sm:$0xff] %v1990_v43  ;;  %v2013_v24 = vmul.f32 %v3632_v1, %v988_v21  ;;  %v990_v26 = vld [vmem:[%s3625_s8 + $0x1a00] sm:$0xff]  ;;  %v991_v27 = vld [vmem:[%s3625_s8 + $0x1a08] sm:$0xff]  ;;  %v2014_v28 = vmul.f32 %v3632_v1, %v989_v25 }
 0x1e4   : > { %3015 = vst [vmem:[%s3648_s20 + $0x1940] sm:$0xff] %v1991_v44  ;;  %3016 = vst [vmem:[%s3648_s20 + $0x1948] sm:$0xff] %v1992_v45  ;;  %v2015_v29 = vmul.f32 %v3632_v1, %v990_v26  ;;  %v2016_v30 = vmul.f32 %v3632_v1, %v991_v27  ;;  %v992_v31 = vld [vmem:[%s3625_s8 + $0x1a10] sm:$0xff]  ;;  %v993_v32 = vld [vmem:[%s3625_s8 + $0x1a18] sm:$0xff] }
 0x1e5   : > { %3017 = vst [vmem:[%s3648_s20 + $0x1950] sm:$0xff] %v1993_v49  ;;  %3018 = vst [vmem:[%s3648_s20 + $0x1958] sm:$0xff] %v1994_v50  ;;  %v994_v33 = vld [vmem:[%s3625_s8 + $0x1a20] sm:$0xff]  ;;  %v2017_v34 = vmul.f32 %v3632_v1, %v992_v31  ;;  %v2018_v35 = vmul.f32 %v3632_v1, %v993_v32  ;;  %v995_v37 = vld [vmem:[%s3625_s8 + $0x1a28] sm:$0xff] }
 0x1e6   : > { %3019 = vst [vmem:[%s3648_s20 + $0x1960] sm:$0xff] %v1995_v51  ;;  %3020 = vst [vmem:[%s3648_s20 + $0x1968] sm:$0xff] %v1996_v55  ;;  %v2019_v36 = vmul.f32 %v3632_v1, %v994_v33  ;;  %v996_v38 = vld [vmem:[%s3625_s8 + $0x1a30] sm:$0xff]  ;;  %v997_v39 = vld [vmem:[%s3625_s8 + $0x1a38] sm:$0xff]  ;;  %v2020_v40 = vmul.f32 %v3632_v1, %v995_v37 }
 0x1e7   : > { %3021 = vst [vmem:[%s3648_s20 + $0x1970] sm:$0xff] %v1997_v56  ;;  %3022 = vst [vmem:[%s3648_s20 + $0x1978] sm:$0xff] %v1998_v57  ;;  %v2021_v41 = vmul.f32 %v3632_v1, %v996_v38  ;;  %v2022_v42 = vmul.f32 %v3632_v1, %v997_v39  ;;  %v998_v43 = vld [vmem:[%s3625_s8 + $0x1a40] sm:$0xff]  ;;  %v999_v44 = vld [vmem:[%s3625_s8 + $0x1a48] sm:$0xff] }
 0x1e8   : > { %3023 = vst [vmem:[%s3648_s20 + $0x1980] sm:$0xff] %v1999_v61  ;;  %3024 = vst [vmem:[%s3648_s20 + $0x1988] sm:$0xff] %v2000_v62  ;;  %v1000_v45 = vld [vmem:[%s3625_s8 + $0x1a50] sm:$0xff]  ;;  %v2023_v46 = vmul.f32 %v3632_v1, %v998_v43  ;;  %v2024_v47 = vmul.f32 %v3632_v1, %v999_v44  ;;  %v1001_v49 = vld [vmem:[%s3625_s8 + $0x1a58] sm:$0xff] }
 0x1e9   : > { %3025 = vst [vmem:[%s3648_s20 + $0x1990] sm:$0xff] %v2001_v63  ;;  %3026 = vst [vmem:[%s3648_s20 + $0x1998] sm:$0xff] %v2002_v4  ;;  %v2025_v48 = vmul.f32 %v3632_v1, %v1000_v45  ;;  %v1002_v50 = vld [vmem:[%s3625_s8 + $0x1a60] sm:$0xff]  ;;  %v1003_v51 = vld [vmem:[%s3625_s8 + $0x1a68] sm:$0xff]  ;;  %v2026_v52 = vmul.f32 %v3632_v1, %v1001_v49 }
 0x1ea   : > { %3027 = vst [vmem:[%s3648_s20 + $0x19a0] sm:$0xff] %v2003_v5  ;;  %3028 = vst [vmem:[%s3648_s20 + $0x19a8] sm:$0xff] %v2004_v6  ;;  %v2027_v53 = vmul.f32 %v3632_v1, %v1002_v50  ;;  %v2028_v54 = vmul.f32 %v3632_v1, %v1003_v51  ;;  %v1004_v55 = vld [vmem:[%s3625_s8 + $0x1a70] sm:$0xff]  ;;  %v1005_v56 = vld [vmem:[%s3625_s8 + $0x1a78] sm:$0xff] }
 0x1eb   : > { %3029 = vst [vmem:[%s3648_s20 + $0x19b0] sm:$0xff] %v2005_v10  ;;  %3030 = vst [vmem:[%s3648_s20 + $0x19b8] sm:$0xff] %v2006_v11  ;;  %v1006_v57 = vld [vmem:[%s3625_s8 + $0x1a80] sm:$0xff]  ;;  %v2029_v58 = vmul.f32 %v3632_v1, %v1004_v55  ;;  %v2030_v59 = vmul.f32 %v3632_v1, %v1005_v56  ;;  %v1007_v61 = vld [vmem:[%s3625_s8 + $0x1a88] sm:$0xff] }
 0x1ec   : > { %3031 = vst [vmem:[%s3648_s20 + $0x19c0] sm:$0xff] %v2007_v12  ;;  %3032 = vst [vmem:[%s3648_s20 + $0x19c8] sm:$0xff] %v2008_v16  ;;  %v2031_v60 = vmul.f32 %v3632_v1, %v1006_v57  ;;  %v1008_v62 = vld [vmem:[%s3625_s8 + $0x1a90] sm:$0xff]  ;;  %v1009_v63 = vld [vmem:[%s3625_s8 + $0x1a98] sm:$0xff]  ;;  %v2032_v0 = vmul.f32 %v3632_v1, %v1007_v61 }
 0x1ed   : > { %3033 = vst [vmem:[%s3648_s20 + $0x19d0] sm:$0xff] %v2009_v17  ;;  %3034 = vst [vmem:[%s3648_s20 + $0x19d8] sm:$0xff] %v2010_v18  ;;  %v2033_v2 = vmul.f32 %v3632_v1, %v1008_v62  ;;  %v2034_v3 = vmul.f32 %v3632_v1, %v1009_v63  ;;  %v1010_v4 = vld [vmem:[%s3625_s8 + $0x1aa0] sm:$0xff]  ;;  %v1011_v5 = vld [vmem:[%s3625_s8 + $0x1aa8] sm:$0xff] }
 0x1ee   : > { %3035 = vst [vmem:[%s3648_s20 + $0x19e0] sm:$0xff] %v2011_v22  ;;  %3036 = vst [vmem:[%s3648_s20 + $0x19e8] sm:$0xff] %v2012_v23  ;;  %v1012_v6 = vld [vmem:[%s3625_s8 + $0x1ab0] sm:$0xff]  ;;  %v2035_v7 = vmul.f32 %v3632_v1, %v1010_v4  ;;  %v2036_v8 = vmul.f32 %v3632_v1, %v1011_v5  ;;  %v1013_v10 = vld [vmem:[%s3625_s8 + $0x1ab8] sm:$0xff] }
 0x1ef   : > { %3037 = vst [vmem:[%s3648_s20 + $0x19f0] sm:$0xff] %v2013_v24  ;;  %3038 = vst [vmem:[%s3648_s20 + $0x19f8] sm:$0xff] %v2014_v28  ;;  %v2037_v9 = vmul.f32 %v3632_v1, %v1012_v6  ;;  %v1014_v11 = vld [vmem:[%s3625_s8 + $0x1ac0] sm:$0xff]  ;;  %v1015_v12 = vld [vmem:[%s3625_s8 + $0x1ac8] sm:$0xff]  ;;  %v2038_v13 = vmul.f32 %v3632_v1, %v1013_v10 }
 0x1f0   : > { %3039 = vst [vmem:[%s3648_s20 + $0x1a00] sm:$0xff] %v2015_v29  ;;  %3040 = vst [vmem:[%s3648_s20 + $0x1a08] sm:$0xff] %v2016_v30  ;;  %v2039_v14 = vmul.f32 %v3632_v1, %v1014_v11  ;;  %v2040_v15 = vmul.f32 %v3632_v1, %v1015_v12  ;;  %v1016_v16 = vld [vmem:[%s3625_s8 + $0x1ad0] sm:$0xff]  ;;  %v1017_v17 = vld [vmem:[%s3625_s8 + $0x1ad8] sm:$0xff] }
 0x1f1   : > { %3041 = vst [vmem:[%s3648_s20 + $0x1a10] sm:$0xff] %v2017_v34  ;;  %3042 = vst [vmem:[%s3648_s20 + $0x1a18] sm:$0xff] %v2018_v35  ;;  %v1018_v18 = vld [vmem:[%s3625_s8 + $0x1ae0] sm:$0xff]  ;;  %v2041_v19 = vmul.f32 %v3632_v1, %v1016_v16  ;;  %v2042_v20 = vmul.f32 %v3632_v1, %v1017_v17  ;;  %v1019_v22 = vld [vmem:[%s3625_s8 + $0x1ae8] sm:$0xff] }
 0x1f2   : > { %3043 = vst [vmem:[%s3648_s20 + $0x1a20] sm:$0xff] %v2019_v36  ;;  %3044 = vst [vmem:[%s3648_s20 + $0x1a28] sm:$0xff] %v2020_v40  ;;  %v2043_v21 = vmul.f32 %v3632_v1, %v1018_v18  ;;  %v1020_v23 = vld [vmem:[%s3625_s8 + $0x1af0] sm:$0xff]  ;;  %v1021_v24 = vld [vmem:[%s3625_s8 + $0x1af8] sm:$0xff]  ;;  %v2044_v25 = vmul.f32 %v3632_v1, %v1019_v22 }
 0x1f3   : > { %3045 = vst [vmem:[%s3648_s20 + $0x1a30] sm:$0xff] %v2021_v41  ;;  %3046 = vst [vmem:[%s3648_s20 + $0x1a38] sm:$0xff] %v2022_v42  ;;  %v2045_v26 = vmul.f32 %v3632_v1, %v1020_v23  ;;  %v2046_v27 = vmul.f32 %v3632_v1, %v1021_v24  ;;  %v1022_v28 = vld [vmem:[%s3625_s8 + $0x1b00] sm:$0xff]  ;;  %v1023_v29 = vld [vmem:[%s3625_s8 + $0x1b08] sm:$0xff] }
 0x1f4   : > { %3047 = vst [vmem:[%s3648_s20 + $0x1a40] sm:$0xff] %v2023_v46  ;;  %3048 = vst [vmem:[%s3648_s20 + $0x1a48] sm:$0xff] %v2024_v47  ;;  %v1024_v30 = vld [vmem:[%s3625_s8 + $0x1b10] sm:$0xff]  ;;  %v2047_v31 = vmul.f32 %v3632_v1, %v1022_v28  ;;  %v2048_v32 = vmul.f32 %v3632_v1, %v1023_v29  ;;  %v1025_v34 = vld [vmem:[%s3625_s8 + $0x1b18] sm:$0xff] }
 0x1f5   : > { %3049 = vst [vmem:[%s3648_s20 + $0x1a50] sm:$0xff] %v2025_v48  ;;  %3050 = vst [vmem:[%s3648_s20 + $0x1a58] sm:$0xff] %v2026_v52  ;;  %v2049_v33 = vmul.f32 %v3632_v1, %v1024_v30  ;;  %v1026_v35 = vld [vmem:[%s3625_s8 + $0x1b20] sm:$0xff]  ;;  %v1027_v36 = vld [vmem:[%s3625_s8 + $0x1b28] sm:$0xff]  ;;  %v2050_v37 = vmul.f32 %v3632_v1, %v1025_v34 }
 0x1f6   : > { %3051 = vst [vmem:[%s3648_s20 + $0x1a60] sm:$0xff] %v2027_v53  ;;  %3052 = vst [vmem:[%s3648_s20 + $0x1a68] sm:$0xff] %v2028_v54  ;;  %v2051_v38 = vmul.f32 %v3632_v1, %v1026_v35  ;;  %v2052_v39 = vmul.f32 %v3632_v1, %v1027_v36  ;;  %v1028_v40 = vld [vmem:[%s3625_s8 + $0x1b30] sm:$0xff]  ;;  %v1029_v41 = vld [vmem:[%s3625_s8 + $0x1b38] sm:$0xff] }
 0x1f7   : > { %3053 = vst [vmem:[%s3648_s20 + $0x1a70] sm:$0xff] %v2029_v58  ;;  %3054 = vst [vmem:[%s3648_s20 + $0x1a78] sm:$0xff] %v2030_v59  ;;  %v1030_v42 = vld [vmem:[%s3625_s8 + $0x1b40] sm:$0xff]  ;;  %v2053_v43 = vmul.f32 %v3632_v1, %v1028_v40  ;;  %v2054_v44 = vmul.f32 %v3632_v1, %v1029_v41  ;;  %v1031_v46 = vld [vmem:[%s3625_s8 + $0x1b48] sm:$0xff] }
 0x1f8   : > { %3055 = vst [vmem:[%s3648_s20 + $0x1a80] sm:$0xff] %v2031_v60  ;;  %3056 = vst [vmem:[%s3648_s20 + $0x1a88] sm:$0xff] %v2032_v0  ;;  %v2055_v45 = vmul.f32 %v3632_v1, %v1030_v42  ;;  %v1032_v47 = vld [vmem:[%s3625_s8 + $0x1b50] sm:$0xff]  ;;  %v1033_v48 = vld [vmem:[%s3625_s8 + $0x1b58] sm:$0xff]  ;;  %v2056_v49 = vmul.f32 %v3632_v1, %v1031_v46 }
 0x1f9   : > { %3057 = vst [vmem:[%s3648_s20 + $0x1a90] sm:$0xff] %v2033_v2  ;;  %3058 = vst [vmem:[%s3648_s20 + $0x1a98] sm:$0xff] %v2034_v3  ;;  %v2057_v50 = vmul.f32 %v3632_v1, %v1032_v47  ;;  %v2058_v51 = vmul.f32 %v3632_v1, %v1033_v48  ;;  %v1034_v52 = vld [vmem:[%s3625_s8 + $0x1b60] sm:$0xff]  ;;  %v1035_v53 = vld [vmem:[%s3625_s8 + $0x1b68] sm:$0xff] }
 0x1fa   : > { %3059 = vst [vmem:[%s3648_s20 + $0x1aa0] sm:$0xff] %v2035_v7  ;;  %3060 = vst [vmem:[%s3648_s20 + $0x1aa8] sm:$0xff] %v2036_v8  ;;  %v1036_v54 = vld [vmem:[%s3625_s8 + $0x1b70] sm:$0xff]  ;;  %v2059_v55 = vmul.f32 %v3632_v1, %v1034_v52  ;;  %v2060_v56 = vmul.f32 %v3632_v1, %v1035_v53  ;;  %v1037_v58 = vld [vmem:[%s3625_s8 + $0x1b78] sm:$0xff] }
 0x1fb   : > { %3061 = vst [vmem:[%s3648_s20 + $0x1ab0] sm:$0xff] %v2037_v9  ;;  %3062 = vst [vmem:[%s3648_s20 + $0x1ab8] sm:$0xff] %v2038_v13  ;;  %v2061_v57 = vmul.f32 %v3632_v1, %v1036_v54  ;;  %v1038_v59 = vld [vmem:[%s3625_s8 + $0x1b80] sm:$0xff]  ;;  %v1039_v60 = vld [vmem:[%s3625_s8 + $0x1b88] sm:$0xff]  ;;  %v2062_v61 = vmul.f32 %v3632_v1, %v1037_v58 }
 0x1fc   : > { %3063 = vst [vmem:[%s3648_s20 + $0x1ac0] sm:$0xff] %v2039_v14  ;;  %3064 = vst [vmem:[%s3648_s20 + $0x1ac8] sm:$0xff] %v2040_v15  ;;  %v2063_v62 = vmul.f32 %v3632_v1, %v1038_v59  ;;  %v2064_v63 = vmul.f32 %v3632_v1, %v1039_v60  ;;  %v1040_v0 = vld [vmem:[%s3625_s8 + $0x1b90] sm:$0xff]  ;;  %v1041_v2 = vld [vmem:[%s3625_s8 + $0x1b98] sm:$0xff] }
 0x1fd   : > { %3065 = vst [vmem:[%s3648_s20 + $0x1ad0] sm:$0xff] %v2041_v19  ;;  %3066 = vst [vmem:[%s3648_s20 + $0x1ad8] sm:$0xff] %v2042_v20  ;;  %v1042_v3 = vld [vmem:[%s3625_s8 + $0x1ba0] sm:$0xff]  ;;  %v2065_v4 = vmul.f32 %v3632_v1, %v1040_v0  ;;  %v2066_v5 = vmul.f32 %v3632_v1, %v1041_v2  ;;  %v1043_v7 = vld [vmem:[%s3625_s8 + $0x1ba8] sm:$0xff] }
 0x1fe   : > { %3067 = vst [vmem:[%s3648_s20 + $0x1ae0] sm:$0xff] %v2043_v21  ;;  %3068 = vst [vmem:[%s3648_s20 + $0x1ae8] sm:$0xff] %v2044_v25  ;;  %v2067_v6 = vmul.f32 %v3632_v1, %v1042_v3  ;;  %v1044_v8 = vld [vmem:[%s3625_s8 + $0x1bb0] sm:$0xff]  ;;  %v1045_v9 = vld [vmem:[%s3625_s8 + $0x1bb8] sm:$0xff]  ;;  %v2068_v10 = vmul.f32 %v3632_v1, %v1043_v7 }
 0x1ff   : > { %3069 = vst [vmem:[%s3648_s20 + $0x1af0] sm:$0xff] %v2045_v26  ;;  %3070 = vst [vmem:[%s3648_s20 + $0x1af8] sm:$0xff] %v2046_v27  ;;  %v2069_v11 = vmul.f32 %v3632_v1, %v1044_v8  ;;  %v2070_v12 = vmul.f32 %v3632_v1, %v1045_v9  ;;  %v1046_v13 = vld [vmem:[%s3625_s8 + $0x1bc0] sm:$0xff]  ;;  %v1047_v14 = vld [vmem:[%s3625_s8 + $0x1bc8] sm:$0xff] }
 0x200   : > { %3071 = vst [vmem:[%s3648_s20 + $0x1b00] sm:$0xff] %v2047_v31  ;;  %3072 = vst [vmem:[%s3648_s20 + $0x1b08] sm:$0xff] %v2048_v32  ;;  %v1048_v15 = vld [vmem:[%s3625_s8 + $0x1bd0] sm:$0xff]  ;;  %v2071_v16 = vmul.f32 %v3632_v1, %v1046_v13  ;;  %v2072_v17 = vmul.f32 %v3632_v1, %v1047_v14  ;;  %v1049_v19 = vld [vmem:[%s3625_s8 + $0x1bd8] sm:$0xff] }
 0x201   : > { %3073 = vst [vmem:[%s3648_s20 + $0x1b10] sm:$0xff] %v2049_v33  ;;  %3074 = vst [vmem:[%s3648_s20 + $0x1b18] sm:$0xff] %v2050_v37  ;;  %v2073_v18 = vmul.f32 %v3632_v1, %v1048_v15  ;;  %v1050_v20 = vld [vmem:[%s3625_s8 + $0x1be0] sm:$0xff]  ;;  %v1051_v21 = vld [vmem:[%s3625_s8 + $0x1be8] sm:$0xff]  ;;  %v2074_v22 = vmul.f32 %v3632_v1, %v1049_v19 }
 0x202   : > { %3075 = vst [vmem:[%s3648_s20 + $0x1b20] sm:$0xff] %v2051_v38  ;;  %3076 = vst [vmem:[%s3648_s20 + $0x1b28] sm:$0xff] %v2052_v39  ;;  %v2075_v23 = vmul.f32 %v3632_v1, %v1050_v20  ;;  %v2076_v24 = vmul.f32 %v3632_v1, %v1051_v21  ;;  %v1052_v25 = vld [vmem:[%s3625_s8 + $0x1bf0] sm:$0xff]  ;;  %v1053_v26 = vld [vmem:[%s3625_s8 + $0x1bf8] sm:$0xff] }
 0x203   : > { %3077 = vst [vmem:[%s3648_s20 + $0x1b30] sm:$0xff] %v2053_v43  ;;  %3078 = vst [vmem:[%s3648_s20 + $0x1b38] sm:$0xff] %v2054_v44  ;;  %v1054_v27 = vld [vmem:[%s3625_s8 + $0x1c00] sm:$0xff]  ;;  %v2077_v28 = vmul.f32 %v3632_v1, %v1052_v25  ;;  %v2078_v29 = vmul.f32 %v3632_v1, %v1053_v26  ;;  %v1055_v31 = vld [vmem:[%s3625_s8 + $0x1c08] sm:$0xff] }
 0x204   : > { %3079 = vst [vmem:[%s3648_s20 + $0x1b40] sm:$0xff] %v2055_v45  ;;  %3080 = vst [vmem:[%s3648_s20 + $0x1b48] sm:$0xff] %v2056_v49  ;;  %v2079_v30 = vmul.f32 %v3632_v1, %v1054_v27  ;;  %v1056_v32 = vld [vmem:[%s3625_s8 + $0x1c10] sm:$0xff]  ;;  %v1057_v33 = vld [vmem:[%s3625_s8 + $0x1c18] sm:$0xff]  ;;  %v2080_v34 = vmul.f32 %v3632_v1, %v1055_v31 }
 0x205   : > { %3081 = vst [vmem:[%s3648_s20 + $0x1b50] sm:$0xff] %v2057_v50  ;;  %3082 = vst [vmem:[%s3648_s20 + $0x1b58] sm:$0xff] %v2058_v51  ;;  %v2081_v35 = vmul.f32 %v3632_v1, %v1056_v32  ;;  %v2082_v36 = vmul.f32 %v3632_v1, %v1057_v33  ;;  %v1058_v37 = vld [vmem:[%s3625_s8 + $0x1c20] sm:$0xff]  ;;  %v1059_v38 = vld [vmem:[%s3625_s8 + $0x1c28] sm:$0xff] }
 0x206   : > { %3083 = vst [vmem:[%s3648_s20 + $0x1b60] sm:$0xff] %v2059_v55  ;;  %3084 = vst [vmem:[%s3648_s20 + $0x1b68] sm:$0xff] %v2060_v56  ;;  %v1060_v39 = vld [vmem:[%s3625_s8 + $0x1c30] sm:$0xff]  ;;  %v2083_v40 = vmul.f32 %v3632_v1, %v1058_v37  ;;  %v2084_v41 = vmul.f32 %v3632_v1, %v1059_v38  ;;  %v1061_v43 = vld [vmem:[%s3625_s8 + $0x1c38] sm:$0xff] }
 0x207   : > { %3085 = vst [vmem:[%s3648_s20 + $0x1b70] sm:$0xff] %v2061_v57  ;;  %3086 = vst [vmem:[%s3648_s20 + $0x1b78] sm:$0xff] %v2062_v61  ;;  %v2085_v42 = vmul.f32 %v3632_v1, %v1060_v39  ;;  %v1062_v44 = vld [vmem:[%s3625_s8 + $0x1c40] sm:$0xff]  ;;  %v1063_v45 = vld [vmem:[%s3625_s8 + $0x1c48] sm:$0xff]  ;;  %v2086_v46 = vmul.f32 %v3632_v1, %v1061_v43 }
 0x208   : > { %3087 = vst [vmem:[%s3648_s20 + $0x1b80] sm:$0xff] %v2063_v62  ;;  %3088 = vst [vmem:[%s3648_s20 + $0x1b88] sm:$0xff] %v2064_v63  ;;  %v2087_v47 = vmul.f32 %v3632_v1, %v1062_v44  ;;  %v2088_v48 = vmul.f32 %v3632_v1, %v1063_v45  ;;  %v1064_v49 = vld [vmem:[%s3625_s8 + $0x1c50] sm:$0xff]  ;;  %v1065_v50 = vld [vmem:[%s3625_s8 + $0x1c58] sm:$0xff] }
 0x209   : > { %3089 = vst [vmem:[%s3648_s20 + $0x1b90] sm:$0xff] %v2065_v4  ;;  %3090 = vst [vmem:[%s3648_s20 + $0x1b98] sm:$0xff] %v2066_v5  ;;  %v1066_v51 = vld [vmem:[%s3625_s8 + $0x1c60] sm:$0xff]  ;;  %v2089_v52 = vmul.f32 %v3632_v1, %v1064_v49  ;;  %v2090_v53 = vmul.f32 %v3632_v1, %v1065_v50  ;;  %v1067_v55 = vld [vmem:[%s3625_s8 + $0x1c68] sm:$0xff] }
 0x20a   : > { %3091 = vst [vmem:[%s3648_s20 + $0x1ba0] sm:$0xff] %v2067_v6  ;;  %3092 = vst [vmem:[%s3648_s20 + $0x1ba8] sm:$0xff] %v2068_v10  ;;  %v2091_v54 = vmul.f32 %v3632_v1, %v1066_v51  ;;  %v1068_v56 = vld [vmem:[%s3625_s8 + $0x1c70] sm:$0xff]  ;;  %v1069_v57 = vld [vmem:[%s3625_s8 + $0x1c78] sm:$0xff]  ;;  %v2092_v58 = vmul.f32 %v3632_v1, %v1067_v55 }
 0x20b   : > { %3093 = vst [vmem:[%s3648_s20 + $0x1bb0] sm:$0xff] %v2069_v11  ;;  %3094 = vst [vmem:[%s3648_s20 + $0x1bb8] sm:$0xff] %v2070_v12  ;;  %v2093_v59 = vmul.f32 %v3632_v1, %v1068_v56  ;;  %v2094_v60 = vmul.f32 %v3632_v1, %v1069_v57  ;;  %v1070_v61 = vld [vmem:[%s3625_s8 + $0x1c80] sm:$0xff]  ;;  %v1071_v62 = vld [vmem:[%s3625_s8 + $0x1c88] sm:$0xff] }
 0x20c   : > { %3095 = vst [vmem:[%s3648_s20 + $0x1bc0] sm:$0xff] %v2071_v16  ;;  %3096 = vst [vmem:[%s3648_s20 + $0x1bc8] sm:$0xff] %v2072_v17  ;;  %v1072_v63 = vld [vmem:[%s3625_s8 + $0x1c90] sm:$0xff]  ;;  %v2095_v0 = vmul.f32 %v3632_v1, %v1070_v61  ;;  %v2096_v2 = vmul.f32 %v3632_v1, %v1071_v62  ;;  %v1073_v4 = vld [vmem:[%s3625_s8 + $0x1c98] sm:$0xff] }
 0x20d   : > { %3097 = vst [vmem:[%s3648_s20 + $0x1bd0] sm:$0xff] %v2073_v18  ;;  %3098 = vst [vmem:[%s3648_s20 + $0x1bd8] sm:$0xff] %v2074_v22  ;;  %v2097_v3 = vmul.f32 %v3632_v1, %v1072_v63  ;;  %v1074_v5 = vld [vmem:[%s3625_s8 + $0x1ca0] sm:$0xff]  ;;  %v1075_v6 = vld [vmem:[%s3625_s8 + $0x1ca8] sm:$0xff]  ;;  %v2098_v7 = vmul.f32 %v3632_v1, %v1073_v4 }
 0x20e   : > { %3099 = vst [vmem:[%s3648_s20 + $0x1be0] sm:$0xff] %v2075_v23  ;;  %3100 = vst [vmem:[%s3648_s20 + $0x1be8] sm:$0xff] %v2076_v24  ;;  %v2099_v8 = vmul.f32 %v3632_v1, %v1074_v5  ;;  %v2100_v9 = vmul.f32 %v3632_v1, %v1075_v6  ;;  %v1076_v10 = vld [vmem:[%s3625_s8 + $0x1cb0] sm:$0xff]  ;;  %v1077_v11 = vld [vmem:[%s3625_s8 + $0x1cb8] sm:$0xff] }
 0x20f   : > { %3101 = vst [vmem:[%s3648_s20 + $0x1bf0] sm:$0xff] %v2077_v28  ;;  %3102 = vst [vmem:[%s3648_s20 + $0x1bf8] sm:$0xff] %v2078_v29  ;;  %v1078_v12 = vld [vmem:[%s3625_s8 + $0x1cc0] sm:$0xff]  ;;  %v2101_v13 = vmul.f32 %v3632_v1, %v1076_v10  ;;  %v2102_v14 = vmul.f32 %v3632_v1, %v1077_v11  ;;  %v1079_v16 = vld [vmem:[%s3625_s8 + $0x1cc8] sm:$0xff] }
 0x210   : > { %3103 = vst [vmem:[%s3648_s20 + $0x1c00] sm:$0xff] %v2079_v30  ;;  %3104 = vst [vmem:[%s3648_s20 + $0x1c08] sm:$0xff] %v2080_v34  ;;  %v2103_v15 = vmul.f32 %v3632_v1, %v1078_v12  ;;  %v1080_v17 = vld [vmem:[%s3625_s8 + $0x1cd0] sm:$0xff]  ;;  %v1081_v18 = vld [vmem:[%s3625_s8 + $0x1cd8] sm:$0xff]  ;;  %v2104_v19 = vmul.f32 %v3632_v1, %v1079_v16 }
 0x211   : > { %3105 = vst [vmem:[%s3648_s20 + $0x1c10] sm:$0xff] %v2081_v35  ;;  %3106 = vst [vmem:[%s3648_s20 + $0x1c18] sm:$0xff] %v2082_v36  ;;  %v2105_v20 = vmul.f32 %v3632_v1, %v1080_v17  ;;  %v2106_v21 = vmul.f32 %v3632_v1, %v1081_v18  ;;  %v1082_v22 = vld [vmem:[%s3625_s8 + $0x1ce0] sm:$0xff]  ;;  %v1083_v23 = vld [vmem:[%s3625_s8 + $0x1ce8] sm:$0xff] }
 0x212   : > { %3107 = vst [vmem:[%s3648_s20 + $0x1c20] sm:$0xff] %v2083_v40  ;;  %3108 = vst [vmem:[%s3648_s20 + $0x1c28] sm:$0xff] %v2084_v41  ;;  %v1084_v24 = vld [vmem:[%s3625_s8 + $0x1cf0] sm:$0xff]  ;;  %v2107_v25 = vmul.f32 %v3632_v1, %v1082_v22  ;;  %v2108_v26 = vmul.f32 %v3632_v1, %v1083_v23  ;;  %v1085_v28 = vld [vmem:[%s3625_s8 + $0x1cf8] sm:$0xff] }
 0x213   : > { %3109 = vst [vmem:[%s3648_s20 + $0x1c30] sm:$0xff] %v2085_v42  ;;  %3110 = vst [vmem:[%s3648_s20 + $0x1c38] sm:$0xff] %v2086_v46  ;;  %v2109_v27 = vmul.f32 %v3632_v1, %v1084_v24  ;;  %v1086_v29 = vld [vmem:[%s3625_s8 + $0x1d00] sm:$0xff]  ;;  %v1087_v30 = vld [vmem:[%s3625_s8 + $0x1d08] sm:$0xff]  ;;  %v2110_v31 = vmul.f32 %v3632_v1, %v1085_v28 }
 0x214   : > { %3111 = vst [vmem:[%s3648_s20 + $0x1c40] sm:$0xff] %v2087_v47  ;;  %3112 = vst [vmem:[%s3648_s20 + $0x1c48] sm:$0xff] %v2088_v48  ;;  %v2111_v32 = vmul.f32 %v3632_v1, %v1086_v29  ;;  %v2112_v33 = vmul.f32 %v3632_v1, %v1087_v30  ;;  %v1088_v34 = vld [vmem:[%s3625_s8 + $0x1d10] sm:$0xff]  ;;  %v1089_v35 = vld [vmem:[%s3625_s8 + $0x1d18] sm:$0xff] }
 0x215   : > { %3113 = vst [vmem:[%s3648_s20 + $0x1c50] sm:$0xff] %v2089_v52  ;;  %3114 = vst [vmem:[%s3648_s20 + $0x1c58] sm:$0xff] %v2090_v53  ;;  %v1090_v36 = vld [vmem:[%s3625_s8 + $0x1d20] sm:$0xff]  ;;  %v2113_v37 = vmul.f32 %v3632_v1, %v1088_v34  ;;  %v2114_v38 = vmul.f32 %v3632_v1, %v1089_v35  ;;  %v1091_v40 = vld [vmem:[%s3625_s8 + $0x1d28] sm:$0xff] }
 0x216   : > { %3115 = vst [vmem:[%s3648_s20 + $0x1c60] sm:$0xff] %v2091_v54  ;;  %3116 = vst [vmem:[%s3648_s20 + $0x1c68] sm:$0xff] %v2092_v58  ;;  %v2115_v39 = vmul.f32 %v3632_v1, %v1090_v36  ;;  %v1092_v41 = vld [vmem:[%s3625_s8 + $0x1d30] sm:$0xff]  ;;  %v1093_v42 = vld [vmem:[%s3625_s8 + $0x1d38] sm:$0xff]  ;;  %v2116_v43 = vmul.f32 %v3632_v1, %v1091_v40 }
 0x217   : > { %3117 = vst [vmem:[%s3648_s20 + $0x1c70] sm:$0xff] %v2093_v59  ;;  %3118 = vst [vmem:[%s3648_s20 + $0x1c78] sm:$0xff] %v2094_v60  ;;  %v2117_v44 = vmul.f32 %v3632_v1, %v1092_v41  ;;  %v2118_v45 = vmul.f32 %v3632_v1, %v1093_v42  ;;  %v1094_v46 = vld [vmem:[%s3625_s8 + $0x1d40] sm:$0xff]  ;;  %v1095_v47 = vld [vmem:[%s3625_s8 + $0x1d48] sm:$0xff] }
 0x218   : > { %3119 = vst [vmem:[%s3648_s20 + $0x1c80] sm:$0xff] %v2095_v0  ;;  %3120 = vst [vmem:[%s3648_s20 + $0x1c88] sm:$0xff] %v2096_v2  ;;  %v1096_v48 = vld [vmem:[%s3625_s8 + $0x1d50] sm:$0xff]  ;;  %v2119_v49 = vmul.f32 %v3632_v1, %v1094_v46  ;;  %v2120_v50 = vmul.f32 %v3632_v1, %v1095_v47  ;;  %v1097_v52 = vld [vmem:[%s3625_s8 + $0x1d58] sm:$0xff] }
 0x219   : > { %3121 = vst [vmem:[%s3648_s20 + $0x1c90] sm:$0xff] %v2097_v3  ;;  %3122 = vst [vmem:[%s3648_s20 + $0x1c98] sm:$0xff] %v2098_v7  ;;  %v2121_v51 = vmul.f32 %v3632_v1, %v1096_v48  ;;  %v1098_v53 = vld [vmem:[%s3625_s8 + $0x1d60] sm:$0xff]  ;;  %v1099_v54 = vld [vmem:[%s3625_s8 + $0x1d68] sm:$0xff]  ;;  %v2122_v55 = vmul.f32 %v3632_v1, %v1097_v52 }
 0x21a   : > { %3123 = vst [vmem:[%s3648_s20 + $0x1ca0] sm:$0xff] %v2099_v8  ;;  %3124 = vst [vmem:[%s3648_s20 + $0x1ca8] sm:$0xff] %v2100_v9  ;;  %v2123_v56 = vmul.f32 %v3632_v1, %v1098_v53  ;;  %v2124_v57 = vmul.f32 %v3632_v1, %v1099_v54  ;;  %v1100_v58 = vld [vmem:[%s3625_s8 + $0x1d70] sm:$0xff]  ;;  %v1101_v59 = vld [vmem:[%s3625_s8 + $0x1d78] sm:$0xff] }
 0x21b   : > { %3125 = vst [vmem:[%s3648_s20 + $0x1cb0] sm:$0xff] %v2101_v13  ;;  %3126 = vst [vmem:[%s3648_s20 + $0x1cb8] sm:$0xff] %v2102_v14  ;;  %v1102_v60 = vld [vmem:[%s3625_s8 + $0x1d80] sm:$0xff]  ;;  %v2125_v61 = vmul.f32 %v3632_v1, %v1100_v58  ;;  %v2126_v62 = vmul.f32 %v3632_v1, %v1101_v59  ;;  %v1103_v0 = vld [vmem:[%s3625_s8 + $0x1d88] sm:$0xff] }
 0x21c   : > { %3127 = vst [vmem:[%s3648_s20 + $0x1cc0] sm:$0xff] %v2103_v15  ;;  %3128 = vst [vmem:[%s3648_s20 + $0x1cc8] sm:$0xff] %v2104_v19  ;;  %v2127_v63 = vmul.f32 %v3632_v1, %v1102_v60  ;;  %v1104_v2 = vld [vmem:[%s3625_s8 + $0x1d90] sm:$0xff]  ;;  %v1105_v3 = vld [vmem:[%s3625_s8 + $0x1d98] sm:$0xff]  ;;  %v2128_v4 = vmul.f32 %v3632_v1, %v1103_v0 }
 0x21d   : > { %3129 = vst [vmem:[%s3648_s20 + $0x1cd0] sm:$0xff] %v2105_v20  ;;  %3130 = vst [vmem:[%s3648_s20 + $0x1cd8] sm:$0xff] %v2106_v21  ;;  %v2129_v5 = vmul.f32 %v3632_v1, %v1104_v2  ;;  %v2130_v6 = vmul.f32 %v3632_v1, %v1105_v3  ;;  %v1106_v7 = vld [vmem:[%s3625_s8 + $0x1da0] sm:$0xff]  ;;  %v1107_v8 = vld [vmem:[%s3625_s8 + $0x1da8] sm:$0xff] }
 0x21e   : > { %3131 = vst [vmem:[%s3648_s20 + $0x1ce0] sm:$0xff] %v2107_v25  ;;  %3132 = vst [vmem:[%s3648_s20 + $0x1ce8] sm:$0xff] %v2108_v26  ;;  %v1108_v9 = vld [vmem:[%s3625_s8 + $0x1db0] sm:$0xff]  ;;  %v2131_v10 = vmul.f32 %v3632_v1, %v1106_v7  ;;  %v2132_v11 = vmul.f32 %v3632_v1, %v1107_v8  ;;  %v1109_v13 = vld [vmem:[%s3625_s8 + $0x1db8] sm:$0xff] }
 0x21f   : > { %3133 = vst [vmem:[%s3648_s20 + $0x1cf0] sm:$0xff] %v2109_v27  ;;  %3134 = vst [vmem:[%s3648_s20 + $0x1cf8] sm:$0xff] %v2110_v31  ;;  %v2133_v12 = vmul.f32 %v3632_v1, %v1108_v9  ;;  %v1110_v14 = vld [vmem:[%s3625_s8 + $0x1dc0] sm:$0xff]  ;;  %v1111_v15 = vld [vmem:[%s3625_s8 + $0x1dc8] sm:$0xff]  ;;  %v2134_v16 = vmul.f32 %v3632_v1, %v1109_v13 }
 0x220   : > { %3135 = vst [vmem:[%s3648_s20 + $0x1d00] sm:$0xff] %v2111_v32  ;;  %3136 = vst [vmem:[%s3648_s20 + $0x1d08] sm:$0xff] %v2112_v33  ;;  %v2135_v17 = vmul.f32 %v3632_v1, %v1110_v14  ;;  %v2136_v18 = vmul.f32 %v3632_v1, %v1111_v15  ;;  %v1112_v19 = vld [vmem:[%s3625_s8 + $0x1dd0] sm:$0xff]  ;;  %v1113_v20 = vld [vmem:[%s3625_s8 + $0x1dd8] sm:$0xff] }
 0x221   : > { %3137 = vst [vmem:[%s3648_s20 + $0x1d10] sm:$0xff] %v2113_v37  ;;  %3138 = vst [vmem:[%s3648_s20 + $0x1d18] sm:$0xff] %v2114_v38  ;;  %v1114_v21 = vld [vmem:[%s3625_s8 + $0x1de0] sm:$0xff]  ;;  %v2137_v22 = vmul.f32 %v3632_v1, %v1112_v19  ;;  %v2138_v23 = vmul.f32 %v3632_v1, %v1113_v20  ;;  %v1115_v25 = vld [vmem:[%s3625_s8 + $0x1de8] sm:$0xff] }
 0x222   : > { %3139 = vst [vmem:[%s3648_s20 + $0x1d20] sm:$0xff] %v2115_v39  ;;  %3140 = vst [vmem:[%s3648_s20 + $0x1d28] sm:$0xff] %v2116_v43  ;;  %v2139_v24 = vmul.f32 %v3632_v1, %v1114_v21  ;;  %v1116_v26 = vld [vmem:[%s3625_s8 + $0x1df0] sm:$0xff]  ;;  %v1117_v27 = vld [vmem:[%s3625_s8 + $0x1df8] sm:$0xff]  ;;  %v2140_v28 = vmul.f32 %v3632_v1, %v1115_v25 }
 0x223   : > { %3141 = vst [vmem:[%s3648_s20 + $0x1d30] sm:$0xff] %v2117_v44  ;;  %3142 = vst [vmem:[%s3648_s20 + $0x1d38] sm:$0xff] %v2118_v45  ;;  %v2141_v29 = vmul.f32 %v3632_v1, %v1116_v26  ;;  %v2142_v30 = vmul.f32 %v3632_v1, %v1117_v27  ;;  %v1118_v31 = vld [vmem:[%s3625_s8 + $0x1e00] sm:$0xff]  ;;  %v1119_v32 = vld [vmem:[%s3625_s8 + $0x1e08] sm:$0xff] }
 0x224   : > { %3143 = vst [vmem:[%s3648_s20 + $0x1d40] sm:$0xff] %v2119_v49  ;;  %3144 = vst [vmem:[%s3648_s20 + $0x1d48] sm:$0xff] %v2120_v50  ;;  %v1120_v33 = vld [vmem:[%s3625_s8 + $0x1e10] sm:$0xff]  ;;  %v2143_v34 = vmul.f32 %v3632_v1, %v1118_v31  ;;  %v2144_v35 = vmul.f32 %v3632_v1, %v1119_v32  ;;  %v1121_v37 = vld [vmem:[%s3625_s8 + $0x1e18] sm:$0xff] }
 0x225   : > { %3145 = vst [vmem:[%s3648_s20 + $0x1d50] sm:$0xff] %v2121_v51  ;;  %3146 = vst [vmem:[%s3648_s20 + $0x1d58] sm:$0xff] %v2122_v55  ;;  %v2145_v36 = vmul.f32 %v3632_v1, %v1120_v33  ;;  %v1122_v38 = vld [vmem:[%s3625_s8 + $0x1e20] sm:$0xff]  ;;  %v1123_v39 = vld [vmem:[%s3625_s8 + $0x1e28] sm:$0xff]  ;;  %v2146_v40 = vmul.f32 %v3632_v1, %v1121_v37 }
 0x226   : > { %3147 = vst [vmem:[%s3648_s20 + $0x1d60] sm:$0xff] %v2123_v56  ;;  %3148 = vst [vmem:[%s3648_s20 + $0x1d68] sm:$0xff] %v2124_v57  ;;  %v2147_v41 = vmul.f32 %v3632_v1, %v1122_v38  ;;  %v2148_v42 = vmul.f32 %v3632_v1, %v1123_v39  ;;  %v1124_v43 = vld [vmem:[%s3625_s8 + $0x1e30] sm:$0xff]  ;;  %v1125_v44 = vld [vmem:[%s3625_s8 + $0x1e38] sm:$0xff] }
 0x227   : > { %3149 = vst [vmem:[%s3648_s20 + $0x1d70] sm:$0xff] %v2125_v61  ;;  %3150 = vst [vmem:[%s3648_s20 + $0x1d78] sm:$0xff] %v2126_v62  ;;  %v1126_v45 = vld [vmem:[%s3625_s8 + $0x1e40] sm:$0xff]  ;;  %v2149_v46 = vmul.f32 %v3632_v1, %v1124_v43  ;;  %v2150_v47 = vmul.f32 %v3632_v1, %v1125_v44  ;;  %v1127_v49 = vld [vmem:[%s3625_s8 + $0x1e48] sm:$0xff] }
 0x228   : > { %3151 = vst [vmem:[%s3648_s20 + $0x1d80] sm:$0xff] %v2127_v63  ;;  %3152 = vst [vmem:[%s3648_s20 + $0x1d88] sm:$0xff] %v2128_v4  ;;  %v2151_v48 = vmul.f32 %v3632_v1, %v1126_v45  ;;  %v1128_v50 = vld [vmem:[%s3625_s8 + $0x1e50] sm:$0xff]  ;;  %v1129_v51 = vld [vmem:[%s3625_s8 + $0x1e58] sm:$0xff]  ;;  %v2152_v52 = vmul.f32 %v3632_v1, %v1127_v49 }
 0x229   : > { %3153 = vst [vmem:[%s3648_s20 + $0x1d90] sm:$0xff] %v2129_v5  ;;  %3154 = vst [vmem:[%s3648_s20 + $0x1d98] sm:$0xff] %v2130_v6  ;;  %v2153_v53 = vmul.f32 %v3632_v1, %v1128_v50  ;;  %v2154_v54 = vmul.f32 %v3632_v1, %v1129_v51  ;;  %v1130_v55 = vld [vmem:[%s3625_s8 + $0x1e60] sm:$0xff]  ;;  %v1131_v56 = vld [vmem:[%s3625_s8 + $0x1e68] sm:$0xff] }
 0x22a   : > { %3155 = vst [vmem:[%s3648_s20 + $0x1da0] sm:$0xff] %v2131_v10  ;;  %3156 = vst [vmem:[%s3648_s20 + $0x1da8] sm:$0xff] %v2132_v11  ;;  %v1132_v57 = vld [vmem:[%s3625_s8 + $0x1e70] sm:$0xff]  ;;  %v2155_v58 = vmul.f32 %v3632_v1, %v1130_v55  ;;  %v2156_v59 = vmul.f32 %v3632_v1, %v1131_v56  ;;  %v1133_v61 = vld [vmem:[%s3625_s8 + $0x1e78] sm:$0xff] }
 0x22b   : > { %3157 = vst [vmem:[%s3648_s20 + $0x1db0] sm:$0xff] %v2133_v12  ;;  %3158 = vst [vmem:[%s3648_s20 + $0x1db8] sm:$0xff] %v2134_v16  ;;  %v2157_v60 = vmul.f32 %v3632_v1, %v1132_v57  ;;  %v1134_v62 = vld [vmem:[%s3625_s8 + $0x1e80] sm:$0xff]  ;;  %v1135_v63 = vld [vmem:[%s3625_s8 + $0x1e88] sm:$0xff]  ;;  %v2158_v0 = vmul.f32 %v3632_v1, %v1133_v61 }
 0x22c   : > { %3159 = vst [vmem:[%s3648_s20 + $0x1dc0] sm:$0xff] %v2135_v17  ;;  %3160 = vst [vmem:[%s3648_s20 + $0x1dc8] sm:$0xff] %v2136_v18  ;;  %v2159_v2 = vmul.f32 %v3632_v1, %v1134_v62  ;;  %v2160_v3 = vmul.f32 %v3632_v1, %v1135_v63  ;;  %v1136_v4 = vld [vmem:[%s3625_s8 + $0x1e90] sm:$0xff]  ;;  %v1137_v5 = vld [vmem:[%s3625_s8 + $0x1e98] sm:$0xff] }
 0x22d   : > { %3161 = vst [vmem:[%s3648_s20 + $0x1dd0] sm:$0xff] %v2137_v22  ;;  %3162 = vst [vmem:[%s3648_s20 + $0x1dd8] sm:$0xff] %v2138_v23  ;;  %v1138_v6 = vld [vmem:[%s3625_s8 + $0x1ea0] sm:$0xff]  ;;  %v2161_v7 = vmul.f32 %v3632_v1, %v1136_v4  ;;  %v2162_v8 = vmul.f32 %v3632_v1, %v1137_v5  ;;  %v1139_v10 = vld [vmem:[%s3625_s8 + $0x1ea8] sm:$0xff] }
 0x22e   : > { %3163 = vst [vmem:[%s3648_s20 + $0x1de0] sm:$0xff] %v2139_v24  ;;  %3164 = vst [vmem:[%s3648_s20 + $0x1de8] sm:$0xff] %v2140_v28  ;;  %v2163_v9 = vmul.f32 %v3632_v1, %v1138_v6  ;;  %v1140_v11 = vld [vmem:[%s3625_s8 + $0x1eb0] sm:$0xff]  ;;  %v1141_v12 = vld [vmem:[%s3625_s8 + $0x1eb8] sm:$0xff]  ;;  %v2164_v13 = vmul.f32 %v3632_v1, %v1139_v10 }
 0x22f   : > { %3165 = vst [vmem:[%s3648_s20 + $0x1df0] sm:$0xff] %v2141_v29  ;;  %3166 = vst [vmem:[%s3648_s20 + $0x1df8] sm:$0xff] %v2142_v30  ;;  %v2165_v14 = vmul.f32 %v3632_v1, %v1140_v11  ;;  %v2166_v15 = vmul.f32 %v3632_v1, %v1141_v12  ;;  %v1142_v16 = vld [vmem:[%s3625_s8 + $0x1ec0] sm:$0xff]  ;;  %v1143_v17 = vld [vmem:[%s3625_s8 + $0x1ec8] sm:$0xff] }
 0x230   : > { %3167 = vst [vmem:[%s3648_s20 + $0x1e00] sm:$0xff] %v2143_v34  ;;  %3168 = vst [vmem:[%s3648_s20 + $0x1e08] sm:$0xff] %v2144_v35  ;;  %v1144_v18 = vld [vmem:[%s3625_s8 + $0x1ed0] sm:$0xff]  ;;  %v2167_v19 = vmul.f32 %v3632_v1, %v1142_v16  ;;  %v2168_v20 = vmul.f32 %v3632_v1, %v1143_v17  ;;  %v1145_v22 = vld [vmem:[%s3625_s8 + $0x1ed8] sm:$0xff] }
 0x231   : > { %3169 = vst [vmem:[%s3648_s20 + $0x1e10] sm:$0xff] %v2145_v36  ;;  %3170 = vst [vmem:[%s3648_s20 + $0x1e18] sm:$0xff] %v2146_v40  ;;  %v2169_v21 = vmul.f32 %v3632_v1, %v1144_v18  ;;  %v1146_v23 = vld [vmem:[%s3625_s8 + $0x1ee0] sm:$0xff]  ;;  %v1147_v24 = vld [vmem:[%s3625_s8 + $0x1ee8] sm:$0xff]  ;;  %v2170_v25 = vmul.f32 %v3632_v1, %v1145_v22 }
 0x232   : > { %3171 = vst [vmem:[%s3648_s20 + $0x1e20] sm:$0xff] %v2147_v41  ;;  %3172 = vst [vmem:[%s3648_s20 + $0x1e28] sm:$0xff] %v2148_v42  ;;  %v2171_v26 = vmul.f32 %v3632_v1, %v1146_v23  ;;  %v2172_v27 = vmul.f32 %v3632_v1, %v1147_v24  ;;  %v1148_v28 = vld [vmem:[%s3625_s8 + $0x1ef0] sm:$0xff]  ;;  %v1149_v29 = vld [vmem:[%s3625_s8 + $0x1ef8] sm:$0xff] }
 0x233   : > { %3173 = vst [vmem:[%s3648_s20 + $0x1e30] sm:$0xff] %v2149_v46  ;;  %3174 = vst [vmem:[%s3648_s20 + $0x1e38] sm:$0xff] %v2150_v47  ;;  %v1150_v30 = vld [vmem:[%s3625_s8 + $0x1f00] sm:$0xff]  ;;  %v2173_v31 = vmul.f32 %v3632_v1, %v1148_v28  ;;  %v2174_v32 = vmul.f32 %v3632_v1, %v1149_v29  ;;  %v1151_v34 = vld [vmem:[%s3625_s8 + $0x1f08] sm:$0xff] }
 0x234   : > { %3175 = vst [vmem:[%s3648_s20 + $0x1e40] sm:$0xff] %v2151_v48  ;;  %3176 = vst [vmem:[%s3648_s20 + $0x1e48] sm:$0xff] %v2152_v52  ;;  %v2175_v33 = vmul.f32 %v3632_v1, %v1150_v30  ;;  %v1152_v35 = vld [vmem:[%s3625_s8 + $0x1f10] sm:$0xff]  ;;  %v1153_v36 = vld [vmem:[%s3625_s8 + $0x1f18] sm:$0xff]  ;;  %v2176_v37 = vmul.f32 %v3632_v1, %v1151_v34 }
 0x235   : > { %3177 = vst [vmem:[%s3648_s20 + $0x1e50] sm:$0xff] %v2153_v53  ;;  %3178 = vst [vmem:[%s3648_s20 + $0x1e58] sm:$0xff] %v2154_v54  ;;  %v2177_v38 = vmul.f32 %v3632_v1, %v1152_v35  ;;  %v2178_v39 = vmul.f32 %v3632_v1, %v1153_v36  ;;  %v1154_v40 = vld [vmem:[%s3625_s8 + $0x1f20] sm:$0xff]  ;;  %v1155_v41 = vld [vmem:[%s3625_s8 + $0x1f28] sm:$0xff] }
 0x236   : > { %3179 = vst [vmem:[%s3648_s20 + $0x1e60] sm:$0xff] %v2155_v58  ;;  %3180 = vst [vmem:[%s3648_s20 + $0x1e68] sm:$0xff] %v2156_v59  ;;  %v1156_v42 = vld [vmem:[%s3625_s8 + $0x1f30] sm:$0xff]  ;;  %v2179_v43 = vmul.f32 %v3632_v1, %v1154_v40  ;;  %v2180_v44 = vmul.f32 %v3632_v1, %v1155_v41  ;;  %v1157_v46 = vld [vmem:[%s3625_s8 + $0x1f38] sm:$0xff] }
 0x237   : > { %3181 = vst [vmem:[%s3648_s20 + $0x1e70] sm:$0xff] %v2157_v60  ;;  %3182 = vst [vmem:[%s3648_s20 + $0x1e78] sm:$0xff] %v2158_v0  ;;  %v2181_v45 = vmul.f32 %v3632_v1, %v1156_v42  ;;  %v1158_v47 = vld [vmem:[%s3625_s8 + $0x1f40] sm:$0xff]  ;;  %v1159_v48 = vld [vmem:[%s3625_s8 + $0x1f48] sm:$0xff]  ;;  %v2182_v49 = vmul.f32 %v3632_v1, %v1157_v46 }
 0x238   : > { %3183 = vst [vmem:[%s3648_s20 + $0x1e80] sm:$0xff] %v2159_v2  ;;  %3184 = vst [vmem:[%s3648_s20 + $0x1e88] sm:$0xff] %v2160_v3  ;;  %v2183_v50 = vmul.f32 %v3632_v1, %v1158_v47  ;;  %v2184_v51 = vmul.f32 %v3632_v1, %v1159_v48  ;;  %v1160_v52 = vld [vmem:[%s3625_s8 + $0x1f50] sm:$0xff]  ;;  %v1161_v53 = vld [vmem:[%s3625_s8 + $0x1f58] sm:$0xff] }
 0x239   : > { %3185 = vst [vmem:[%s3648_s20 + $0x1e90] sm:$0xff] %v2161_v7  ;;  %3186 = vst [vmem:[%s3648_s20 + $0x1e98] sm:$0xff] %v2162_v8  ;;  %v1162_v54 = vld [vmem:[%s3625_s8 + $0x1f60] sm:$0xff]  ;;  %v2185_v55 = vmul.f32 %v3632_v1, %v1160_v52  ;;  %v2186_v56 = vmul.f32 %v3632_v1, %v1161_v53  ;;  %v1163_v58 = vld [vmem:[%s3625_s8 + $0x1f68] sm:$0xff] }
 0x23a   : > { %3187 = vst [vmem:[%s3648_s20 + $0x1ea0] sm:$0xff] %v2163_v9  ;;  %3188 = vst [vmem:[%s3648_s20 + $0x1ea8] sm:$0xff] %v2164_v13  ;;  %v2187_v57 = vmul.f32 %v3632_v1, %v1162_v54  ;;  %v1164_v59 = vld [vmem:[%s3625_s8 + $0x1f70] sm:$0xff]  ;;  %v1165_v60 = vld [vmem:[%s3625_s8 + $0x1f78] sm:$0xff]  ;;  %v2188_v61 = vmul.f32 %v3632_v1, %v1163_v58 }
 0x23b   : > { %3189 = vst [vmem:[%s3648_s20 + $0x1eb0] sm:$0xff] %v2165_v14  ;;  %3190 = vst [vmem:[%s3648_s20 + $0x1eb8] sm:$0xff] %v2166_v15  ;;  %v2189_v62 = vmul.f32 %v3632_v1, %v1164_v59  ;;  %v2190_v63 = vmul.f32 %v3632_v1, %v1165_v60  ;;  %v1166_v0 = vld [vmem:[%s3625_s8 + $0x1f80] sm:$0xff]  ;;  %v1167_v2 = vld [vmem:[%s3625_s8 + $0x1f88] sm:$0xff] }
 0x23c   : > { %3191 = vst [vmem:[%s3648_s20 + $0x1ec0] sm:$0xff] %v2167_v19  ;;  %3192 = vst [vmem:[%s3648_s20 + $0x1ec8] sm:$0xff] %v2168_v20  ;;  %v1168_v3 = vld [vmem:[%s3625_s8 + $0x1f90] sm:$0xff]  ;;  %v2191_v4 = vmul.f32 %v3632_v1, %v1166_v0  ;;  %v2192_v5 = vmul.f32 %v3632_v1, %v1167_v2  ;;  %v1169_v7 = vld [vmem:[%s3625_s8 + $0x1f98] sm:$0xff] }
 0x23d   : > { %3193 = vst [vmem:[%s3648_s20 + $0x1ed0] sm:$0xff] %v2169_v21  ;;  %3194 = vst [vmem:[%s3648_s20 + $0x1ed8] sm:$0xff] %v2170_v25  ;;  %v2193_v6 = vmul.f32 %v3632_v1, %v1168_v3  ;;  %v1170_v8 = vld [vmem:[%s3625_s8 + $0x1fa0] sm:$0xff]  ;;  %v1171_v9 = vld [vmem:[%s3625_s8 + $0x1fa8] sm:$0xff]  ;;  %v2194_v10 = vmul.f32 %v3632_v1, %v1169_v7 }
 0x23e   : > { %3195 = vst [vmem:[%s3648_s20 + $0x1ee0] sm:$0xff] %v2171_v26  ;;  %3196 = vst [vmem:[%s3648_s20 + $0x1ee8] sm:$0xff] %v2172_v27  ;;  %v2195_v11 = vmul.f32 %v3632_v1, %v1170_v8  ;;  %v2196_v12 = vmul.f32 %v3632_v1, %v1171_v9  ;;  %v1172_v13 = vld [vmem:[%s3625_s8 + $0x1fb0] sm:$0xff]  ;;  %v1173_v14 = vld [vmem:[%s3625_s8 + $0x1fb8] sm:$0xff] }
 0x23f   : > { %3197 = vst [vmem:[%s3648_s20 + $0x1ef0] sm:$0xff] %v2173_v31  ;;  %3198 = vst [vmem:[%s3648_s20 + $0x1ef8] sm:$0xff] %v2174_v32  ;;  %v1174_v15 = vld [vmem:[%s3625_s8 + $0x1fc0] sm:$0xff]  ;;  %v2197_v16 = vmul.f32 %v3632_v1, %v1172_v13  ;;  %v2198_v17 = vmul.f32 %v3632_v1, %v1173_v14  ;;  %v1175_v19 = vld [vmem:[%s3625_s8 + $0x1fc8] sm:$0xff] }
 0x240   : > { %3199 = vst [vmem:[%s3648_s20 + $0x1f00] sm:$0xff] %v2175_v33  ;;  %3200 = vst [vmem:[%s3648_s20 + $0x1f08] sm:$0xff] %v2176_v37  ;;  %v2199_v18 = vmul.f32 %v3632_v1, %v1174_v15  ;;  %v1176_v20 = vld [vmem:[%s3625_s8 + $0x1fd0] sm:$0xff]  ;;  %v1177_v21 = vld [vmem:[%s3625_s8 + $0x1fd8] sm:$0xff]  ;;  %v2200_v22 = vmul.f32 %v3632_v1, %v1175_v19 }
 0x241   : > { %3201 = vst [vmem:[%s3648_s20 + $0x1f10] sm:$0xff] %v2177_v38  ;;  %3202 = vst [vmem:[%s3648_s20 + $0x1f18] sm:$0xff] %v2178_v39  ;;  %v2201_v23 = vmul.f32 %v3632_v1, %v1176_v20  ;;  %v2202_v24 = vmul.f32 %v3632_v1, %v1177_v21  ;;  %v1178_v25 = vld [vmem:[%s3625_s8 + $0x1fe0] sm:$0xff]  ;;  %v1179_v26 = vld [vmem:[%s3625_s8 + $0x1fe8] sm:$0xff] }
 0x242   : > { %3203 = vst [vmem:[%s3648_s20 + $0x1f20] sm:$0xff] %v2179_v43  ;;  %3204 = vst [vmem:[%s3648_s20 + $0x1f28] sm:$0xff] %v2180_v44  ;;  %v1180_v27 = vld [vmem:[%s3625_s8 + $0x1ff0] sm:$0xff]  ;;  %v2203_v28 = vmul.f32 %v3632_v1, %v1178_v25  ;;  %v2204_v29 = vmul.f32 %v3632_v1, %v1179_v26  ;;  %v1181_v31 = vld [vmem:[%s3625_s8 + $0x1ff8] sm:$0xff] }
 0x243   : > { %3205 = vst [vmem:[%s3648_s20 + $0x1f30] sm:$0xff] %v2181_v45  ;;  %3206 = vst [vmem:[%s3648_s20 + $0x1f38] sm:$0xff] %v2182_v49  ;;  %v2205_v30 = vmul.f32 %v3632_v1, %v1180_v27  ;;  %v2206_v32 = vmul.f32 %v3632_v1, %v1181_v31 }
 0x244   : > { %3207 = vst [vmem:[%s3648_s20 + $0x1f40] sm:$0xff] %v2183_v50  ;;  %3208 = vst [vmem:[%s3648_s20 + $0x1f48] sm:$0xff] %v2184_v51 }
 0x245   : > { %3209 = vst [vmem:[%s3648_s20 + $0x1f50] sm:$0xff] %v2185_v55  ;;  %3210 = vst [vmem:[%s3648_s20 + $0x1f58] sm:$0xff] %v2186_v56 }
 0x246   : > { %3211 = vst [vmem:[%s3648_s20 + $0x1f60] sm:$0xff] %v2187_v57  ;;  %3212 = vst [vmem:[%s3648_s20 + $0x1f68] sm:$0xff] %v2188_v61 }
 0x247   : > { %3213 = vst [vmem:[%s3648_s20 + $0x1f70] sm:$0xff] %v2189_v62  ;;  %3214 = vst [vmem:[%s3648_s20 + $0x1f78] sm:$0xff] %v2190_v63 }
 0x248   : > { %3215 = vst [vmem:[%s3648_s20 + $0x1f80] sm:$0xff] %v2191_v4  ;;  %3216 = vst [vmem:[%s3648_s20 + $0x1f88] sm:$0xff] %v2192_v5 }
 0x249   : > { %3217 = vst [vmem:[%s3648_s20 + $0x1f90] sm:$0xff] %v2193_v6  ;;  %3218 = vst [vmem:[%s3648_s20 + $0x1f98] sm:$0xff] %v2194_v10  ;;  %3238 = sbr.rel (!%p3565_p9) target bundleno = 620 (0x26c), region = 32 }
 0x24a   : > { %3219 = vst [vmem:[%s3648_s20 + $0x1fa0] sm:$0xff] %v2195_v11  ;;  %3220 = vst [vmem:[%s3648_s20 + $0x1fa8] sm:$0xff] %v2196_v12 }
 0x24b   : > { %3221 = vst [vmem:[%s3648_s20 + $0x1fb0] sm:$0xff] %v2197_v16  ;;  %3222 = vst [vmem:[%s3648_s20 + $0x1fb8] sm:$0xff] %v2198_v17 }
 0x24c   : > { %3223 = vst [vmem:[%s3648_s20 + $0x1fc0] sm:$0xff] %v2199_v18  ;;  %3224 = vst [vmem:[%s3648_s20 + $0x1fc8] sm:$0xff] %v2200_v22 }
 0x24d   : > { %3225 = vst [vmem:[%s3648_s20 + $0x1fd0] sm:$0xff] %v2201_v23  ;;  %3226 = vst [vmem:[%s3648_s20 + $0x1fd8] sm:$0xff] %v2202_v24 }
 0x24e   : > { %3227 = vst [vmem:[%s3648_s20 + $0x1fe0] sm:$0xff] %v2203_v28  ;;  %3228 = vst [vmem:[%s3648_s20 + $0x1fe8] sm:$0xff] %v2204_v29 }
 0x24f   : > { %3229 = vst [vmem:[%s3648_s20 + $0x1ff0] sm:$0xff] %v2205_v30  ;;  %3230 = vst [vmem:[%s3648_s20 + $0x1ff8] sm:$0xff] %v2206_v32 }
 0x250   : > { %s6786_s7 = smov (!%p3241_p6, %s3240_s7), 128 }
 0x251   : > { %s6711_s9 = sshll.u32 %s6786_s7, 10 }
 0x252   : > { %s3246_s10 = ssub.s32 131072, %s6711_s9 }
 0x253   : > { %3247 = vsyncadd %s3232_s29, %s3246_s10  ;;  %p3345_p10 = scmp.ne.s32.totalorder %s6711_s9, 0  ;;  %s3357_s21 = sshll.u32 %s3542_s0, 17 }
 0x254   : > { %s6721_s18 = scalar_lea.hbm %s6772_s2, %s3357_s21  ;;  %s3253_s23 = sshll.u32 %s3648_s20, 4  ;;  %s6724_s23 = int_to_ptr.vmem [resolvable:$true] %s3253_s23 }
 0x255   : > { %s3429_s24 = scalar_lea.vmem %s6724_s23, %s6711_s9  ;;  %s3500_s25 = smov [#allocation7]  }
 0x256   : > { %p3430_p9 = scmp.ne.s32.totalorder %s6724_s23, %s3429_s24  ;;  %s3433_s26 = sshll.u32 %s3500_s25, 4  ;;  %s3434_s26 = int_to_ptr.vmem [resolvable:$false] %s3433_s26 }
 0x257   : > { %s3435_s0 = scalar_lea.vmem %s3434_s26, 262144  ;;  %p3436_p12 = scmp.lt.s32.totalorder %s6724_s23, %s3434_s26 }
 0x258   : > { %p3431_p11 = pnand %p3430_p9, %p3345_p10  ;;  %p3437_p0 = scmp.lt.s32.totalorder %s3435_s0, %s3429_s24 }
 0x25a   : > { %p3432_p13 = pneg %p3431_p11  ;;  %p3438_p1 = por %p3437_p0, %p3436_p12 }
 0x25c   : > { %p3439_p3 = pnand %p3438_p1, %p3432_p13 }
 0x25e   : > { %3442 = shalt.err (!%p3439_p3)
}
 0x25f   : > { %s3443_s28 = scalar_lea.hbm %s6721_s18, %s6711_s9  ;;  %s3447_s5 = scalar_lea.hbm %s6772_s2, 133120 }
 0x260   : > { %p3444_p4 = scmp.ne.s32.totalorder %s6721_s18, %s3443_s28  ;;  %p3448_p7 = scmp.lt.u32.totalorder %s6721_s18, %s6772_s2 }
 0x261   : > { %p3449_p8 = scmp.lt.u32.totalorder %s3447_s5, %s3443_s28  ;;  %p3451_p9 = scmp.lt.u32.totalorder %s3443_s28, %s6721_s18 }
 0x262   : > { %p3445_p5 = pnand %p3444_p4, %p3345_p10 }
 0x263   : > { %p3450_p6 = por %p3449_p8, %p3448_p7 }
 0x264   : > { %p3446_p2 = pneg %p3445_p5 }
 0x265   : > { %p3452_p11 = por %p3451_p9, %p3450_p6 }
 0x267   : > { %p3453_p13 = pnand %p3452_p11, %p3446_p2 }
 0x269   : > { %3456 = shalt.err (!%p3453_p13)
}
 0x26a   : > { %s3501_s20 = smov 1024   ;;  %s3502_s6 = smov 64  }
 0x26b   : > { %3259 = dma.vmem_to_hbm [thread:$0]  (%p3345_p10), %s6724_s23, %s6711_s9, %s6721_s18, %s3232_s29, %s3501_s20, %s3501_s20, %s3502_s6  }
 0x26c PF: > { %s3268_s7 = sand.u32 1, %s3483_s11   ;;  %p6777_p12 = scmp.ne.s32.totalorder %s6776_s22, 0 }
 0x26d   : > { %p6778_p0 = scmp.ge.s32.totalorder %s3495_s14, 2  ;;  %s3269_s10 = scalar_lea.sflag [#allocation6], %s3268_s7 }
 0x26f   : > { %p3361_p1 = pnand %p6778_p0, %p6777_p12 }
 0x271   : > { %3478 = dma.done.wait (!%p3361_p1), %s3269_s10, 131072  }
 0x272   : > { %3480 = vsyncadd (!%p3361_p1), %s3269_s10, 4294836224  ;;  %p16_p3 = scmp.ge.s32.totalorder %s3546_s16, 4   ;;  %s6779_s11 = smov %s3487_s12 }
 0x273   : > { %s6780_s12 = smov %s3491_s13  ;;  %s6781_s13 = smov %s3558_s19 }
 0x274   : > { %s6782_s14 = smov %s3546_s16  ;;  %18 = sbr.rel (!%p16_p3) target bundleno = 7 (0x7), region = 69 }
 0x27b   :  { %3274 = vsyncpa [#allocation5], 1 }
 0x27c   :  { %3276 = vsyncpa [#allocation5 + $0x1], 1 }
 0x27d   :  { %3277 = vsyncpa [#allocation6], 1 }
 0x27e   :  { %3279 = vsyncpa [#allocation6 + $0x1], 1 }

</bundles_post_ra>
